<compile_context>
chip_gen: v7x
topology: tpu7x:2x2x1
jax: 0.10.0
libtpu: 0.0.40
codegen_flags: <defaults>
</compile_context>

<pallas_src>
import math
from functools import partial

import jax
import jax.numpy as jnp
from jax import lax
from jax.experimental import pallas as pl
from jax.experimental.pallas import tpu as pltpu


# ----------------------------- small JAX helpers (glue) -----------------------------

def silu(x):
    return x * jax.nn.sigmoid(x)


def rms_norm(x, weight, eps=1e-6):
    var = jnp.mean(x * x, axis=-1, keepdims=True)
    return x * lax.rsqrt(var + eps) * weight


def l2_norm(x):
    n = jnp.sqrt(jnp.sum(x * x, axis=-1, keepdims=True))
    return x / (n + 1e-5)


def inv_softplus(x):
    return x + math.log(-math.expm1(-x))


# ----------------------------- Pallas kernel -----------------------------

def _matT(a, b):
    # a @ b.T : contract last dim of a with last dim of b
    return lax.dot_general(a, b, (((1,), (1,)), ((), ())),
                           preferred_element_type=jnp.float32)


def _tmat(a, b):
    # a.T @ b : contract dim 0 of a with dim 0 of b
    return lax.dot_general(a, b, (((0,), (0,)), ((), ())),
                           preferred_element_type=jnp.float32)


def lact_kernel(w0_ref, w1_ref, w2_ref, q_ref, k_ref, v_ref, lr_ref, out_ref, *,
                chunk_size, nc, lr_dim, batch):
    """One head per grid step; weights stay resident across the in-kernel batch loop.

    Ref shapes:
      w0_ref, w2_ref : (1, d_h, d_in)
      w1_ref         : (1, d_out, d_h)
      q/k/v_ref      : (batch, 1, L, d_in)
      lr_ref         : (batch, 1, L, 3*lr_dim)   [lr0 | lr1 | lr2] along lanes
      out_ref        : (batch, 1, nc, chunk*d_out)   lane-dense chunk rows
    """
    f32 = jnp.float32
    d_h = w0_ref.shape[1]

    # Shared per-head initial fast weights.  w0 and w2 are fused along rows so
    # the activation matmuls, the dw0/dw2 gradient matmul, the additive update
    # and the per-row renormalisation all act on a single [2*d_h, d_in] tensor.
    w02_0 = jnp.concatenate([w0_ref[0].astype(f32), w2_ref[0].astype(f32)], axis=0)
    w1_0 = w1_ref[0].astype(f32)                                   # [d_out, d_h]
    w02_norm = jnp.sqrt(jnp.sum(w02_0 * w02_0, axis=-1, keepdims=True))
    w1_norm = jnp.sqrt(jnp.sum(w1_0 * w1_0, axis=-1, keepdims=True))

    for b in range(batch):              # static unroll: batch is tiny here
        w02 = w02_0
        w1 = w1_0
        # TODO(synk): switch to lax.fori_loop(..., unroll=True) carrying (w02, w1)
        #             once nc grows beyond a handful of chunks.
        for c in range(nc):
            s = c * chunk_size
            last = (c == nc - 1)

            qi = q_ref[b, 0, pl.ds(s, chunk_size), :].astype(f32)      # [chunk, d_in]
            if last:
                rows = qi
            else:
                ki = k_ref[b, 0, pl.ds(s, chunk_size), :].astype(f32)  # [chunk, d_in]
                rows = jnp.concatenate([qi, ki], axis=0)               # [2*chunk, d_in]

            # Single MXU push for q@W0^T, q@W2^T (and k@W0^T, k@W2^T when updating).
            act = _matT(rows, w02)                                     # [rows, 2*d_h]
            g = act[:chunk_size, :d_h]
            h = act[:chunk_size, d_h:]
            o = _matT(g * jax.nn.sigmoid(g) * h, w1)                   # [chunk, d_out]

            # Lane-dense writeback: [chunk, d_out] -> [1, chunk*d_out] by
            # concatenating sublane-row slices along lanes (robust Mosaic ops).
            row = jnp.concatenate([o[i:i + 1, :] for i in range(chunk_size)], axis=1)
            out_ref[b, 0, c:c + 1, :] = row.astype(out_ref.dtype)

            # ---- fast-weight gradient step on every chunk except the last ----
            if not last:
                vi = v_ref[b, 0, pl.ds(s, chunk_size), :].astype(f32)
                lrc = lr_ref[b, 0, pl.ds(s, chunk_size), :].astype(f32)
                lr0 = lrc[:, 0:lr_dim]
                lr1 = lrc[:, lr_dim:2 * lr_dim]
                lr2 = lrc[:, 2 * lr_dim:3 * lr_dim]

                gba = act[chunk_size:, :d_h]        # gate_before_act   [chunk, d_h]
                hbm_ = act[chunk_size:, d_h:]       # hidden_before_mul [chunk, d_h]
                sig = jax.nn.sigmoid(gba)
                silu_gba = gba * sig
                hidden = silu_gba * hbm_

                dhidden = jnp.dot(vi, w1, preferred_element_type=f32)  # [chunk, d_h]
                dhbm = dhidden * silu_gba
                dgate = dhidden * hbm_
                dgba = dgate * sig * (1.0 + gba * (1.0 - sig))         # silu backprop

                dw1 = _tmat(vi, hidden * lr1)                          # [d_out, d_h]
                # dw0/dw2 fused: fold lr into the left operand, one matmul.
                dg02 = jnp.concatenate([dgba * lr0, dhbm * lr2], axis=1)  # [chunk, 2*d_h]
                dw02 = _tmat(dg02, ki)                                    # [2*d_h, d_in]

                w02 = w02 + dw02
                w1 = w1 + dw1
                w02 = w02 * pl.reciprocal(
                    jnp.sqrt(jnp.sum(w02 * w02, -1, keepdims=True)) + 1e-5,
                    approx=True) * w02_norm
                w1 = w1 * pl.reciprocal(
                    jnp.sqrt(jnp.sum(w1 * w1, -1, keepdims=True)) + 1e-5,
                    approx=True) * w1_norm


def block_causal_lact_swiglu_pallas(w0_h, w1_h, w2_h, q, k, v, lr, chunk_size):
    """w0_h/w1_h/w2_h: per-head fast weights [n_heads, rows, cols] (NOT batch-tiled).
       q, k, v: [batch*n_heads, L, d]; lr: [batch*n_heads, L, 3*lr_dim]."""
    n_heads, d_h, d_in = w0_h.shape
    d_out = w1_h.shape[1]
    B, L, _ = q.shape
    assert B % n_heads == 0, "leading dim must be batch*n_heads"
    batch = B // n_heads
    assert L % chunk_size == 0, "this kernel assumes seq_len % chunk_size == 0"
    nc = L // chunk_size
    lr_dim = lr.shape[-1] // 3
    # ki*lr0 / hidden*lr1 broadcasts assume one lr scalar per token (same latent
    # assumption as the reference implementation).
    assert lr_dim == 1, "kernel assumes lact_lr_dim == 1"

    # Free reshapes only: no HBM concat of q/k/v.
    q4 = q.reshape(batch, n_heads, L, d_in)
    k4 = k.reshape(batch, n_heads, L, d_in)
    v4 = v.reshape(batch, n_heads, L, d_in)
    lr4 = lr.reshape(batch, n_heads, L, 3 * lr_dim)

    kernel = partial(lact_kernel, chunk_size=chunk_size, nc=nc,
                     lr_dim=lr_dim, batch=batch)

    head_map = lambda hi: (hi, 0, 0)         # per-head weights resident for the step
    seq_map = lambda hi: (0, hi, 0, 0)       # all batches for this head in one block

    out = pl.pallas_call(
        kernel,
        out_shape=jax.ShapeDtypeStruct((batch, n_heads, nc, chunk_size * d_out), q.dtype),
        grid_spec=pltpu.PrefetchScalarGridSpec(
            num_scalar_prefetch=0,
            grid=(n_heads,),
            in_specs=[
                pl.BlockSpec((1, d_h, d_in), head_map),
                pl.BlockSpec((1, d_out, d_h), head_map),
                pl.BlockSpec((1, d_h, d_in), head_map),
                pl.BlockSpec((batch, 1, L, d_in), seq_map),
                pl.BlockSpec((batch, 1, L, d_in), seq_map),
                pl.BlockSpec((batch, 1, L, d_in), seq_map),
                pl.BlockSpec((batch, 1, L, 3 * lr_dim), seq_map),
            ],
            out_specs=pl.BlockSpec((batch, 1, nc, chunk_size * d_out), seq_map),
        ),
        compiler_params=pltpu.CompilerParams(
            dimension_semantics=("parallel",),       # both v7x TCs get one head each
            vmem_limit_bytes=32 * 1024 * 1024),      # scaling guard; tiny shapes here
    )(w0_h, w1_h, w2_h, q4, k4, v4, lr4)

    # Undo the lane-dense packing with free reshapes:
    # (batch, n_heads, nc, chunk*d_out) -> (batch*n_heads, L, d_out)
    return out.reshape(batch * n_heads, L, d_out)


# ----------------------------- pure-JAX reference for the hot path -----------------------------

def block_causal_lact_swiglu_ref(w0_h, w1_h, w2_h, q, k, v, lr, chunk_size):
    B, L, _ = q.shape
    n_heads = w0_h.shape[0]
    batch = B // n_heads
    lr_dim = lr.shape[-1] // 3
    w0 = jnp.tile(w0_h, (batch, 1, 1))
    w1 = jnp.tile(w1_h, (batch, 1, 1))
    w2 = jnp.tile(w2_h, (batch, 1, 1))
    lr0 = lr[..., 0:lr_dim]
    lr1 = lr[..., lr_dim:2 * lr_dim]
    lr2 = lr[..., 2 * lr_dim:3 * lr_dim]

    nc = L // chunk_size
    w0n = jnp.linalg.norm(w0, axis=2, keepdims=True)
    w1n = jnp.linalg.norm(w1, axis=2, keepdims=True)
    w2n = jnp.linalg.norm(w2, axis=2, keepdims=True)
    outs = []
    for c in range(nc):
        s, e = c * chunk_size, (c + 1) * chunk_size
        qi = q[:, s:e]
        h = jnp.einsum('bhd,bld->blh', w2, qi)
        g = jnp.einsum('bhd,bld->blh', w0, qi)
        outs.append(jnp.einsum('boh,blh->blo', w1, silu(g) * h))
        if c < nc - 1:
            ki, vi = k[:, s:e], v[:, s:e]
            gba = jnp.einsum('bhd,bld->blh', w0, ki)
            hbm = jnp.einsum('bhd,bld->blh', w2, ki)
            hidden = silu(gba) * hbm
            dhidden = jnp.einsum('boh,blo->blh', w1, vi)
            dhbm = dhidden * silu(gba)
            dgate = dhidden * hbm
            sig = jax.nn.sigmoid(gba)
            dgba = dgate * sig * (1.0 + gba * (1.0 - sig))
            dw1 = jnp.einsum('blo,blh->boh', vi, hidden * lr1[:, s:e])
            dw0 = jnp.einsum('blh,bld->bhd', dgba, ki * lr0[:, s:e])
            dw2 = jnp.einsum('blh,bld->bhd', dhbm, ki * lr2[:, s:e])
            w0, w1, w2 = w0 + dw0, w1 + dw1, w2 + dw2
            w0 = w0 / (jnp.linalg.norm(w0, axis=2, keepdims=True) + 1e-5) * w0n
            w1 = w1 / (jnp.linalg.norm(w1, axis=2, keepdims=True) + 1e-5) * w1n
            w2 = w2 / (jnp.linalg.norm(w2, axis=2, keepdims=True) + 1e-5) * w2n
    return jnp.concatenate(outs, axis=1)


# ----------------------------- full LaCT forward -----------------------------

def lact_forward(params, hidden_states, cfg, block_fn):
    b, l, d = hidden_states.shape
    n_h = cfg["n_heads"]
    d_head = cfg["d_head"]
    lr_dim = cfg["lact_lr_dim"]
    chunk = cfg["chunk_size"]

    qkv = hidden_states @ params["qkv_w"].T                   # (b, l, 3d)
    q, k, v = jnp.split(qkv, 3, axis=-1)
    q = rms_norm(q, params["q_norm_w"])
    k = rms_norm(k, params["k_norm_w"])

    def to_heads(x):
        return x.reshape(b, l, n_h, d_head).transpose(0, 2, 1, 3).reshape(b * n_h, l, d_head)

    q, k, v = to_heads(q), to_heads(k), to_heads(v)
    q, k, v = l2_norm(silu(q)), l2_norm(silu(k)), silu(v)

    lr = hidden_states @ params["lr_w"].T + params["lr_b"]
    lr = jax.nn.softplus(lr.astype(jnp.float32) + cfg["base_lr_inv"])
    fw_lr = lr.reshape(b, l, n_h, 3 * lr_dim).transpose(0, 2, 1, 3).reshape(b * n_h, l, 3 * lr_dim)

    # torch call: block_causal_lact_swiglu(w0, w1, w2, q, k, v, lr0=fw_lr1, lr1=fw_lr2, lr2=fw_lr3)
    # Fast weights are passed per-head (no batch tiling); lr thirds are split inside.
    o = block_fn(params["w0"], params["w1"], params["w2"], q, k, v, fw_lr, chunk)

    # NOTE: the reference asserts len(o.shape)==4 although its block fn returns 3D;
    # the only interpretation consistent with out_proj is merging heads back:
    o = o.reshape(b, n_h, l, d_head).transpose(0, 2, 1, 3).reshape(b, l, d)
    out = o @ params["out_w"].T
    return out


# ----------------------------- main -----------------------------

if __name__ == "__main__":
    d_model = 32
    n_heads = 2
    d_head = d_model // n_heads          # 16
    inter_multi = 2                      # expand_factor * lact_expand_factor
    d_h = d_head * inter_multi           # 32
    chunk_size = 8
    lact_lr_dim = 1
    lr_dim_total = lact_lr_dim * 3 * n_heads
    batch, seqlen = 2, 32

    cfg = dict(n_heads=n_heads, d_head=d_head, d_h=d_h, chunk_size=chunk_size,
               lact_lr_dim=lact_lr_dim, base_lr_inv=inv_softplus(0.001))

    key = jax.random.PRNGKey(0)
    ks = jax.random.split(key, 8)
    params = {
        "qkv_w": jax.random.normal(ks[0], (3 * d_model, d_model), jnp.float32) / math.sqrt(d_model),
        "q_norm_w": jnp.ones((d_model,), jnp.float32),
        "k_norm_w": jnp.ones((d_model,), jnp.float32),
        "w0": jax.random.normal(ks[1], (n_heads, d_h, d_head), jnp.float32) / math.sqrt(d_head),
        "w2": jax.random.normal(ks[2], (n_heads, d_h, d_head), jnp.float32) / math.sqrt(d_head),
        "w1": jax.random.normal(ks[3], (n_heads, d_head, d_h), jnp.float32) / math.sqrt(d_h),
        "lr_w": jax.random.normal(ks[4], (lr_dim_total, d_model), jnp.float32) / math.sqrt(d_model),
        "lr_b": jnp.zeros((lr_dim_total,), jnp.float32),
        "out_w": jax.random.normal(ks[5], (d_model, d_model), jnp.float32) / math.sqrt(d_model),
    }

    x = jax.random.normal(ks[6], (batch, seqlen, d_model), jnp.float32)

    out_pallas = lact_forward(params, x, cfg, block_causal_lact_swiglu_pallas)
    jax.block_until_ready(out_pallas)

    out_ref = lact_forward(params, x, cfg, block_causal_lact_swiglu_ref)
    jax.block_until_ready(out_ref)

    max_err = float(jnp.max(jnp.abs(out_pallas - out_ref)))
    if max_err > 1e-2:
        raise AssertionError(f"Pallas kernel mismatch vs reference, max abs err = {max_err}")

    print("KERNEL_OK")
</pallas_src>

<mosaic_0001>
module attributes {stable_mosaic.version = 11 : i64} {
  func.func @lact_kernel(%arg0: i32, %arg1: memref<1x32x16xf32, #tpu.memory_space<vmem>>, %arg2: memref<1x16x32xf32, #tpu.memory_space<vmem>>, %arg3: memref<1x32x16xf32, #tpu.memory_space<vmem>>, %arg4: memref<2x1x32x16xf32, #tpu.memory_space<vmem>>, %arg5: memref<2x1x32x16xf32, #tpu.memory_space<vmem>>, %arg6: memref<2x1x32x16xf32, #tpu.memory_space<vmem>>, %arg7: memref<2x1x32x3xf32, #tpu.memory_space<vmem>>, %arg8: memref<2x1x4x128xf32, #tpu.memory_space<vmem>>) attributes {dimension_semantics = [#tpu.dimension_semantics<parallel>], iteration_bounds = array<i64: 2>, scalar_prefetch = 0 : i64, scratch_operands = 0 : i64, tpu.core_type = #tpu.core_type<tc>, window_params = [{transform_indices = @transform_0, window_bounds = array<i64: 1, 32, 16>}, {transform_indices = @transform_1, window_bounds = array<i64: 1, 16, 32>}, {transform_indices = @transform_2, window_bounds = array<i64: 1, 32, 16>}, {transform_indices = @transform_3, window_bounds = array<i64: 2, 1, 32, 16>}, {transform_indices = @transform_4, window_bounds = array<i64: 2, 1, 32, 16>}, {transform_indices = @transform_5, window_bounds = array<i64: 2, 1, 32, 16>}, {transform_indices = @transform_6, window_bounds = array<i64: 2, 1, 32, 3>}, {transform_indices = @transform_7, window_bounds = array<i64: 2, 1, 4, 128>}]} {
    %c0 = arith.constant 0 : index
    %c0_0 = arith.constant 0 : index
    %c0_1 = arith.constant 0 : index
    %0 = vector.load %arg1[%c0, %c0_0, %c0_1] : memref<1x32x16xf32, #tpu.memory_space<vmem>>, vector<1x32x16xf32>
    %1 = vector.shape_cast %0 : vector<1x32x16xf32> to vector<32x16xf32>
    %c0_2 = arith.constant 0 : index
    %c0_3 = arith.constant 0 : index
    %c0_4 = arith.constant 0 : index
    %2 = vector.load %arg3[%c0_2, %c0_3, %c0_4] : memref<1x32x16xf32, #tpu.memory_space<vmem>>, vector<1x32x16xf32>
    %3 = vector.shape_cast %2 : vector<1x32x16xf32> to vector<32x16xf32>
    %4 = tpu.concatenate %1, %3 in 0 : vector<32x16xf32>, vector<32x16xf32> -> vector<64x16xf32>
    %c0_5 = arith.constant 0 : index
    %c0_6 = arith.constant 0 : index
    %c0_7 = arith.constant 0 : index
    %5 = vector.load %arg2[%c0_5, %c0_6, %c0_7] : memref<1x16x32xf32, #tpu.memory_space<vmem>>, vector<1x16x32xf32>
    %6 = vector.shape_cast %5 : vector<1x16x32xf32> to vector<16x32xf32>
    %7 = arith.mulf %4, %4 : vector<64x16xf32>
    %cst = arith.constant dense<0.000000e+00> : vector<64xf32>
    %8 = vector.multi_reduction <add>, %7, %cst [1] : vector<64x16xf32> to vector<64xf32>
    %9 = vector.shape_cast %8 : vector<64xf32> to vector<64x1xf32>
    %10 = math.sqrt %9 : vector<64x1xf32>
    %11 = arith.mulf %6, %6 : vector<16x32xf32>
    %cst_8 = arith.constant dense<0.000000e+00> : vector<16xf32>
    %12 = vector.multi_reduction <add>, %11, %cst_8 [1] : vector<16x32xf32> to vector<16xf32>
    %13 = vector.shape_cast %12 : vector<16xf32> to vector<16x1xf32>
    %14 = math.sqrt %13 : vector<16x1xf32>
    %c0_9 = arith.constant 0 : index
    %c0_10 = arith.constant 0 : index
    %c0_11 = arith.constant 0 : index
    %c0_12 = arith.constant 0 : index
    %15 = vector.load %arg4[%c0_9, %c0_10, %c0_11, %c0_12] : memref<2x1x32x16xf32, #tpu.memory_space<vmem>>, vector<1x1x8x16xf32>
    %16 = vector.shape_cast %15 : vector<1x1x8x16xf32> to vector<8x16xf32>
    %c0_13 = arith.constant 0 : index
    %c0_14 = arith.constant 0 : index
    %c0_15 = arith.constant 0 : index
    %c0_16 = arith.constant 0 : index
    %17 = vector.load %arg5[%c0_13, %c0_14, %c0_15, %c0_16] : memref<2x1x32x16xf32, #tpu.memory_space<vmem>>, vector<1x1x8x16xf32>
    %18 = vector.shape_cast %17 : vector<1x1x8x16xf32> to vector<8x16xf32>
    %19 = tpu.concatenate %16, %18 in 0 : vector<8x16xf32>, vector<8x16xf32> -> vector<16x16xf32>
    %cst_17 = arith.constant dense<0.000000e+00> : vector<16x64xf32>
    %20 = tpu.matmul %19, %4, %cst_17 {dimension_numbers = #tpu.dot_dimension_numbers<[1], [1], [0], [0], [0, 0, 1, 0], [], []>} : vector<16x16xf32>, vector<64x16xf32>, vector<16x64xf32> -> vector<16x64xf32>
    %21 = vector.extract_strided_slice %20 {offsets = [0, 0], sizes = [8, 32], strides = [1, 1]} : vector<16x64xf32> to vector<8x32xf32>
    %22 = vector.extract_strided_slice %20 {offsets = [0, 32], sizes = [8, 32], strides = [1, 1]} : vector<16x64xf32> to vector<8x32xf32>
    %23 = arith.negf %21 : vector<8x32xf32>
    %24 = math.exp %23 : vector<8x32xf32>
    %cst_18 = arith.constant 1.000000e+00 : f32
    %25 = vector.broadcast %cst_18 : f32 to vector<8x32xf32>
    %26 = arith.addf %25, %24 : vector<8x32xf32>
    %27 = arith.divf %25, %26 : vector<8x32xf32>
    %28 = arith.mulf %21, %27 : vector<8x32xf32>
    %29 = arith.mulf %28, %22 : vector<8x32xf32>
    %cst_19 = arith.constant dense<0.000000e+00> : vector<8x16xf32>
    %30 = tpu.matmul %29, %6, %cst_19 {dimension_numbers = #tpu.dot_dimension_numbers<[1], [1], [0], [0], [0, 0, 1, 0], [], []>} : vector<8x32xf32>, vector<16x32xf32>, vector<8x16xf32> -> vector<8x16xf32>
    %31 = vector.extract_strided_slice %30 {offsets = [0, 0], sizes = [1, 16], strides = [1, 1]} : vector<8x16xf32> to vector<1x16xf32>
    %32 = vector.extract_strided_slice %30 {offsets = [1, 0], sizes = [1, 16], strides = [1, 1]} : vector<8x16xf32> to vector<1x16xf32>
    %33 = vector.extract_strided_slice %30 {offsets = [2, 0], sizes = [1, 16], strides = [1, 1]} : vector<8x16xf32> to vector<1x16xf32>
    %34 = vector.extract_strided_slice %30 {offsets = [3, 0], sizes = [1, 16], strides = [1, 1]} : vector<8x16xf32> to vector<1x16xf32>
    %35 = vector.extract_strided_slice %30 {offsets = [4, 0], sizes = [1, 16], strides = [1, 1]} : vector<8x16xf32> to vector<1x16xf32>
    %36 = vector.extract_strided_slice %30 {offsets = [5, 0], sizes = [1, 16], strides = [1, 1]} : vector<8x16xf32> to vector<1x16xf32>
    %37 = vector.extract_strided_slice %30 {offsets = [6, 0], sizes = [1, 16], strides = [1, 1]} : vector<8x16xf32> to vector<1x16xf32>
    %38 = vector.extract_strided_slice %30 {offsets = [7, 0], sizes = [1, 16], strides = [1, 1]} : vector<8x16xf32> to vector<1x16xf32>
    %39 = tpu.concatenate %31, %32, %33, %34, %35, %36, %37, %38 in 1 : vector<1x16xf32>, vector<1x16xf32>, vector<1x16xf32>, vector<1x16xf32>, vector<1x16xf32>, vector<1x16xf32>, vector<1x16xf32>, vector<1x16xf32> -> vector<1x128xf32>
    %c0_20 = arith.constant 0 : index
    %c0_21 = arith.constant 0 : index
    %c0_22 = arith.constant 0 : index
    %c0_23 = arith.constant 0 : index
    %40 = vector.load %arg8[%c0_20, %c0_21, %c0_22, %c0_23] : memref<2x1x4x128xf32, #tpu.memory_space<vmem>>, vector<1x1x1x128xf32>
    %41 = vector.shape_cast %40 : vector<1x1x1x128xf32> to vector<1x128xf32>
    %42 = vector.shape_cast %39 : vector<1x128xf32> to vector<1x1x1x128xf32>
    tpu.vector_store %arg8[%c0_20, %c0_21, %c0_22, %c0_23], %42 {strides = array<i32>} : memref<2x1x4x128xf32, #tpu.memory_space<vmem>>, vector<1x1x1x128xf32>,
    %c0_24 = arith.constant 0 : index
    %c0_25 = arith.constant 0 : index
    %c0_26 = arith.constant 0 : index
    %c0_27 = arith.constant 0 : index
    %43 = vector.load %arg6[%c0_24, %c0_25, %c0_26, %c0_27] : memref<2x1x32x16xf32, #tpu.memory_space<vmem>>, vector<1x1x8x16xf32>
    %44 = vector.shape_cast %43 : vector<1x1x8x16xf32> to vector<8x16xf32>
    %c0_28 = arith.constant 0 : index
    %c0_29 = arith.constant 0 : index
    %c0_30 = arith.constant 0 : index
    %c0_31 = arith.constant 0 : index
    %45 = vector.load %arg7[%c0_28, %c0_29, %c0_30, %c0_31] : memref<2x1x32x3xf32, #tpu.memory_space<vmem>>, vector<1x1x8x3xf32>
    %46 = vector.shape_cast %45 : vector<1x1x8x3xf32> to vector<8x3xf32>
    %47 = vector.extract_strided_slice %46 {offsets = [0, 0], sizes = [8, 1], strides = [1, 1]} : vector<8x3xf32> to vector<8x1xf32>
    %48 = vector.extract_strided_slice %46 {offsets = [0, 1], sizes = [8, 1], strides = [1, 1]} : vector<8x3xf32> to vector<8x1xf32>
    %49 = vector.extract_strided_slice %46 {offsets = [0, 2], sizes = [8, 1], strides = [1, 1]} : vector<8x3xf32> to vector<8x1xf32>
    %50 = vector.extract_strided_slice %20 {offsets = [8, 0], sizes = [8, 32], strides = [1, 1]} : vector<16x64xf32> to vector<8x32xf32>
    %51 = vector.extract_strided_slice %20 {offsets = [8, 32], sizes = [8, 32], strides = [1, 1]} : vector<16x64xf32> to vector<8x32xf32>
    %52 = arith.negf %50 : vector<8x32xf32>
    %53 = math.exp %52 : vector<8x32xf32>
    %cst_32 = arith.constant 1.000000e+00 : f32
    %54 = vector.broadcast %cst_32 : f32 to vector<8x32xf32>
    %55 = arith.addf %54, %53 : vector<8x32xf32>
    %56 = arith.divf %54, %55 : vector<8x32xf32>
    %57 = arith.mulf %50, %56 : vector<8x32xf32>
    %58 = arith.mulf %57, %51 : vector<8x32xf32>
    %cst_33 = arith.constant dense<0.000000e+00> : vector<8x32xf32>
    %59 = tpu.matmul %44, %6, %cst_33 {dimension_numbers = #tpu.dot_dimension_numbers<[1], [0], [0], [1], [0, 0, 1, 1], [], []>} : vector<8x16xf32>, vector<16x32xf32>, vector<8x32xf32> -> vector<8x32xf32>
    %60 = arith.mulf %59, %57 : vector<8x32xf32>
    %61 = arith.mulf %59, %51 : vector<8x32xf32>
    %62 = arith.mulf %61, %56 : vector<8x32xf32>
    %cst_34 = arith.constant 1.000000e+00 : f32
    %63 = vector.broadcast %cst_34 : f32 to vector<8x32xf32>
    %64 = arith.subf %63, %56 : vector<8x32xf32>
    %65 = arith.mulf %50, %64 : vector<8x32xf32>
    %cst_35 = arith.constant 1.000000e+00 : f32
    %66 = vector.broadcast %cst_35 : f32 to vector<8x32xf32>
    %67 = arith.addf %66, %65 : vector<8x32xf32>
    %68 = arith.mulf %62, %67 : vector<8x32xf32>
    %69 = vector.broadcast %48 : vector<8x1xf32> to vector<8x32xf32>
    %70 = arith.mulf %58, %69 : vector<8x32xf32>
    %cst_36 = arith.constant dense<0.000000e+00> : vector<16x32xf32>
    %71 = tpu.matmul %44, %70, %cst_36 {dimension_numbers = #tpu.dot_dimension_numbers<[0], [0], [1], [1], [0, 1, 1, 1], [], []>} : vector<8x16xf32>, vector<8x32xf32>, vector<16x32xf32> -> vector<16x32xf32>
    %72 = vector.broadcast %47 : vector<8x1xf32> to vector<8x32xf32>
    %73 = arith.mulf %68, %72 : vector<8x32xf32>
    %74 = vector.broadcast %49 : vector<8x1xf32> to vector<8x32xf32>
    %75 = arith.mulf %60, %74 : vector<8x32xf32>
    %76 = tpu.concatenate %73, %75 in 1 : vector<8x32xf32>, vector<8x32xf32> -> vector<8x64xf32>
    %cst_37 = arith.constant dense<0.000000e+00> : vector<64x16xf32>
    %77 = tpu.matmul %76, %18, %cst_37 {dimension_numbers = #tpu.dot_dimension_numbers<[0], [0], [1], [1], [0, 1, 1, 1], [], []>} : vector<8x64xf32>, vector<8x16xf32>, vector<64x16xf32> -> vector<64x16xf32>
    %78 = arith.addf %4, %77 : vector<64x16xf32>
    %79 = arith.addf %6, %71 : vector<16x32xf32>
    %80 = arith.mulf %78, %78 : vector<64x16xf32>
    %cst_38 = arith.constant dense<0.000000e+00> : vector<64xf32>
    %81 = vector.multi_reduction <add>, %80, %cst_38 [1] : vector<64x16xf32> to vector<64xf32>
    %82 = vector.shape_cast %81 : vector<64xf32> to vector<64x1xf32>
    %83 = math.sqrt %82 : vector<64x1xf32>
    %cst_39 = arith.constant 9.99999974E-6 : f32
    %84 = vector.broadcast %cst_39 : f32 to vector<64x1xf32>
    %85 = arith.addf %83, %84 : vector<64x1xf32>
    %86 = tpu.reciprocal %85 {approx = true} : vector<64x1xf32> -> vector<64x1xf32>
    %87 = vector.broadcast %86 : vector<64x1xf32> to vector<64x16xf32>
    %88 = arith.mulf %78, %87 : vector<64x16xf32>
    %89 = vector.broadcast %10 : vector<64x1xf32> to vector<64x16xf32>
    %90 = arith.mulf %88, %89 : vector<64x16xf32>
    %91 = arith.mulf %79, %79 : vector<16x32xf32>
    %cst_40 = arith.constant dense<0.000000e+00> : vector<16xf32>
    %92 = vector.multi_reduction <add>, %91, %cst_40 [1] : vector<16x32xf32> to vector<16xf32>
    %93 = vector.shape_cast %92 : vector<16xf32> to vector<16x1xf32>
    %94 = math.sqrt %93 : vector<16x1xf32>
    %cst_41 = arith.constant 9.99999974E-6 : f32
    %95 = vector.broadcast %cst_41 : f32 to vector<16x1xf32>
    %96 = arith.addf %94, %95 : vector<16x1xf32>
    %97 = tpu.reciprocal %96 {approx = true} : vector<16x1xf32> -> vector<16x1xf32>
    %98 = vector.broadcast %97 : vector<16x1xf32> to vector<16x32xf32>
    %99 = arith.mulf %79, %98 : vector<16x32xf32>
    %100 = vector.broadcast %14 : vector<16x1xf32> to vector<16x32xf32>
    %101 = arith.mulf %99, %100 : vector<16x32xf32>
    %c0_42 = arith.constant 0 : index
    %c0_43 = arith.constant 0 : index
    %c8 = arith.constant 8 : index
    %c0_44 = arith.constant 0 : index
    %102 = vector.load %arg4[%c0_42, %c0_43, %c8, %c0_44] : memref<2x1x32x16xf32, #tpu.memory_space<vmem>>, vector<1x1x8x16xf32>
    %103 = vector.shape_cast %102 : vector<1x1x8x16xf32> to vector<8x16xf32>
    %c0_45 = arith.constant 0 : index
    %c0_46 = arith.constant 0 : index
    %c8_47 = arith.constant 8 : index
    %c0_48 = arith.constant 0 : index
    %104 = vector.load %arg5[%c0_45, %c0_46, %c8_47, %c0_48] : memref<2x1x32x16xf32, #tpu.memory_space<vmem>>, vector<1x1x8x16xf32>
    %105 = vector.shape_cast %104 : vector<1x1x8x16xf32> to vector<8x16xf32>
    %106 = tpu.concatenate %103, %105 in 0 : vector<8x16xf32>, vector<8x16xf32> -> vector<16x16xf32>
    %cst_49 = arith.constant dense<0.000000e+00> : vector<16x64xf32>
    %107 = tpu.matmul %106, %90, %cst_49 {dimension_numbers = #tpu.dot_dimension_numbers<[1], [1], [0], [0], [0, 0, 1, 0], [], []>} : vector<16x16xf32>, vector<64x16xf32>, vector<16x64xf32> -> vector<16x64xf32>
    %108 = vector.extract_strided_slice %107 {offsets = [0, 0], sizes = [8, 32], strides = [1, 1]} : vector<16x64xf32> to vector<8x32xf32>
    %109 = vector.extract_strided_slice %107 {offsets = [0, 32], sizes = [8, 32], strides = [1, 1]} : vector<16x64xf32> to vector<8x32xf32>
    %110 = arith.negf %108 : vector<8x32xf32>
    %111 = math.exp %110 : vector<8x32xf32>
    %cst_50 = arith.constant 1.000000e+00 : f32
    %112 = vector.broadcast %cst_50 : f32 to vector<8x32xf32>
    %113 = arith.addf %112, %111 : vector<8x32xf32>
    %114 = arith.divf %112, %113 : vector<8x32xf32>
    %115 = arith.mulf %108, %114 : vector<8x32xf32>
    %116 = arith.mulf %115, %109 : vector<8x32xf32>
    %cst_51 = arith.constant dense<0.000000e+00> : vector<8x16xf32>
    %117 = tpu.matmul %116, %101, %cst_51 {dimension_numbers = #tpu.dot_dimension_numbers<[1], [1], [0], [0], [0, 0, 1, 0], [], []>} : vector<8x32xf32>, vector<16x32xf32>, vector<8x16xf32> -> vector<8x16xf32>
    %118 = vector.extract_strided_slice %117 {offsets = [0, 0], sizes = [1, 16], strides = [1, 1]} : vector<8x16xf32> to vector<1x16xf32>
    %119 = vector.extract_strided_slice %117 {offsets = [1, 0], sizes = [1, 16], strides = [1, 1]} : vector<8x16xf32> to vector<1x16xf32>
    %120 = vector.extract_strided_slice %117 {offsets = [2, 0], sizes = [1, 16], strides = [1, 1]} : vector<8x16xf32> to vector<1x16xf32>
    %121 = vector.extract_strided_slice %117 {offsets = [3, 0], sizes = [1, 16], strides = [1, 1]} : vector<8x16xf32> to vector<1x16xf32>
    %122 = vector.extract_strided_slice %117 {offsets = [4, 0], sizes = [1, 16], strides = [1, 1]} : vector<8x16xf32> to vector<1x16xf32>
    %123 = vector.extract_strided_slice %117 {offsets = [5, 0], sizes = [1, 16], strides = [1, 1]} : vector<8x16xf32> to vector<1x16xf32>
    %124 = vector.extract_strided_slice %117 {offsets = [6, 0], sizes = [1, 16], strides = [1, 1]} : vector<8x16xf32> to vector<1x16xf32>
    %125 = vector.extract_strided_slice %117 {offsets = [7, 0], sizes = [1, 16], strides = [1, 1]} : vector<8x16xf32> to vector<1x16xf32>
    %126 = tpu.concatenate %118, %119, %120, %121, %122, %123, %124, %125 in 1 : vector<1x16xf32>, vector<1x16xf32>, vector<1x16xf32>, vector<1x16xf32>, vector<1x16xf32>, vector<1x16xf32>, vector<1x16xf32>, vector<1x16xf32> -> vector<1x128xf32>
    %c0_52 = arith.constant 0 : index
    %c0_53 = arith.constant 0 : index
    %c1 = arith.constant 1 : index
    %c0_54 = arith.constant 0 : index
    %127 = vector.load %arg8[%c0_52, %c0_53, %c1, %c0_54] : memref<2x1x4x128xf32, #tpu.memory_space<vmem>>, vector<1x1x1x128xf32>
    %128 = vector.shape_cast %127 : vector<1x1x1x128xf32> to vector<1x128xf32>
    %129 = vector.shape_cast %126 : vector<1x128xf32> to vector<1x1x1x128xf32>
    tpu.vector_store %arg8[%c0_52, %c0_53, %c1, %c0_54], %129 {strides = array<i32>} : memref<2x1x4x128xf32, #tpu.memory_space<vmem>>, vector<1x1x1x128xf32>,
    %c0_55 = arith.constant 0 : index
    %c0_56 = arith.constant 0 : index
    %c8_57 = arith.constant 8 : index
    %c0_58 = arith.constant 0 : index
    %130 = vector.load %arg6[%c0_55, %c0_56, %c8_57, %c0_58] : memref<2x1x32x16xf32, #tpu.memory_space<vmem>>, vector<1x1x8x16xf32>
    %131 = vector.shape_cast %130 : vector<1x1x8x16xf32> to vector<8x16xf32>
    %c0_59 = arith.constant 0 : index
    %c0_60 = arith.constant 0 : index
    %c8_61 = arith.constant 8 : index
    %c0_62 = arith.constant 0 : index
    %132 = vector.load %arg7[%c0_59, %c0_60, %c8_61, %c0_62] : memref<2x1x32x3xf32, #tpu.memory_space<vmem>>, vector<1x1x8x3xf32>
    %133 = vector.shape_cast %132 : vector<1x1x8x3xf32> to vector<8x3xf32>
    %134 = vector.extract_strided_slice %133 {offsets = [0, 0], sizes = [8, 1], strides = [1, 1]} : vector<8x3xf32> to vector<8x1xf32>
    %135 = vector.extract_strided_slice %133 {offsets = [0, 1], sizes = [8, 1], strides = [1, 1]} : vector<8x3xf32> to vector<8x1xf32>
    %136 = vector.extract_strided_slice %133 {offsets = [0, 2], sizes = [8, 1], strides = [1, 1]} : vector<8x3xf32> to vector<8x1xf32>
    %137 = vector.extract_strided_slice %107 {offsets = [8, 0], sizes = [8, 32], strides = [1, 1]} : vector<16x64xf32> to vector<8x32xf32>
    %138 = vector.extract_strided_slice %107 {offsets = [8, 32], sizes = [8, 32], strides = [1, 1]} : vector<16x64xf32> to vector<8x32xf32>
    %139 = arith.negf %137 : vector<8x32xf32>
    %140 = math.exp %139 : vector<8x32xf32>
    %cst_63 = arith.constant 1.000000e+00 : f32
    %141 = vector.broadcast %cst_63 : f32 to vector<8x32xf32>
    %142 = arith.addf %141, %140 : vector<8x32xf32>
    %143 = arith.divf %141, %142 : vector<8x32xf32>
    %144 = arith.mulf %137, %143 : vector<8x32xf32>
    %145 = arith.mulf %144, %138 : vector<8x32xf32>
    %cst_64 = arith.constant dense<0.000000e+00> : vector<8x32xf32>
    %146 = tpu.matmul %131, %101, %cst_64 {dimension_numbers = #tpu.dot_dimension_numbers<[1], [0], [0], [1], [0, 0, 1, 1], [], []>} : vector<8x16xf32>, vector<16x32xf32>, vector<8x32xf32> -> vector<8x32xf32>
    %147 = arith.mulf %146, %144 : vector<8x32xf32>
    %148 = arith.mulf %146, %138 : vector<8x32xf32>
    %149 = arith.mulf %148, %143 : vector<8x32xf32>
    %cst_65 = arith.constant 1.000000e+00 : f32
    %150 = vector.broadcast %cst_65 : f32 to vector<8x32xf32>
    %151 = arith.subf %150, %143 : vector<8x32xf32>
    %152 = arith.mulf %137, %151 : vector<8x32xf32>
    %cst_66 = arith.constant 1.000000e+00 : f32
    %153 = vector.broadcast %cst_66 : f32 to vector<8x32xf32>
    %154 = arith.addf %153, %152 : vector<8x32xf32>
    %155 = arith.mulf %149, %154 : vector<8x32xf32>
    %156 = vector.broadcast %135 : vector<8x1xf32> to vector<8x32xf32>
    %157 = arith.mulf %145, %156 : vector<8x32xf32>
    %cst_67 = arith.constant dense<0.000000e+00> : vector<16x32xf32>
    %158 = tpu.matmul %131, %157, %cst_67 {dimension_numbers = #tpu.dot_dimension_numbers<[0], [0], [1], [1], [0, 1, 1, 1], [], []>} : vector<8x16xf32>, vector<8x32xf32>, vector<16x32xf32> -> vector<16x32xf32>
    %159 = vector.broadcast %134 : vector<8x1xf32> to vector<8x32xf32>
    %160 = arith.mulf %155, %159 : vector<8x32xf32>
    %161 = vector.broadcast %136 : vector<8x1xf32> to vector<8x32xf32>
    %162 = arith.mulf %147, %161 : vector<8x32xf32>
    %163 = tpu.concatenate %160, %162 in 1 : vector<8x32xf32>, vector<8x32xf32> -> vector<8x64xf32>
    %cst_68 = arith.constant dense<0.000000e+00> : vector<64x16xf32>
    %164 = tpu.matmul %163, %105, %cst_68 {dimension_numbers = #tpu.dot_dimension_numbers<[0], [0], [1], [1], [0, 1, 1, 1], [], []>} : vector<8x64xf32>, vector<8x16xf32>, vector<64x16xf32> -> vector<64x16xf32>
    %165 = arith.addf %90, %164 : vector<64x16xf32>
    %166 = arith.addf %101, %158 : vector<16x32xf32>
    %167 = arith.mulf %165, %165 : vector<64x16xf32>
    %cst_69 = arith.constant dense<0.000000e+00> : vector<64xf32>
    %168 = vector.multi_reduction <add>, %167, %cst_69 [1] : vector<64x16xf32> to vector<64xf32>
    %169 = vector.shape_cast %168 : vector<64xf32> to vector<64x1xf32>
    %170 = math.sqrt %169 : vector<64x1xf32>
    %cst_70 = arith.constant 9.99999974E-6 : f32
    %171 = vector.broadcast %cst_70 : f32 to vector<64x1xf32>
    %172 = arith.addf %170, %171 : vector<64x1xf32>
    %173 = tpu.reciprocal %172 {approx = true} : vector<64x1xf32> -> vector<64x1xf32>
    %174 = vector.broadcast %173 : vector<64x1xf32> to vector<64x16xf32>
    %175 = arith.mulf %165, %174 : vector<64x16xf32>
    %176 = vector.broadcast %10 : vector<64x1xf32> to vector<64x16xf32>
    %177 = arith.mulf %175, %176 : vector<64x16xf32>
    %178 = arith.mulf %166, %166 : vector<16x32xf32>
    %cst_71 = arith.constant dense<0.000000e+00> : vector<16xf32>
    %179 = vector.multi_reduction <add>, %178, %cst_71 [1] : vector<16x32xf32> to vector<16xf32>
    %180 = vector.shape_cast %179 : vector<16xf32> to vector<16x1xf32>
    %181 = math.sqrt %180 : vector<16x1xf32>
    %cst_72 = arith.constant 9.99999974E-6 : f32
    %182 = vector.broadcast %cst_72 : f32 to vector<16x1xf32>
    %183 = arith.addf %181, %182 : vector<16x1xf32>
    %184 = tpu.reciprocal %183 {approx = true} : vector<16x1xf32> -> vector<16x1xf32>
    %185 = vector.broadcast %184 : vector<16x1xf32> to vector<16x32xf32>
    %186 = arith.mulf %166, %185 : vector<16x32xf32>
    %187 = vector.broadcast %14 : vector<16x1xf32> to vector<16x32xf32>
    %188 = arith.mulf %186, %187 : vector<16x32xf32>
    %c0_73 = arith.constant 0 : index
    %c0_74 = arith.constant 0 : index
    %c16 = arith.constant 16 : index
    %c0_75 = arith.constant 0 : index
    %189 = vector.load %arg4[%c0_73, %c0_74, %c16, %c0_75] : memref<2x1x32x16xf32, #tpu.memory_space<vmem>>, vector<1x1x8x16xf32>
    %190 = vector.shape_cast %189 : vector<1x1x8x16xf32> to vector<8x16xf32>
    %c0_76 = arith.constant 0 : index
    %c0_77 = arith.constant 0 : index
    %c16_78 = arith.constant 16 : index
    %c0_79 = arith.constant 0 : index
    %191 = vector.load %arg5[%c0_76, %c0_77, %c16_78, %c0_79] : memref<2x1x32x16xf32, #tpu.memory_space<vmem>>, vector<1x1x8x16xf32>
    %192 = vector.shape_cast %191 : vector<1x1x8x16xf32> to vector<8x16xf32>
    %193 = tpu.concatenate %190, %192 in 0 : vector<8x16xf32>, vector<8x16xf32> -> vector<16x16xf32>
    %cst_80 = arith.constant dense<0.000000e+00> : vector<16x64xf32>
    %194 = tpu.matmul %193, %177, %cst_80 {dimension_numbers = #tpu.dot_dimension_numbers<[1], [1], [0], [0], [0, 0, 1, 0], [], []>} : vector<16x16xf32>, vector<64x16xf32>, vector<16x64xf32> -> vector<16x64xf32>
    %195 = vector.extract_strided_slice %194 {offsets = [0, 0], sizes = [8, 32], strides = [1, 1]} : vector<16x64xf32> to vector<8x32xf32>
    %196 = vector.extract_strided_slice %194 {offsets = [0, 32], sizes = [8, 32], strides = [1, 1]} : vector<16x64xf32> to vector<8x32xf32>
    %197 = arith.negf %195 : vector<8x32xf32>
    %198 = math.exp %197 : vector<8x32xf32>
    %cst_81 = arith.constant 1.000000e+00 : f32
    %199 = vector.broadcast %cst_81 : f32 to vector<8x32xf32>
    %200 = arith.addf %199, %198 : vector<8x32xf32>
    %201 = arith.divf %199, %200 : vector<8x32xf32>
    %202 = arith.mulf %195, %201 : vector<8x32xf32>
    %203 = arith.mulf %202, %196 : vector<8x32xf32>
    %cst_82 = arith.constant dense<0.000000e+00> : vector<8x16xf32>
    %204 = tpu.matmul %203, %188, %cst_82 {dimension_numbers = #tpu.dot_dimension_numbers<[1], [1], [0], [0], [0, 0, 1, 0], [], []>} : vector<8x32xf32>, vector<16x32xf32>, vector<8x16xf32> -> vector<8x16xf32>
    %205 = vector.extract_strided_slice %204 {offsets = [0, 0], sizes = [1, 16], strides = [1, 1]} : vector<8x16xf32> to vector<1x16xf32>
    %206 = vector.extract_strided_slice %204 {offsets = [1, 0], sizes = [1, 16], strides = [1, 1]} : vector<8x16xf32> to vector<1x16xf32>
    %207 = vector.extract_strided_slice %204 {offsets = [2, 0], sizes = [1, 16], strides = [1, 1]} : vector<8x16xf32> to vector<1x16xf32>
    %208 = vector.extract_strided_slice %204 {offsets = [3, 0], sizes = [1, 16], strides = [1, 1]} : vector<8x16xf32> to vector<1x16xf32>
    %209 = vector.extract_strided_slice %204 {offsets = [4, 0], sizes = [1, 16], strides = [1, 1]} : vector<8x16xf32> to vector<1x16xf32>
    %210 = vector.extract_strided_slice %204 {offsets = [5, 0], sizes = [1, 16], strides = [1, 1]} : vector<8x16xf32> to vector<1x16xf32>
    %211 = vector.extract_strided_slice %204 {offsets = [6, 0], sizes = [1, 16], strides = [1, 1]} : vector<8x16xf32> to vector<1x16xf32>
    %212 = vector.extract_strided_slice %204 {offsets = [7, 0], sizes = [1, 16], strides = [1, 1]} : vector<8x16xf32> to vector<1x16xf32>
    %213 = tpu.concatenate %205, %206, %207, %208, %209, %210, %211, %212 in 1 : vector<1x16xf32>, vector<1x16xf32>, vector<1x16xf32>, vector<1x16xf32>, vector<1x16xf32>, vector<1x16xf32>, vector<1x16xf32>, vector<1x16xf32> -> vector<1x128xf32>
    %c0_83 = arith.constant 0 : index
    %c0_84 = arith.constant 0 : index
    %c2 = arith.constant 2 : index
    %c0_85 = arith.constant 0 : index
    %214 = vector.load %arg8[%c0_83, %c0_84, %c2, %c0_85] : memref<2x1x4x128xf32, #tpu.memory_space<vmem>>, vector<1x1x1x128xf32>
    %215 = vector.shape_cast %214 : vector<1x1x1x128xf32> to vector<1x128xf32>
    %216 = vector.shape_cast %213 : vector<1x128xf32> to vector<1x1x1x128xf32>
    tpu.vector_store %arg8[%c0_83, %c0_84, %c2, %c0_85], %216 {strides = array<i32>} : memref<2x1x4x128xf32, #tpu.memory_space<vmem>>, vector<1x1x1x128xf32>,
    %c0_86 = arith.constant 0 : index
    %c0_87 = arith.constant 0 : index
    %c16_88 = arith.constant 16 : index
    %c0_89 = arith.constant 0 : index
    %217 = vector.load %arg6[%c0_86, %c0_87, %c16_88, %c0_89] : memref<2x1x32x16xf32, #tpu.memory_space<vmem>>, vector<1x1x8x16xf32>
    %218 = vector.shape_cast %217 : vector<1x1x8x16xf32> to vector<8x16xf32>
    %c0_90 = arith.constant 0 : index
    %c0_91 = arith.constant 0 : index
    %c16_92 = arith.constant 16 : index
    %c0_93 = arith.constant 0 : index
    %219 = vector.load %arg7[%c0_90, %c0_91, %c16_92, %c0_93] : memref<2x1x32x3xf32, #tpu.memory_space<vmem>>, vector<1x1x8x3xf32>
    %220 = vector.shape_cast %219 : vector<1x1x8x3xf32> to vector<8x3xf32>
    %221 = vector.extract_strided_slice %220 {offsets = [0, 0], sizes = [8, 1], strides = [1, 1]} : vector<8x3xf32> to vector<8x1xf32>
    %222 = vector.extract_strided_slice %220 {offsets = [0, 1], sizes = [8, 1], strides = [1, 1]} : vector<8x3xf32> to vector<8x1xf32>
    %223 = vector.extract_strided_slice %220 {offsets = [0, 2], sizes = [8, 1], strides = [1, 1]} : vector<8x3xf32> to vector<8x1xf32>
    %224 = vector.extract_strided_slice %194 {offsets = [8, 0], sizes = [8, 32], strides = [1, 1]} : vector<16x64xf32> to vector<8x32xf32>
    %225 = vector.extract_strided_slice %194 {offsets = [8, 32], sizes = [8, 32], strides = [1, 1]} : vector<16x64xf32> to vector<8x32xf32>
    %226 = arith.negf %224 : vector<8x32xf32>
    %227 = math.exp %226 : vector<8x32xf32>
    %cst_94 = arith.constant 1.000000e+00 : f32
    %228 = vector.broadcast %cst_94 : f32 to vector<8x32xf32>
    %229 = arith.addf %228, %227 : vector<8x32xf32>
    %230 = arith.divf %228, %229 : vector<8x32xf32>
    %231 = arith.mulf %224, %230 : vector<8x32xf32>
    %232 = arith.mulf %231, %225 : vector<8x32xf32>
    %cst_95 = arith.constant dense<0.000000e+00> : vector<8x32xf32>
    %233 = tpu.matmul %218, %188, %cst_95 {dimension_numbers = #tpu.dot_dimension_numbers<[1], [0], [0], [1], [0, 0, 1, 1], [], []>} : vector<8x16xf32>, vector<16x32xf32>, vector<8x32xf32> -> vector<8x32xf32>
    %234 = arith.mulf %233, %231 : vector<8x32xf32>
    %235 = arith.mulf %233, %225 : vector<8x32xf32>
    %236 = arith.mulf %235, %230 : vector<8x32xf32>
    %cst_96 = arith.constant 1.000000e+00 : f32
    %237 = vector.broadcast %cst_96 : f32 to vector<8x32xf32>
    %238 = arith.subf %237, %230 : vector<8x32xf32>
    %239 = arith.mulf %224, %238 : vector<8x32xf32>
    %cst_97 = arith.constant 1.000000e+00 : f32
    %240 = vector.broadcast %cst_97 : f32 to vector<8x32xf32>
    %241 = arith.addf %240, %239 : vector<8x32xf32>
    %242 = arith.mulf %236, %241 : vector<8x32xf32>
    %243 = vector.broadcast %222 : vector<8x1xf32> to vector<8x32xf32>
    %244 = arith.mulf %232, %243 : vector<8x32xf32>
    %cst_98 = arith.constant dense<0.000000e+00> : vector<16x32xf32>
    %245 = tpu.matmul %218, %244, %cst_98 {dimension_numbers = #tpu.dot_dimension_numbers<[0], [0], [1], [1], [0, 1, 1, 1], [], []>} : vector<8x16xf32>, vector<8x32xf32>, vector<16x32xf32> -> vector<16x32xf32>
    %246 = vector.broadcast %221 : vector<8x1xf32> to vector<8x32xf32>
    %247 = arith.mulf %242, %246 : vector<8x32xf32>
    %248 = vector.broadcast %223 : vector<8x1xf32> to vector<8x32xf32>
    %249 = arith.mulf %234, %248 : vector<8x32xf32>
    %250 = tpu.concatenate %247, %249 in 1 : vector<8x32xf32>, vector<8x32xf32> -> vector<8x64xf32>
    %cst_99 = arith.constant dense<0.000000e+00> : vector<64x16xf32>
    %251 = tpu.matmul %250, %192, %cst_99 {dimension_numbers = #tpu.dot_dimension_numbers<[0], [0], [1], [1], [0, 1, 1, 1], [], []>} : vector<8x64xf32>, vector<8x16xf32>, vector<64x16xf32> -> vector<64x16xf32>
    %252 = arith.addf %177, %251 : vector<64x16xf32>
    %253 = arith.addf %188, %245 : vector<16x32xf32>
    %254 = arith.mulf %252, %252 : vector<64x16xf32>
    %cst_100 = arith.constant dense<0.000000e+00> : vector<64xf32>
    %255 = vector.multi_reduction <add>, %254, %cst_100 [1] : vector<64x16xf32> to vector<64xf32>
    %256 = vector.shape_cast %255 : vector<64xf32> to vector<64x1xf32>
    %257 = math.sqrt %256 : vector<64x1xf32>
    %cst_101 = arith.constant 9.99999974E-6 : f32
    %258 = vector.broadcast %cst_101 : f32 to vector<64x1xf32>
    %259 = arith.addf %257, %258 : vector<64x1xf32>
    %260 = tpu.reciprocal %259 {approx = true} : vector<64x1xf32> -> vector<64x1xf32>
    %261 = vector.broadcast %260 : vector<64x1xf32> to vector<64x16xf32>
    %262 = arith.mulf %252, %261 : vector<64x16xf32>
    %263 = vector.broadcast %10 : vector<64x1xf32> to vector<64x16xf32>
    %264 = arith.mulf %262, %263 : vector<64x16xf32>
    %265 = arith.mulf %253, %253 : vector<16x32xf32>
    %cst_102 = arith.constant dense<0.000000e+00> : vector<16xf32>
    %266 = vector.multi_reduction <add>, %265, %cst_102 [1] : vector<16x32xf32> to vector<16xf32>
    %267 = vector.shape_cast %266 : vector<16xf32> to vector<16x1xf32>
    %268 = math.sqrt %267 : vector<16x1xf32>
    %cst_103 = arith.constant 9.99999974E-6 : f32
    %269 = vector.broadcast %cst_103 : f32 to vector<16x1xf32>
    %270 = arith.addf %268, %269 : vector<16x1xf32>
    %271 = tpu.reciprocal %270 {approx = true} : vector<16x1xf32> -> vector<16x1xf32>
    %272 = vector.broadcast %271 : vector<16x1xf32> to vector<16x32xf32>
    %273 = arith.mulf %253, %272 : vector<16x32xf32>
    %274 = vector.broadcast %14 : vector<16x1xf32> to vector<16x32xf32>
    %275 = arith.mulf %273, %274 : vector<16x32xf32>
    %c0_104 = arith.constant 0 : index
    %c0_105 = arith.constant 0 : index
    %c24 = arith.constant 24 : index
    %c0_106 = arith.constant 0 : index
    %276 = vector.load %arg4[%c0_104, %c0_105, %c24, %c0_106] : memref<2x1x32x16xf32, #tpu.memory_space<vmem>>, vector<1x1x8x16xf32>
    %277 = vector.shape_cast %276 : vector<1x1x8x16xf32> to vector<8x16xf32>
    %cst_107 = arith.constant dense<0.000000e+00> : vector<8x64xf32>
    %278 = tpu.matmul %277, %264, %cst_107 {dimension_numbers = #tpu.dot_dimension_numbers<[1], [1], [0], [0], [0, 0, 1, 0], [], []>} : vector<8x16xf32>, vector<64x16xf32>, vector<8x64xf32> -> vector<8x64xf32>
    %279 = vector.extract_strided_slice %278 {offsets = [0, 0], sizes = [8, 32], strides = [1, 1]} : vector<8x64xf32> to vector<8x32xf32>
    %280 = vector.extract_strided_slice %278 {offsets = [0, 32], sizes = [8, 32], strides = [1, 1]} : vector<8x64xf32> to vector<8x32xf32>
    %281 = arith.negf %279 : vector<8x32xf32>
    %282 = math.exp %281 : vector<8x32xf32>
    %cst_108 = arith.constant 1.000000e+00 : f32
    %283 = vector.broadcast %cst_108 : f32 to vector<8x32xf32>
    %284 = arith.addf %283, %282 : vector<8x32xf32>
    %285 = arith.divf %283, %284 : vector<8x32xf32>
    %286 = arith.mulf %279, %285 : vector<8x32xf32>
    %287 = arith.mulf %286, %280 : vector<8x32xf32>
    %cst_109 = arith.constant dense<0.000000e+00> : vector<8x16xf32>
    %288 = tpu.matmul %287, %275, %cst_109 {dimension_numbers = #tpu.dot_dimension_numbers<[1], [1], [0], [0], [0, 0, 1, 0], [], []>} : vector<8x32xf32>, vector<16x32xf32>, vector<8x16xf32> -> vector<8x16xf32>
    %289 = vector.extract_strided_slice %288 {offsets = [0, 0], sizes = [1, 16], strides = [1, 1]} : vector<8x16xf32> to vector<1x16xf32>
    %290 = vector.extract_strided_slice %288 {offsets = [1, 0], sizes = [1, 16], strides = [1, 1]} : vector<8x16xf32> to vector<1x16xf32>
    %291 = vector.extract_strided_slice %288 {offsets = [2, 0], sizes = [1, 16], strides = [1, 1]} : vector<8x16xf32> to vector<1x16xf32>
    %292 = vector.extract_strided_slice %288 {offsets = [3, 0], sizes = [1, 16], strides = [1, 1]} : vector<8x16xf32> to vector<1x16xf32>
    %293 = vector.extract_strided_slice %288 {offsets = [4, 0], sizes = [1, 16], strides = [1, 1]} : vector<8x16xf32> to vector<1x16xf32>
    %294 = vector.extract_strided_slice %288 {offsets = [5, 0], sizes = [1, 16], strides = [1, 1]} : vector<8x16xf32> to vector<1x16xf32>
    %295 = vector.extract_strided_slice %288 {offsets = [6, 0], sizes = [1, 16], strides = [1, 1]} : vector<8x16xf32> to vector<1x16xf32>
    %296 = vector.extract_strided_slice %288 {offsets = [7, 0], sizes = [1, 16], strides = [1, 1]} : vector<8x16xf32> to vector<1x16xf32>
    %297 = tpu.concatenate %289, %290, %291, %292, %293, %294, %295, %296 in 1 : vector<1x16xf32>, vector<1x16xf32>, vector<1x16xf32>, vector<1x16xf32>, vector<1x16xf32>, vector<1x16xf32>, vector<1x16xf32>, vector<1x16xf32> -> vector<1x128xf32>
    %c0_110 = arith.constant 0 : index
    %c0_111 = arith.constant 0 : index
    %c3 = arith.constant 3 : index
    %c0_112 = arith.constant 0 : index
    %298 = vector.load %arg8[%c0_110, %c0_111, %c3, %c0_112] : memref<2x1x4x128xf32, #tpu.memory_space<vmem>>, vector<1x1x1x128xf32>
    %299 = vector.shape_cast %298 : vector<1x1x1x128xf32> to vector<1x128xf32>
    %300 = vector.shape_cast %297 : vector<1x128xf32> to vector<1x1x1x128xf32>
    tpu.vector_store %arg8[%c0_110, %c0_111, %c3, %c0_112], %300 {strides = array<i32>} : memref<2x1x4x128xf32, #tpu.memory_space<vmem>>, vector<1x1x1x128xf32>,
    %c1_113 = arith.constant 1 : index
    %c0_114 = arith.constant 0 : index
    %c0_115 = arith.constant 0 : index
    %c0_116 = arith.constant 0 : index
    %301 = vector.load %arg4[%c1_113, %c0_114, %c0_115, %c0_116] : memref<2x1x32x16xf32, #tpu.memory_space<vmem>>, vector<1x1x8x16xf32>
    %302 = vector.shape_cast %301 : vector<1x1x8x16xf32> to vector<8x16xf32>
    %c1_117 = arith.constant 1 : index
    %c0_118 = arith.constant 0 : index
    %c0_119 = arith.constant 0 : index
    %c0_120 = arith.constant 0 : index
    %303 = vector.load %arg5[%c1_117, %c0_118, %c0_119, %c0_120] : memref<2x1x32x16xf32, #tpu.memory_space<vmem>>, vector<1x1x8x16xf32>
    %304 = vector.shape_cast %303 : vector<1x1x8x16xf32> to vector<8x16xf32>
    %305 = tpu.concatenate %302, %304 in 0 : vector<8x16xf32>, vector<8x16xf32> -> vector<16x16xf32>
    %cst_121 = arith.constant dense<0.000000e+00> : vector<16x64xf32>
    %306 = tpu.matmul %305, %4, %cst_121 {dimension_numbers = #tpu.dot_dimension_numbers<[1], [1], [0], [0], [0, 0, 1, 0], [], []>} : vector<16x16xf32>, vector<64x16xf32>, vector<16x64xf32> -> vector<16x64xf32>
    %307 = vector.extract_strided_slice %306 {offsets = [0, 0], sizes = [8, 32], strides = [1, 1]} : vector<16x64xf32> to vector<8x32xf32>
    %308 = vector.extract_strided_slice %306 {offsets = [0, 32], sizes = [8, 32], strides = [1, 1]} : vector<16x64xf32> to vector<8x32xf32>
    %309 = arith.negf %307 : vector<8x32xf32>
    %310 = math.exp %309 : vector<8x32xf32>
    %cst_122 = arith.constant 1.000000e+00 : f32
    %311 = vector.broadcast %cst_122 : f32 to vector<8x32xf32>
    %312 = arith.addf %311, %310 : vector<8x32xf32>
    %313 = arith.divf %311, %312 : vector<8x32xf32>
    %314 = arith.mulf %307, %313 : vector<8x32xf32>
    %315 = arith.mulf %314, %308 : vector<8x32xf32>
    %cst_123 = arith.constant dense<0.000000e+00> : vector<8x16xf32>
    %316 = tpu.matmul %315, %6, %cst_123 {dimension_numbers = #tpu.dot_dimension_numbers<[1], [1], [0], [0], [0, 0, 1, 0], [], []>} : vector<8x32xf32>, vector<16x32xf32>, vector<8x16xf32> -> vector<8x16xf32>
    %317 = vector.extract_strided_slice %316 {offsets = [0, 0], sizes = [1, 16], strides = [1, 1]} : vector<8x16xf32> to vector<1x16xf32>
    %318 = vector.extract_strided_slice %316 {offsets = [1, 0], sizes = [1, 16], strides = [1, 1]} : vector<8x16xf32> to vector<1x16xf32>
    %319 = vector.extract_strided_slice %316 {offsets = [2, 0], sizes = [1, 16], strides = [1, 1]} : vector<8x16xf32> to vector<1x16xf32>
    %320 = vector.extract_strided_slice %316 {offsets = [3, 0], sizes = [1, 16], strides = [1, 1]} : vector<8x16xf32> to vector<1x16xf32>
    %321 = vector.extract_strided_slice %316 {offsets = [4, 0], sizes = [1, 16], strides = [1, 1]} : vector<8x16xf32> to vector<1x16xf32>
    %322 = vector.extract_strided_slice %316 {offsets = [5, 0], sizes = [1, 16], strides = [1, 1]} : vector<8x16xf32> to vector<1x16xf32>
    %323 = vector.extract_strided_slice %316 {offsets = [6, 0], sizes = [1, 16], strides = [1, 1]} : vector<8x16xf32> to vector<1x16xf32>
    %324 = vector.extract_strided_slice %316 {offsets = [7, 0], sizes = [1, 16], strides = [1, 1]} : vector<8x16xf32> to vector<1x16xf32>
    %325 = tpu.concatenate %317, %318, %319, %320, %321, %322, %323, %324 in 1 : vector<1x16xf32>, vector<1x16xf32>, vector<1x16xf32>, vector<1x16xf32>, vector<1x16xf32>, vector<1x16xf32>, vector<1x16xf32>, vector<1x16xf32> -> vector<1x128xf32>
    %c1_124 = arith.constant 1 : index
    %c0_125 = arith.constant 0 : index
    %c0_126 = arith.constant 0 : index
    %c0_127 = arith.constant 0 : index
    %326 = vector.load %arg8[%c1_124, %c0_125, %c0_126, %c0_127] : memref<2x1x4x128xf32, #tpu.memory_space<vmem>>, vector<1x1x1x128xf32>
    %327 = vector.shape_cast %326 : vector<1x1x1x128xf32> to vector<1x128xf32>
    %328 = vector.shape_cast %325 : vector<1x128xf32> to vector<1x1x1x128xf32>
    tpu.vector_store %arg8[%c1_124, %c0_125, %c0_126, %c0_127], %328 {strides = array<i32>} : memref<2x1x4x128xf32, #tpu.memory_space<vmem>>, vector<1x1x1x128xf32>,
    %c1_128 = arith.constant 1 : index
    %c0_129 = arith.constant 0 : index
    %c0_130 = arith.constant 0 : index
    %c0_131 = arith.constant 0 : index
    %329 = vector.load %arg6[%c1_128, %c0_129, %c0_130, %c0_131] : memref<2x1x32x16xf32, #tpu.memory_space<vmem>>, vector<1x1x8x16xf32>
    %330 = vector.shape_cast %329 : vector<1x1x8x16xf32> to vector<8x16xf32>
    %c1_132 = arith.constant 1 : index
    %c0_133 = arith.constant 0 : index
    %c0_134 = arith.constant 0 : index
    %c0_135 = arith.constant 0 : index
    %331 = vector.load %arg7[%c1_132, %c0_133, %c0_134, %c0_135] : memref<2x1x32x3xf32, #tpu.memory_space<vmem>>, vector<1x1x8x3xf32>
    %332 = vector.shape_cast %331 : vector<1x1x8x3xf32> to vector<8x3xf32>
    %333 = vector.extract_strided_slice %332 {offsets = [0, 0], sizes = [8, 1], strides = [1, 1]} : vector<8x3xf32> to vector<8x1xf32>
    %334 = vector.extract_strided_slice %332 {offsets = [0, 1], sizes = [8, 1], strides = [1, 1]} : vector<8x3xf32> to vector<8x1xf32>
    %335 = vector.extract_strided_slice %332 {offsets = [0, 2], sizes = [8, 1], strides = [1, 1]} : vector<8x3xf32> to vector<8x1xf32>
    %336 = vector.extract_strided_slice %306 {offsets = [8, 0], sizes = [8, 32], strides = [1, 1]} : vector<16x64xf32> to vector<8x32xf32>
    %337 = vector.extract_strided_slice %306 {offsets = [8, 32], sizes = [8, 32], strides = [1, 1]} : vector<16x64xf32> to vector<8x32xf32>
    %338 = arith.negf %336 : vector<8x32xf32>
    %339 = math.exp %338 : vector<8x32xf32>
    %cst_136 = arith.constant 1.000000e+00 : f32
    %340 = vector.broadcast %cst_136 : f32 to vector<8x32xf32>
    %341 = arith.addf %340, %339 : vector<8x32xf32>
    %342 = arith.divf %340, %341 : vector<8x32xf32>
    %343 = arith.mulf %336, %342 : vector<8x32xf32>
    %344 = arith.mulf %343, %337 : vector<8x32xf32>
    %cst_137 = arith.constant dense<0.000000e+00> : vector<8x32xf32>
    %345 = tpu.matmul %330, %6, %cst_137 {dimension_numbers = #tpu.dot_dimension_numbers<[1], [0], [0], [1], [0, 0, 1, 1], [], []>} : vector<8x16xf32>, vector<16x32xf32>, vector<8x32xf32> -> vector<8x32xf32>
    %346 = arith.mulf %345, %343 : vector<8x32xf32>
    %347 = arith.mulf %345, %337 : vector<8x32xf32>
    %348 = arith.mulf %347, %342 : vector<8x32xf32>
    %cst_138 = arith.constant 1.000000e+00 : f32
    %349 = vector.broadcast %cst_138 : f32 to vector<8x32xf32>
    %350 = arith.subf %349, %342 : vector<8x32xf32>
    %351 = arith.mulf %336, %350 : vector<8x32xf32>
    %cst_139 = arith.constant 1.000000e+00 : f32
    %352 = vector.broadcast %cst_139 : f32 to vector<8x32xf32>
    %353 = arith.addf %352, %351 : vector<8x32xf32>
    %354 = arith.mulf %348, %353 : vector<8x32xf32>
    %355 = vector.broadcast %334 : vector<8x1xf32> to vector<8x32xf32>
    %356 = arith.mulf %344, %355 : vector<8x32xf32>
    %cst_140 = arith.constant dense<0.000000e+00> : vector<16x32xf32>
    %357 = tpu.matmul %330, %356, %cst_140 {dimension_numbers = #tpu.dot_dimension_numbers<[0], [0], [1], [1], [0, 1, 1, 1], [], []>} : vector<8x16xf32>, vector<8x32xf32>, vector<16x32xf32> -> vector<16x32xf32>
    %358 = vector.broadcast %333 : vector<8x1xf32> to vector<8x32xf32>
    %359 = arith.mulf %354, %358 : vector<8x32xf32>
    %360 = vector.broadcast %335 : vector<8x1xf32> to vector<8x32xf32>
    %361 = arith.mulf %346, %360 : vector<8x32xf32>
    %362 = tpu.concatenate %359, %361 in 1 : vector<8x32xf32>, vector<8x32xf32> -> vector<8x64xf32>
    %cst_141 = arith.constant dense<0.000000e+00> : vector<64x16xf32>
    %363 = tpu.matmul %362, %304, %cst_141 {dimension_numbers = #tpu.dot_dimension_numbers<[0], [0], [1], [1], [0, 1, 1, 1], [], []>} : vector<8x64xf32>, vector<8x16xf32>, vector<64x16xf32> -> vector<64x16xf32>
    %364 = arith.addf %4, %363 : vector<64x16xf32>
    %365 = arith.addf %6, %357 : vector<16x32xf32>
    %366 = arith.mulf %364, %364 : vector<64x16xf32>
    %cst_142 = arith.constant dense<0.000000e+00> : vector<64xf32>
    %367 = vector.multi_reduction <add>, %366, %cst_142 [1] : vector<64x16xf32> to vector<64xf32>
    %368 = vector.shape_cast %367 : vector<64xf32> to vector<64x1xf32>
    %369 = math.sqrt %368 : vector<64x1xf32>
    %cst_143 = arith.constant 9.99999974E-6 : f32
    %370 = vector.broadcast %cst_143 : f32 to vector<64x1xf32>
    %371 = arith.addf %369, %370 : vector<64x1xf32>
    %372 = tpu.reciprocal %371 {approx = true} : vector<64x1xf32> -> vector<64x1xf32>
    %373 = vector.broadcast %372 : vector<64x1xf32> to vector<64x16xf32>
    %374 = arith.mulf %364, %373 : vector<64x16xf32>
    %375 = vector.broadcast %10 : vector<64x1xf32> to vector<64x16xf32>
    %376 = arith.mulf %374, %375 : vector<64x16xf32>
    %377 = arith.mulf %365, %365 : vector<16x32xf32>
    %cst_144 = arith.constant dense<0.000000e+00> : vector<16xf32>
    %378 = vector.multi_reduction <add>, %377, %cst_144 [1] : vector<16x32xf32> to vector<16xf32>
    %379 = vector.shape_cast %378 : vector<16xf32> to vector<16x1xf32>
    %380 = math.sqrt %379 : vector<16x1xf32>
    %cst_145 = arith.constant 9.99999974E-6 : f32
    %381 = vector.broadcast %cst_145 : f32 to vector<16x1xf32>
    %382 = arith.addf %380, %381 : vector<16x1xf32>
    %383 = tpu.reciprocal %382 {approx = true} : vector<16x1xf32> -> vector<16x1xf32>
    %384 = vector.broadcast %383 : vector<16x1xf32> to vector<16x32xf32>
    %385 = arith.mulf %365, %384 : vector<16x32xf32>
    %386 = vector.broadcast %14 : vector<16x1xf32> to vector<16x32xf32>
    %387 = arith.mulf %385, %386 : vector<16x32xf32>
    %c1_146 = arith.constant 1 : index
    %c0_147 = arith.constant 0 : index
    %c8_148 = arith.constant 8 : index
    %c0_149 = arith.constant 0 : index
    %388 = vector.load %arg4[%c1_146, %c0_147, %c8_148, %c0_149] : memref<2x1x32x16xf32, #tpu.memory_space<vmem>>, vector<1x1x8x16xf32>
    %389 = vector.shape_cast %388 : vector<1x1x8x16xf32> to vector<8x16xf32>
    %c1_150 = arith.constant 1 : index
    %c0_151 = arith.constant 0 : index
    %c8_152 = arith.constant 8 : index
    %c0_153 = arith.constant 0 : index
    %390 = vector.load %arg5[%c1_150, %c0_151, %c8_152, %c0_153] : memref<2x1x32x16xf32, #tpu.memory_space<vmem>>, vector<1x1x8x16xf32>
    %391 = vector.shape_cast %390 : vector<1x1x8x16xf32> to vector<8x16xf32>
    %392 = tpu.concatenate %389, %391 in 0 : vector<8x16xf32>, vector<8x16xf32> -> vector<16x16xf32>
    %cst_154 = arith.constant dense<0.000000e+00> : vector<16x64xf32>
    %393 = tpu.matmul %392, %376, %cst_154 {dimension_numbers = #tpu.dot_dimension_numbers<[1], [1], [0], [0], [0, 0, 1, 0], [], []>} : vector<16x16xf32>, vector<64x16xf32>, vector<16x64xf32> -> vector<16x64xf32>
    %394 = vector.extract_strided_slice %393 {offsets = [0, 0], sizes = [8, 32], strides = [1, 1]} : vector<16x64xf32> to vector<8x32xf32>
    %395 = vector.extract_strided_slice %393 {offsets = [0, 32], sizes = [8, 32], strides = [1, 1]} : vector<16x64xf32> to vector<8x32xf32>
    %396 = arith.negf %394 : vector<8x32xf32>
    %397 = math.exp %396 : vector<8x32xf32>
    %cst_155 = arith.constant 1.000000e+00 : f32
    %398 = vector.broadcast %cst_155 : f32 to vector<8x32xf32>
    %399 = arith.addf %398, %397 : vector<8x32xf32>
    %400 = arith.divf %398, %399 : vector<8x32xf32>
    %401 = arith.mulf %394, %400 : vector<8x32xf32>
    %402 = arith.mulf %401, %395 : vector<8x32xf32>
    %cst_156 = arith.constant dense<0.000000e+00> : vector<8x16xf32>
    %403 = tpu.matmul %402, %387, %cst_156 {dimension_numbers = #tpu.dot_dimension_numbers<[1], [1], [0], [0], [0, 0, 1, 0], [], []>} : vector<8x32xf32>, vector<16x32xf32>, vector<8x16xf32> -> vector<8x16xf32>
    %404 = vector.extract_strided_slice %403 {offsets = [0, 0], sizes = [1, 16], strides = [1, 1]} : vector<8x16xf32> to vector<1x16xf32>
    %405 = vector.extract_strided_slice %403 {offsets = [1, 0], sizes = [1, 16], strides = [1, 1]} : vector<8x16xf32> to vector<1x16xf32>
    %406 = vector.extract_strided_slice %403 {offsets = [2, 0], sizes = [1, 16], strides = [1, 1]} : vector<8x16xf32> to vector<1x16xf32>
    %407 = vector.extract_strided_slice %403 {offsets = [3, 0], sizes = [1, 16], strides = [1, 1]} : vector<8x16xf32> to vector<1x16xf32>
    %408 = vector.extract_strided_slice %403 {offsets = [4, 0], sizes = [1, 16], strides = [1, 1]} : vector<8x16xf32> to vector<1x16xf32>
    %409 = vector.extract_strided_slice %403 {offsets = [5, 0], sizes = [1, 16], strides = [1, 1]} : vector<8x16xf32> to vector<1x16xf32>
    %410 = vector.extract_strided_slice %403 {offsets = [6, 0], sizes = [1, 16], strides = [1, 1]} : vector<8x16xf32> to vector<1x16xf32>
    %411 = vector.extract_strided_slice %403 {offsets = [7, 0], sizes = [1, 16], strides = [1, 1]} : vector<8x16xf32> to vector<1x16xf32>
    %412 = tpu.concatenate %404, %405, %406, %407, %408, %409, %410, %411 in 1 : vector<1x16xf32>, vector<1x16xf32>, vector<1x16xf32>, vector<1x16xf32>, vector<1x16xf32>, vector<1x16xf32>, vector<1x16xf32>, vector<1x16xf32> -> vector<1x128xf32>
    %c1_157 = arith.constant 1 : index
    %c0_158 = arith.constant 0 : index
    %c1_159 = arith.constant 1 : index
    %c0_160 = arith.constant 0 : index
    %413 = vector.load %arg8[%c1_157, %c0_158, %c1_159, %c0_160] : memref<2x1x4x128xf32, #tpu.memory_space<vmem>>, vector<1x1x1x128xf32>
    %414 = vector.shape_cast %413 : vector<1x1x1x128xf32> to vector<1x128xf32>
    %415 = vector.shape_cast %412 : vector<1x128xf32> to vector<1x1x1x128xf32>
    tpu.vector_store %arg8[%c1_157, %c0_158, %c1_159, %c0_160], %415 {strides = array<i32>} : memref<2x1x4x128xf32, #tpu.memory_space<vmem>>, vector<1x1x1x128xf32>,
    %c1_161 = arith.constant 1 : index
    %c0_162 = arith.constant 0 : index
    %c8_163 = arith.constant 8 : index
    %c0_164 = arith.constant 0 : index
    %416 = vector.load %arg6[%c1_161, %c0_162, %c8_163, %c0_164] : memref<2x1x32x16xf32, #tpu.memory_space<vmem>>, vector<1x1x8x16xf32>
    %417 = vector.shape_cast %416 : vector<1x1x8x16xf32> to vector<8x16xf32>
    %c1_165 = arith.constant 1 : index
    %c0_166 = arith.constant 0 : index
    %c8_167 = arith.constant 8 : index
    %c0_168 = arith.constant 0 : index
    %418 = vector.load %arg7[%c1_165, %c0_166, %c8_167, %c0_168] : memref<2x1x32x3xf32, #tpu.memory_space<vmem>>, vector<1x1x8x3xf32>
    %419 = vector.shape_cast %418 : vector<1x1x8x3xf32> to vector<8x3xf32>
    %420 = vector.extract_strided_slice %419 {offsets = [0, 0], sizes = [8, 1], strides = [1, 1]} : vector<8x3xf32> to vector<8x1xf32>
    %421 = vector.extract_strided_slice %419 {offsets = [0, 1], sizes = [8, 1], strides = [1, 1]} : vector<8x3xf32> to vector<8x1xf32>
    %422 = vector.extract_strided_slice %419 {offsets = [0, 2], sizes = [8, 1], strides = [1, 1]} : vector<8x3xf32> to vector<8x1xf32>
    %423 = vector.extract_strided_slice %393 {offsets = [8, 0], sizes = [8, 32], strides = [1, 1]} : vector<16x64xf32> to vector<8x32xf32>
    %424 = vector.extract_strided_slice %393 {offsets = [8, 32], sizes = [8, 32], strides = [1, 1]} : vector<16x64xf32> to vector<8x32xf32>
    %425 = arith.negf %423 : vector<8x32xf32>
    %426 = math.exp %425 : vector<8x32xf32>
    %cst_169 = arith.constant 1.000000e+00 : f32
    %427 = vector.broadcast %cst_169 : f32 to vector<8x32xf32>
    %428 = arith.addf %427, %426 : vector<8x32xf32>
    %429 = arith.divf %427, %428 : vector<8x32xf32>
    %430 = arith.mulf %423, %429 : vector<8x32xf32>
    %431 = arith.mulf %430, %424 : vector<8x32xf32>
    %cst_170 = arith.constant dense<0.000000e+00> : vector<8x32xf32>
    %432 = tpu.matmul %417, %387, %cst_170 {dimension_numbers = #tpu.dot_dimension_numbers<[1], [0], [0], [1], [0, 0, 1, 1], [], []>} : vector<8x16xf32>, vector<16x32xf32>, vector<8x32xf32> -> vector<8x32xf32>
    %433 = arith.mulf %432, %430 : vector<8x32xf32>
    %434 = arith.mulf %432, %424 : vector<8x32xf32>
    %435 = arith.mulf %434, %429 : vector<8x32xf32>
    %cst_171 = arith.constant 1.000000e+00 : f32
    %436 = vector.broadcast %cst_171 : f32 to vector<8x32xf32>
    %437 = arith.subf %436, %429 : vector<8x32xf32>
    %438 = arith.mulf %423, %437 : vector<8x32xf32>
    %cst_172 = arith.constant 1.000000e+00 : f32
    %439 = vector.broadcast %cst_172 : f32 to vector<8x32xf32>
    %440 = arith.addf %439, %438 : vector<8x32xf32>
    %441 = arith.mulf %435, %440 : vector<8x32xf32>
    %442 = vector.broadcast %421 : vector<8x1xf32> to vector<8x32xf32>
    %443 = arith.mulf %431, %442 : vector<8x32xf32>
    %cst_173 = arith.constant dense<0.000000e+00> : vector<16x32xf32>
    %444 = tpu.matmul %417, %443, %cst_173 {dimension_numbers = #tpu.dot_dimension_numbers<[0], [0], [1], [1], [0, 1, 1, 1], [], []>} : vector<8x16xf32>, vector<8x32xf32>, vector<16x32xf32> -> vector<16x32xf32>
    %445 = vector.broadcast %420 : vector<8x1xf32> to vector<8x32xf32>
    %446 = arith.mulf %441, %445 : vector<8x32xf32>
    %447 = vector.broadcast %422 : vector<8x1xf32> to vector<8x32xf32>
    %448 = arith.mulf %433, %447 : vector<8x32xf32>
    %449 = tpu.concatenate %446, %448 in 1 : vector<8x32xf32>, vector<8x32xf32> -> vector<8x64xf32>
    %cst_174 = arith.constant dense<0.000000e+00> : vector<64x16xf32>
    %450 = tpu.matmul %449, %391, %cst_174 {dimension_numbers = #tpu.dot_dimension_numbers<[0], [0], [1], [1], [0, 1, 1, 1], [], []>} : vector<8x64xf32>, vector<8x16xf32>, vector<64x16xf32> -> vector<64x16xf32>
    %451 = arith.addf %376, %450 : vector<64x16xf32>
    %452 = arith.addf %387, %444 : vector<16x32xf32>
    %453 = arith.mulf %451, %451 : vector<64x16xf32>
    %cst_175 = arith.constant dense<0.000000e+00> : vector<64xf32>
    %454 = vector.multi_reduction <add>, %453, %cst_175 [1] : vector<64x16xf32> to vector<64xf32>
    %455 = vector.shape_cast %454 : vector<64xf32> to vector<64x1xf32>
    %456 = math.sqrt %455 : vector<64x1xf32>
    %cst_176 = arith.constant 9.99999974E-6 : f32
    %457 = vector.broadcast %cst_176 : f32 to vector<64x1xf32>
    %458 = arith.addf %456, %457 : vector<64x1xf32>
    %459 = tpu.reciprocal %458 {approx = true} : vector<64x1xf32> -> vector<64x1xf32>
    %460 = vector.broadcast %459 : vector<64x1xf32> to vector<64x16xf32>
    %461 = arith.mulf %451, %460 : vector<64x16xf32>
    %462 = vector.broadcast %10 : vector<64x1xf32> to vector<64x16xf32>
    %463 = arith.mulf %461, %462 : vector<64x16xf32>
    %464 = arith.mulf %452, %452 : vector<16x32xf32>
    %cst_177 = arith.constant dense<0.000000e+00> : vector<16xf32>
    %465 = vector.multi_reduction <add>, %464, %cst_177 [1] : vector<16x32xf32> to vector<16xf32>
    %466 = vector.shape_cast %465 : vector<16xf32> to vector<16x1xf32>
    %467 = math.sqrt %466 : vector<16x1xf32>
    %cst_178 = arith.constant 9.99999974E-6 : f32
    %468 = vector.broadcast %cst_178 : f32 to vector<16x1xf32>
    %469 = arith.addf %467, %468 : vector<16x1xf32>
    %470 = tpu.reciprocal %469 {approx = true} : vector<16x1xf32> -> vector<16x1xf32>
    %471 = vector.broadcast %470 : vector<16x1xf32> to vector<16x32xf32>
    %472 = arith.mulf %452, %471 : vector<16x32xf32>
    %473 = vector.broadcast %14 : vector<16x1xf32> to vector<16x32xf32>
    %474 = arith.mulf %472, %473 : vector<16x32xf32>
    %c1_179 = arith.constant 1 : index
    %c0_180 = arith.constant 0 : index
    %c16_181 = arith.constant 16 : index
    %c0_182 = arith.constant 0 : index
    %475 = vector.load %arg4[%c1_179, %c0_180, %c16_181, %c0_182] : memref<2x1x32x16xf32, #tpu.memory_space<vmem>>, vector<1x1x8x16xf32>
    %476 = vector.shape_cast %475 : vector<1x1x8x16xf32> to vector<8x16xf32>
    %c1_183 = arith.constant 1 : index
    %c0_184 = arith.constant 0 : index
    %c16_185 = arith.constant 16 : index
    %c0_186 = arith.constant 0 : index
    %477 = vector.load %arg5[%c1_183, %c0_184, %c16_185, %c0_186] : memref<2x1x32x16xf32, #tpu.memory_space<vmem>>, vector<1x1x8x16xf32>
    %478 = vector.shape_cast %477 : vector<1x1x8x16xf32> to vector<8x16xf32>
    %479 = tpu.concatenate %476, %478 in 0 : vector<8x16xf32>, vector<8x16xf32> -> vector<16x16xf32>
    %cst_187 = arith.constant dense<0.000000e+00> : vector<16x64xf32>
    %480 = tpu.matmul %479, %463, %cst_187 {dimension_numbers = #tpu.dot_dimension_numbers<[1], [1], [0], [0], [0, 0, 1, 0], [], []>} : vector<16x16xf32>, vector<64x16xf32>, vector<16x64xf32> -> vector<16x64xf32>
    %481 = vector.extract_strided_slice %480 {offsets = [0, 0], sizes = [8, 32], strides = [1, 1]} : vector<16x64xf32> to vector<8x32xf32>
    %482 = vector.extract_strided_slice %480 {offsets = [0, 32], sizes = [8, 32], strides = [1, 1]} : vector<16x64xf32> to vector<8x32xf32>
    %483 = arith.negf %481 : vector<8x32xf32>
    %484 = math.exp %483 : vector<8x32xf32>
    %cst_188 = arith.constant 1.000000e+00 : f32
    %485 = vector.broadcast %cst_188 : f32 to vector<8x32xf32>
    %486 = arith.addf %485, %484 : vector<8x32xf32>
    %487 = arith.divf %485, %486 : vector<8x32xf32>
    %488 = arith.mulf %481, %487 : vector<8x32xf32>
    %489 = arith.mulf %488, %482 : vector<8x32xf32>
    %cst_189 = arith.constant dense<0.000000e+00> : vector<8x16xf32>
    %490 = tpu.matmul %489, %474, %cst_189 {dimension_numbers = #tpu.dot_dimension_numbers<[1], [1], [0], [0], [0, 0, 1, 0], [], []>} : vector<8x32xf32>, vector<16x32xf32>, vector<8x16xf32> -> vector<8x16xf32>
    %491 = vector.extract_strided_slice %490 {offsets = [0, 0], sizes = [1, 16], strides = [1, 1]} : vector<8x16xf32> to vector<1x16xf32>
    %492 = vector.extract_strided_slice %490 {offsets = [1, 0], sizes = [1, 16], strides = [1, 1]} : vector<8x16xf32> to vector<1x16xf32>
    %493 = vector.extract_strided_slice %490 {offsets = [2, 0], sizes = [1, 16], strides = [1, 1]} : vector<8x16xf32> to vector<1x16xf32>
    %494 = vector.extract_strided_slice %490 {offsets = [3, 0], sizes = [1, 16], strides = [1, 1]} : vector<8x16xf32> to vector<1x16xf32>
    %495 = vector.extract_strided_slice %490 {offsets = [4, 0], sizes = [1, 16], strides = [1, 1]} : vector<8x16xf32> to vector<1x16xf32>
    %496 = vector.extract_strided_slice %490 {offsets = [5, 0], sizes = [1, 16], strides = [1, 1]} : vector<8x16xf32> to vector<1x16xf32>
    %497 = vector.extract_strided_slice %490 {offsets = [6, 0], sizes = [1, 16], strides = [1, 1]} : vector<8x16xf32> to vector<1x16xf32>
    %498 = vector.extract_strided_slice %490 {offsets = [7, 0], sizes = [1, 16], strides = [1, 1]} : vector<8x16xf32> to vector<1x16xf32>
    %499 = tpu.concatenate %491, %492, %493, %494, %495, %496, %497, %498 in 1 : vector<1x16xf32>, vector<1x16xf32>, vector<1x16xf32>, vector<1x16xf32>, vector<1x16xf32>, vector<1x16xf32>, vector<1x16xf32>, vector<1x16xf32> -> vector<1x128xf32>
    %c1_190 = arith.constant 1 : index
    %c0_191 = arith.constant 0 : index
    %c2_192 = arith.constant 2 : index
    %c0_193 = arith.constant 0 : index
    %500 = vector.load %arg8[%c1_190, %c0_191, %c2_192, %c0_193] : memref<2x1x4x128xf32, #tpu.memory_space<vmem>>, vector<1x1x1x128xf32>
    %501 = vector.shape_cast %500 : vector<1x1x1x128xf32> to vector<1x128xf32>
    %502 = vector.shape_cast %499 : vector<1x128xf32> to vector<1x1x1x128xf32>
    tpu.vector_store %arg8[%c1_190, %c0_191, %c2_192, %c0_193], %502 {strides = array<i32>} : memref<2x1x4x128xf32, #tpu.memory_space<vmem>>, vector<1x1x1x128xf32>,
    %c1_194 = arith.constant 1 : index
    %c0_195 = arith.constant 0 : index
    %c16_196 = arith.constant 16 : index
    %c0_197 = arith.constant 0 : index
    %503 = vector.load %arg6[%c1_194, %c0_195, %c16_196, %c0_197] : memref<2x1x32x16xf32, #tpu.memory_space<vmem>>, vector<1x1x8x16xf32>
    %504 = vector.shape_cast %503 : vector<1x1x8x16xf32> to vector<8x16xf32>
    %c1_198 = arith.constant 1 : index
    %c0_199 = arith.constant 0 : index
    %c16_200 = arith.constant 16 : index
    %c0_201 = arith.constant 0 : index
    %505 = vector.load %arg7[%c1_198, %c0_199, %c16_200, %c0_201] : memref<2x1x32x3xf32, #tpu.memory_space<vmem>>, vector<1x1x8x3xf32>
    %506 = vector.shape_cast %505 : vector<1x1x8x3xf32> to vector<8x3xf32>
    %507 = vector.extract_strided_slice %506 {offsets = [0, 0], sizes = [8, 1], strides = [1, 1]} : vector<8x3xf32> to vector<8x1xf32>
    %508 = vector.extract_strided_slice %506 {offsets = [0, 1], sizes = [8, 1], strides = [1, 1]} : vector<8x3xf32> to vector<8x1xf32>
    %509 = vector.extract_strided_slice %506 {offsets = [0, 2], sizes = [8, 1], strides = [1, 1]} : vector<8x3xf32> to vector<8x1xf32>
    %510 = vector.extract_strided_slice %480 {offsets = [8, 0], sizes = [8, 32], strides = [1, 1]} : vector<16x64xf32> to vector<8x32xf32>
    %511 = vector.extract_strided_slice %480 {offsets = [8, 32], sizes = [8, 32], strides = [1, 1]} : vector<16x64xf32> to vector<8x32xf32>
    %512 = arith.negf %510 : vector<8x32xf32>
    %513 = math.exp %512 : vector<8x32xf32>
    %cst_202 = arith.constant 1.000000e+00 : f32
    %514 = vector.broadcast %cst_202 : f32 to vector<8x32xf32>
    %515 = arith.addf %514, %513 : vector<8x32xf32>
    %516 = arith.divf %514, %515 : vector<8x32xf32>
    %517 = arith.mulf %510, %516 : vector<8x32xf32>
    %518 = arith.mulf %517, %511 : vector<8x32xf32>
    %cst_203 = arith.constant dense<0.000000e+00> : vector<8x32xf32>
    %519 = tpu.matmul %504, %474, %cst_203 {dimension_numbers = #tpu.dot_dimension_numbers<[1], [0], [0], [1], [0, 0, 1, 1], [], []>} : vector<8x16xf32>, vector<16x32xf32>, vector<8x32xf32> -> vector<8x32xf32>
    %520 = arith.mulf %519, %517 : vector<8x32xf32>
    %521 = arith.mulf %519, %511 : vector<8x32xf32>
    %522 = arith.mulf %521, %516 : vector<8x32xf32>
    %cst_204 = arith.constant 1.000000e+00 : f32
    %523 = vector.broadcast %cst_204 : f32 to vector<8x32xf32>
    %524 = arith.subf %523, %516 : vector<8x32xf32>
    %525 = arith.mulf %510, %524 : vector<8x32xf32>
    %cst_205 = arith.constant 1.000000e+00 : f32
    %526 = vector.broadcast %cst_205 : f32 to vector<8x32xf32>
    %527 = arith.addf %526, %525 : vector<8x32xf32>
    %528 = arith.mulf %522, %527 : vector<8x32xf32>
    %529 = vector.broadcast %508 : vector<8x1xf32> to vector<8x32xf32>
    %530 = arith.mulf %518, %529 : vector<8x32xf32>
    %cst_206 = arith.constant dense<0.000000e+00> : vector<16x32xf32>
    %531 = tpu.matmul %504, %530, %cst_206 {dimension_numbers = #tpu.dot_dimension_numbers<[0], [0], [1], [1], [0, 1, 1, 1], [], []>} : vector<8x16xf32>, vector<8x32xf32>, vector<16x32xf32> -> vector<16x32xf32>
    %532 = vector.broadcast %507 : vector<8x1xf32> to vector<8x32xf32>
    %533 = arith.mulf %528, %532 : vector<8x32xf32>
    %534 = vector.broadcast %509 : vector<8x1xf32> to vector<8x32xf32>
    %535 = arith.mulf %520, %534 : vector<8x32xf32>
    %536 = tpu.concatenate %533, %535 in 1 : vector<8x32xf32>, vector<8x32xf32> -> vector<8x64xf32>
    %cst_207 = arith.constant dense<0.000000e+00> : vector<64x16xf32>
    %537 = tpu.matmul %536, %478, %cst_207 {dimension_numbers = #tpu.dot_dimension_numbers<[0], [0], [1], [1], [0, 1, 1, 1], [], []>} : vector<8x64xf32>, vector<8x16xf32>, vector<64x16xf32> -> vector<64x16xf32>
    %538 = arith.addf %463, %537 : vector<64x16xf32>
    %539 = arith.addf %474, %531 : vector<16x32xf32>
    %540 = arith.mulf %538, %538 : vector<64x16xf32>
    %cst_208 = arith.constant dense<0.000000e+00> : vector<64xf32>
    %541 = vector.multi_reduction <add>, %540, %cst_208 [1] : vector<64x16xf32> to vector<64xf32>
    %542 = vector.shape_cast %541 : vector<64xf32> to vector<64x1xf32>
    %543 = math.sqrt %542 : vector<64x1xf32>
    %cst_209 = arith.constant 9.99999974E-6 : f32
    %544 = vector.broadcast %cst_209 : f32 to vector<64x1xf32>
    %545 = arith.addf %543, %544 : vector<64x1xf32>
    %546 = tpu.reciprocal %545 {approx = true} : vector<64x1xf32> -> vector<64x1xf32>
    %547 = vector.broadcast %546 : vector<64x1xf32> to vector<64x16xf32>
    %548 = arith.mulf %538, %547 : vector<64x16xf32>
    %549 = vector.broadcast %10 : vector<64x1xf32> to vector<64x16xf32>
    %550 = arith.mulf %548, %549 : vector<64x16xf32>
    %551 = arith.mulf %539, %539 : vector<16x32xf32>
    %cst_210 = arith.constant dense<0.000000e+00> : vector<16xf32>
    %552 = vector.multi_reduction <add>, %551, %cst_210 [1] : vector<16x32xf32> to vector<16xf32>
    %553 = vector.shape_cast %552 : vector<16xf32> to vector<16x1xf32>
    %554 = math.sqrt %553 : vector<16x1xf32>
    %cst_211 = arith.constant 9.99999974E-6 : f32
    %555 = vector.broadcast %cst_211 : f32 to vector<16x1xf32>
    %556 = arith.addf %554, %555 : vector<16x1xf32>
    %557 = tpu.reciprocal %556 {approx = true} : vector<16x1xf32> -> vector<16x1xf32>
    %558 = vector.broadcast %557 : vector<16x1xf32> to vector<16x32xf32>
    %559 = arith.mulf %539, %558 : vector<16x32xf32>
    %560 = vector.broadcast %14 : vector<16x1xf32> to vector<16x32xf32>
    %561 = arith.mulf %559, %560 : vector<16x32xf32>
    %c1_212 = arith.constant 1 : index
    %c0_213 = arith.constant 0 : index
    %c24_214 = arith.constant 24 : index
    %c0_215 = arith.constant 0 : index
    %562 = vector.load %arg4[%c1_212, %c0_213, %c24_214, %c0_215] : memref<2x1x32x16xf32, #tpu.memory_space<vmem>>, vector<1x1x8x16xf32>
    %563 = vector.shape_cast %562 : vector<1x1x8x16xf32> to vector<8x16xf32>
    %cst_216 = arith.constant dense<0.000000e+00> : vector<8x64xf32>
    %564 = tpu.matmul %563, %550, %cst_216 {dimension_numbers = #tpu.dot_dimension_numbers<[1], [1], [0], [0], [0, 0, 1, 0], [], []>} : vector<8x16xf32>, vector<64x16xf32>, vector<8x64xf32> -> vector<8x64xf32>
    %565 = vector.extract_strided_slice %564 {offsets = [0, 0], sizes = [8, 32], strides = [1, 1]} : vector<8x64xf32> to vector<8x32xf32>
    %566 = vector.extract_strided_slice %564 {offsets = [0, 32], sizes = [8, 32], strides = [1, 1]} : vector<8x64xf32> to vector<8x32xf32>
    %567 = arith.negf %565 : vector<8x32xf32>
    %568 = math.exp %567 : vector<8x32xf32>
    %cst_217 = arith.constant 1.000000e+00 : f32
    %569 = vector.broadcast %cst_217 : f32 to vector<8x32xf32>
    %570 = arith.addf %569, %568 : vector<8x32xf32>
    %571 = arith.divf %569, %570 : vector<8x32xf32>
    %572 = arith.mulf %565, %571 : vector<8x32xf32>
    %573 = arith.mulf %572, %566 : vector<8x32xf32>
    %cst_218 = arith.constant dense<0.000000e+00> : vector<8x16xf32>
    %574 = tpu.matmul %573, %561, %cst_218 {dimension_numbers = #tpu.dot_dimension_numbers<[1], [1], [0], [0], [0, 0, 1, 0], [], []>} : vector<8x32xf32>, vector<16x32xf32>, vector<8x16xf32> -> vector<8x16xf32>
    %575 = vector.extract_strided_slice %574 {offsets = [0, 0], sizes = [1, 16], strides = [1, 1]} : vector<8x16xf32> to vector<1x16xf32>
    %576 = vector.extract_strided_slice %574 {offsets = [1, 0], sizes = [1, 16], strides = [1, 1]} : vector<8x16xf32> to vector<1x16xf32>
    %577 = vector.extract_strided_slice %574 {offsets = [2, 0], sizes = [1, 16], strides = [1, 1]} : vector<8x16xf32> to vector<1x16xf32>
    %578 = vector.extract_strided_slice %574 {offsets = [3, 0], sizes = [1, 16], strides = [1, 1]} : vector<8x16xf32> to vector<1x16xf32>
    %579 = vector.extract_strided_slice %574 {offsets = [4, 0], sizes = [1, 16], strides = [1, 1]} : vector<8x16xf32> to vector<1x16xf32>
    %580 = vector.extract_strided_slice %574 {offsets = [5, 0], sizes = [1, 16], strides = [1, 1]} : vector<8x16xf32> to vector<1x16xf32>
    %581 = vector.extract_strided_slice %574 {offsets = [6, 0], sizes = [1, 16], strides = [1, 1]} : vector<8x16xf32> to vector<1x16xf32>
    %582 = vector.extract_strided_slice %574 {offsets = [7, 0], sizes = [1, 16], strides = [1, 1]} : vector<8x16xf32> to vector<1x16xf32>
    %583 = tpu.concatenate %575, %576, %577, %578, %579, %580, %581, %582 in 1 : vector<1x16xf32>, vector<1x16xf32>, vector<1x16xf32>, vector<1x16xf32>, vector<1x16xf32>, vector<1x16xf32>, vector<1x16xf32>, vector<1x16xf32> -> vector<1x128xf32>
    %c1_219 = arith.constant 1 : index
    %c0_220 = arith.constant 0 : index
    %c3_221 = arith.constant 3 : index
    %c0_222 = arith.constant 0 : index
    %584 = vector.load %arg8[%c1_219, %c0_220, %c3_221, %c0_222] : memref<2x1x4x128xf32, #tpu.memory_space<vmem>>, vector<1x1x1x128xf32>
    %585 = vector.shape_cast %584 : vector<1x1x1x128xf32> to vector<1x128xf32>
    %586 = vector.shape_cast %583 : vector<1x128xf32> to vector<1x1x1x128xf32>
    tpu.vector_store %arg8[%c1_219, %c0_220, %c3_221, %c0_222], %586 {strides = array<i32>} : memref<2x1x4x128xf32, #tpu.memory_space<vmem>>, vector<1x1x1x128xf32>,
    return
  }
  func.func @transform_0(%arg0: i32) -> (i32, i32, i32) {
    %c0_i32 = arith.constant 0 : i32
    %c0_i32_0 = arith.constant 0 : i32
    %c0_i32_1 = arith.constant 0 : i32
    return %arg0, %c0_i32, %c0_i32_0 : i32, i32, i32
  }
  func.func @transform_1(%arg0: i32) -> (i32, i32, i32) {
    %c0_i32 = arith.constant 0 : i32
    %c0_i32_0 = arith.constant 0 : i32
    %c0_i32_1 = arith.constant 0 : i32
    return %arg0, %c0_i32, %c0_i32_0 : i32, i32, i32
  }
  func.func @transform_2(%arg0: i32) -> (i32, i32, i32) {
    %c0_i32 = arith.constant 0 : i32
    %c0_i32_0 = arith.constant 0 : i32
    %c0_i32_1 = arith.constant 0 : i32
    return %arg0, %c0_i32, %c0_i32_0 : i32, i32, i32
  }
  func.func @transform_3(%arg0: i32) -> (i32, i32, i32, i32) {
    %c0_i32 = arith.constant 0 : i32
    %c0_i32_0 = arith.constant 0 : i32
    %c0_i32_1 = arith.constant 0 : i32
    %c0_i32_2 = arith.constant 0 : i32
    return %c0_i32, %arg0, %c0_i32_0, %c0_i32_1 : i32, i32, i32, i32
  }
  func.func @transform_4(%arg0: i32) -> (i32, i32, i32, i32) {
    %c0_i32 = arith.constant 0 : i32
    %c0_i32_0 = arith.constant 0 : i32
    %c0_i32_1 = arith.constant 0 : i32
    %c0_i32_2 = arith.constant 0 : i32
    return %c0_i32, %arg0, %c0_i32_0, %c0_i32_1 : i32, i32, i32, i32
  }
  func.func @transform_5(%arg0: i32) -> (i32, i32, i32, i32) {
    %c0_i32 = arith.constant 0 : i32
    %c0_i32_0 = arith.constant 0 : i32
    %c0_i32_1 = arith.constant 0 : i32
    %c0_i32_2 = arith.constant 0 : i32
    return %c0_i32, %arg0, %c0_i32_0, %c0_i32_1 : i32, i32, i32, i32
  }
  func.func @transform_6(%arg0: i32) -> (i32, i32, i32, i32) {
    %c0_i32 = arith.constant 0 : i32
    %c0_i32_0 = arith.constant 0 : i32
    %c0_i32_1 = arith.constant 0 : i32
    %c0_i32_2 = arith.constant 0 : i32
    return %c0_i32, %arg0, %c0_i32_0, %c0_i32_1 : i32, i32, i32, i32
  }
  func.func @transform_7(%arg0: i32) -> (i32, i32, i32, i32) {
    %c0_i32 = arith.constant 0 : i32
    %c0_i32_0 = arith.constant 0 : i32
    %c0_i32_1 = arith.constant 0 : i32
    %c0_i32_2 = arith.constant 0 : i32
    return %c0_i32, %arg0, %c0_i32_0, %c0_i32_1 : i32, i32, i32, i32
  }
}

</mosaic_0001>

<bundles_post_ra>
// kernel: tpu_custom_call.1
= control target key start
LH: loop header
LB: loop body
LE: loop exit
PB: predicated region body
PF: predicated region fallthrough
CT: control target
= control target key end

     0   :  { %12 = vsyncpa [#allocation7], 0  ;;  %s9267_s0 = inlined_call_operand.vmem [shape: f32[2,32,16], index: 0, kind: input, shape index: {}]   ;;  %s9268_s1 = inlined_call_operand.vmem [shape: f32[2,16,32], index: 1, kind: input, shape index: {}]   ;;  %s9269_s2 = inlined_call_operand.vmem [shape: f32[2,32,16], index: 2, kind: input, shape index: {}]   ;;  %s9270_s3 = inlined_call_operand.vmem [shape: f32[2,2,32,16], index: 3, kind: input, shape index: {}]   ;;  %s9271_s4 = inlined_call_operand.vmem [shape: f32[2,2,32,16], index: 4, kind: input, shape index: {}]   ;;  %s9272_s5 = inlined_call_operand.vmem [shape: f32[2,2,32,16], index: 5, kind: input, shape index: {}]   ;;  %s9273_s6 = inlined_call_operand.vmem [shape: f32[2,2,32,3], index: 6, kind: input, shape index: {}]   ;;  %s9274_s7 = inlined_call_operand.hbm [shape: f32[2,2,4,128], index: 7, kind: output, shape index: {}]  }
   0x1   :  { %14 = vsyncpa [#allocation7 + $0x1], 0  ;;  %s7616_s24 = smov 0   ;;  %s7618_s25 = smov 0  }
   0x2   :  { %s7620_s26 = smov 0   ;;  %s7622_s27 = smov 0  }
   0x3 LB: > { %s7637_s28 = sadd.s32 4294967295, %s7558_s27   ;;  %s6079_s29 = sadd.s32 4294967294, %s7558_s27   ;;  %s7558_s27 = sphi %s7622_s27, %s9285_s27   ;;  %s7554_s26 = sphi %s7620_s26, %s9284_s26   ;;  %s7550_s25 = sphi %s7618_s25, %s9283_s25   ;;  %s7546_s24 = sphi %s7616_s24, %s9282_s24  }
   0x4   : > { %s7641_s30 = sadd.s32 1, %s7558_s27   ;;  %s105_s8 = sadd.s32 1, %s7554_s26 }
   0x5   : > { %s102_s9 = ssub.s32 %s7558_s27, %s7641_s30  ;;  %p112_p0 = scmp.ne.s32.totalorder %s7554_s26, %s7550_s25 }
   0x6   : > { %p103_p1 = scmp.eq.s32.totalorder %s102_s9, 0  ;;  %p113_p2 = scmp.eq.s32.totalorder %s7558_s27, 0 }
   0x7   : > { %p220_p3 = scmp.eq.s32.totalorder %s7637_s28, 1  ;;  %p225_p4 = scmp.ne.s32.totalorder %s7550_s25, %s7546_s24 }
   0x8   : > { %s7653_s10 = scalar_select %p103_p1, %s7554_s26, %s105_s8  }
   0x9   : > { %p7655_p5 = por %p113_p2, %p112_p0  ;;  %p7659_p6 = por %p220_p3, %p112_p0 }
   0xa   : > { %p226_p7 = scmp.eq.s32.totalorder %s6079_s29, 1  ;;  %p6081_p9 = scmp.ge.s32.totalorder %s7558_s27, 2 }
   0xc   : > { %p7663_p8 = por %p226_p7, %p225_p4  ;;  %242 = sbr.rel (%p6081_p9) target bundleno = 51 (0x33), region = 16 }
  0x13   : > { %269 = sbr.rel (!%p7655_p5) target bundleno = 27 (0x1b), region = 32  ;;  %s271_s14 = sand.u32 (%p7655_p5), 1, %s7554_s26  }
  0x14   : > { %s6309_s15 = sshll.u32 (%p7655_p5), %s7558_s27, 5  ;;  %s6082_s16 = sshll.u32 (%p7655_p5), %s271_s14, 6 }
  0x15   : > { %s276_s19 = scalar_lea.vmem (%p7655_p5), %s9270_s3, %s6309_s15  ;;  %s273_s20 = scalar_lea.vmem (%p7655_p5), [#allocation2], %s6082_s16 }
  0x16   : > { %v318_v0 = vld [vmem:[%s276_s19] sm:$0xff] (%p7655_p5)  ;;  %v320_v1 = vld [vmem:[%s276_s19 + $0x8] sm:$0xff] (%p7655_p5)  ;;  %v322_v2 = vld [vmem:[%s276_s19 + $0x10] sm:$0xff] (%p7655_p5) }
  0x17   : > { %319 = vst [vmem:[%s273_s20] sm:$0xff] (%p7655_p5), %v318_v0  ;;  %321 = vst [vmem:[%s273_s20 + $0x8] sm:$0xff] (%p7655_p5), %v320_v1  ;;  %v324_v3 = vld [vmem:[%s276_s19 + $0x18] sm:$0xff] (%p7655_p5)  ;;  %v326_v4 = vld [vmem:[%s276_s19 + $0x40] sm:$0xff] (%p7655_p5) }
  0x18   : > { %323 = vst [vmem:[%s273_s20 + $0x10] sm:$0xff] (%p7655_p5), %v322_v2  ;;  %v328_v5 = vld [vmem:[%s276_s19 + $0x48] sm:$0xff] (%p7655_p5)  ;;  %325 = vst [vmem:[%s273_s20 + $0x18] sm:$0xff] (%p7655_p5), %v324_v3  ;;  %v330_v6 = vld [vmem:[%s276_s19 + $0x50] sm:$0xff] (%p7655_p5) }
  0x19   : > { %327 = vst [vmem:[%s273_s20 + $0x20] sm:$0xff] (%p7655_p5), %v326_v4  ;;  %329 = vst [vmem:[%s273_s20 + $0x28] sm:$0xff] (%p7655_p5), %v328_v5  ;;  %v332_v7 = vld [vmem:[%s276_s19 + $0x58] sm:$0xff] (%p7655_p5) }
  0x1a   : > { %331 = vst [vmem:[%s273_s20 + $0x30] sm:$0xff] %v330_v6  ;;  %333 = vst [vmem:[%s273_s20 + $0x38] sm:$0xff] %v332_v7 }
  0x1b PF: > { %339 = sbr.rel (!%p7655_p5) target bundleno = 35 (0x23), region = 70  ;;  %s341_s21 = sand.u32 (%p7655_p5), 1, %s7554_s26  }
  0x1c   : > { %s6310_s22 = sshll.u32 (%p7655_p5), %s7558_s27, 5  ;;  %s6085_s23 = sshll.u32 (%p7655_p5), %s341_s21, 6 }
  0x1d   : > { %s346_s9 = scalar_lea.vmem (%p7655_p5), %s9271_s4, %s6310_s22  ;;  %s343_s14 = scalar_lea.vmem (%p7655_p5), [#allocation3], %s6085_s23 }
  0x1e   : > { %v388_v8 = vld [vmem:[%s346_s9] sm:$0xff] (%p7655_p5)  ;;  %v390_v9 = vld [vmem:[%s346_s9 + $0x8] sm:$0xff] (%p7655_p5)  ;;  %v392_v10 = vld [vmem:[%s346_s9 + $0x10] sm:$0xff] (%p7655_p5) }
  0x1f   : > { %389 = vst [vmem:[%s343_s14] sm:$0xff] (%p7655_p5), %v388_v8  ;;  %391 = vst [vmem:[%s343_s14 + $0x8] sm:$0xff] (%p7655_p5), %v390_v9  ;;  %v394_v11 = vld [vmem:[%s346_s9 + $0x18] sm:$0xff] (%p7655_p5)  ;;  %v396_v12 = vld [vmem:[%s346_s9 + $0x40] sm:$0xff] (%p7655_p5) }
  0x20   : > { %393 = vst [vmem:[%s343_s14 + $0x10] sm:$0xff] (%p7655_p5), %v392_v10  ;;  %v398_v13 = vld [vmem:[%s346_s9 + $0x48] sm:$0xff] (%p7655_p5)  ;;  %395 = vst [vmem:[%s343_s14 + $0x18] sm:$0xff] (%p7655_p5), %v394_v11  ;;  %v400_v14 = vld [vmem:[%s346_s9 + $0x50] sm:$0xff] (%p7655_p5) }
  0x21   : > { %397 = vst [vmem:[%s343_s14 + $0x20] sm:$0xff] (%p7655_p5), %v396_v12  ;;  %399 = vst [vmem:[%s343_s14 + $0x28] sm:$0xff] (%p7655_p5), %v398_v13  ;;  %v402_v15 = vld [vmem:[%s346_s9 + $0x58] sm:$0xff] (%p7655_p5) }
  0x22   : > { %401 = vst [vmem:[%s343_s14 + $0x30] sm:$0xff] %v400_v14  ;;  %403 = vst [vmem:[%s343_s14 + $0x38] sm:$0xff] %v402_v15 }
  0x23 PF: > { %409 = sbr.rel (!%p7655_p5) target bundleno = 43 (0x2b), region = 108  ;;  %s411_s15 = sand.u32 (%p7655_p5), 1, %s7554_s26  }
  0x24   : > { %s6311_s16 = sshll.u32 (%p7655_p5), %s7558_s27, 5  ;;  %s6088_s17 = sshll.u32 (%p7655_p5), %s411_s15, 6 }
  0x25   : > { %s416_s20 = scalar_lea.vmem (%p7655_p5), %s9272_s5, %s6311_s16  ;;  %s413_s21 = scalar_lea.vmem (%p7655_p5), [#allocation4], %s6088_s17 }
  0x26   : > { %v458_v16 = vld [vmem:[%s416_s20] sm:$0xff] (%p7655_p5)  ;;  %v460_v17 = vld [vmem:[%s416_s20 + $0x8] sm:$0xff] (%p7655_p5)  ;;  %v462_v18 = vld [vmem:[%s416_s20 + $0x10] sm:$0xff] (%p7655_p5) }
  0x27   : > { %459 = vst [vmem:[%s413_s21] sm:$0xff] (%p7655_p5), %v458_v16  ;;  %461 = vst [vmem:[%s413_s21 + $0x8] sm:$0xff] (%p7655_p5), %v460_v17  ;;  %v464_v19 = vld [vmem:[%s416_s20 + $0x18] sm:$0xff] (%p7655_p5)  ;;  %v466_v20 = vld [vmem:[%s416_s20 + $0x40] sm:$0xff] (%p7655_p5) }
  0x28   : > { %463 = vst [vmem:[%s413_s21 + $0x10] sm:$0xff] (%p7655_p5), %v462_v18  ;;  %v468_v21 = vld [vmem:[%s416_s20 + $0x48] sm:$0xff] (%p7655_p5)  ;;  %465 = vst [vmem:[%s413_s21 + $0x18] sm:$0xff] (%p7655_p5), %v464_v19  ;;  %v470_v22 = vld [vmem:[%s416_s20 + $0x50] sm:$0xff] (%p7655_p5) }
  0x29   : > { %467 = vst [vmem:[%s413_s21 + $0x20] sm:$0xff] (%p7655_p5), %v466_v20  ;;  %469 = vst [vmem:[%s413_s21 + $0x28] sm:$0xff] (%p7655_p5), %v468_v21  ;;  %v472_v23 = vld [vmem:[%s416_s20 + $0x58] sm:$0xff] (%p7655_p5) }
  0x2a   : > { %471 = vst [vmem:[%s413_s21 + $0x30] sm:$0xff] %v470_v22  ;;  %473 = vst [vmem:[%s413_s21 + $0x38] sm:$0xff] %v472_v23 }
  0x2b PF: > { %479 = sbr.rel (!%p7655_p5) target bundleno = 51 (0x33), region = 146  ;;  %s481_s22 = sand.u32 (%p7655_p5), 1, %s7554_s26  }
  0x2c   : > { %s6312_s23 = sshll.u32 (%p7655_p5), %s7558_s27, 5  ;;  %s6091_s29 = sshll.u32 (%p7655_p5), %s481_s22, 6 }
  0x2d   : > { %s486_s14 = scalar_lea.vmem (%p7655_p5), %s9273_s6, %s6312_s23  ;;  %s483_s15 = scalar_lea.vmem (%p7655_p5), [#allocation5], %s6091_s29 }
  0x2e   : > { %v528_v24 = vld [vmem:[%s486_s14] sm:$0xff] (%p7655_p5)  ;;  %v530_v25 = vld [vmem:[%s486_s14 + $0x8] sm:$0xff] (%p7655_p5)  ;;  %v532_v26 = vld [vmem:[%s486_s14 + $0x10] sm:$0xff] (%p7655_p5) }
  0x2f   : > { %529 = vst [vmem:[%s483_s15] sm:$0xff] (%p7655_p5), %v528_v24  ;;  %531 = vst [vmem:[%s483_s15 + $0x8] sm:$0xff] (%p7655_p5), %v530_v25  ;;  %v534_v27 = vld [vmem:[%s486_s14 + $0x18] sm:$0xff] (%p7655_p5)  ;;  %v536_v28 = vld [vmem:[%s486_s14 + $0x40] sm:$0xff] (%p7655_p5) }
  0x30   : > { %533 = vst [vmem:[%s483_s15 + $0x10] sm:$0xff] (%p7655_p5), %v532_v26  ;;  %v538_v29 = vld [vmem:[%s486_s14 + $0x48] sm:$0xff] (%p7655_p5)  ;;  %535 = vst [vmem:[%s483_s15 + $0x18] sm:$0xff] (%p7655_p5), %v534_v27  ;;  %v540_v30 = vld [vmem:[%s486_s14 + $0x50] sm:$0xff] (%p7655_p5) }
  0x31   : > { %537 = vst [vmem:[%s483_s15 + $0x20] sm:$0xff] (%p7655_p5), %v536_v28  ;;  %539 = vst [vmem:[%s483_s15 + $0x28] sm:$0xff] (%p7655_p5), %v538_v29  ;;  %v542_v31 = vld [vmem:[%s486_s14 + $0x58] sm:$0xff] (%p7655_p5) }
  0x32   : > { %541 = vst [vmem:[%s483_s15 + $0x30] sm:$0xff] %v540_v30  ;;  %543 = vst [vmem:[%s483_s15 + $0x38] sm:$0xff] %v542_v31 }
  0x33 PF: > { %p6094_p10 = scmp.ge.s32.totalorder %s7558_s27, 1  ;;  %p548_p11 = scmp.lt.s32.totalorder %s7558_s27, 3 }
  0x35   : > { %p549_p12 = pnand %p6094_p10, %p548_p11 }
  0x36   : > { %p634_p13 = scmp.lt.s32.totalorder (!%p549_p12), %s7637_s28, 1  ;;  %s7702_s11 = sand.u32 (!%p549_p12), 1, %s7550_s25   ;;  %v7560_v32 = vmov (!%p549_p12), 0   ;;  %vm667_vm0 = vcmask (!%p549_p12), 130048   ;;  %v7561_v49 = vmov (!%p549_p12), 2   ;;  %vm750_vm2 = vcmask (!%p549_p12), 261120  }
  0x37   : > { %552 = sbr.rel (%p549_p12) target bundleno = 8224 (0x2020), region = 184  ;;  %s7705_s16 = sshll.u32 (!%p549_p12), %s7702_s11, 6  ;;  %7153 = vset.pattern.permute.xlu1 (!%p549_p12), %v7560_v32  ;;  %vm7723_vm1 = vmpackc.low (!%p549_p12), %vm667_vm0, %vm667_vm0  ;;  %7152 = vset.pattern.permute.xlu0 (!%p549_p12), %v7561_v49  ;;  %v7562_v50 = vmov (!%p549_p12), 0.0|0.0   ;;  %vm7563_vm4 = vmmov (!%p549_p12), 0   ;;  %v7564_v55 = vmov (!%p549_p12), 0.0   ;;  %v7566_v58 = vmov (!%p549_p12), 1  }
  0x38   : > { %s7713_s19 = scalar_lea.vmem (!%p549_p12), [#allocation2], %s7705_s16  ;;  %s7729_s23 = scalar_lea.vmem (!%p549_p12), [#allocation5], %s7705_s16  ;;  %6896 = vmatprep.subr.bf16.mxu1 (!%p549_p12), %v7562_v50  ;;  %vm7826_vm3 = vmpackc.low (!%p549_p12), %vm750_vm2, %vm750_vm2  ;;  %6531 = vmatprep.mubr.msk.f32.mxu1 (!%p549_p12), %vm7563_vm4, %v7564_v55  ;;  %vm1143_vm5 = vcmask (!%p549_p12), 64512  }
  0x39   : > { %v771_v33 = vld [vmem:[%s7713_s19] sm:$0xff] (!%p549_p12)  ;;  %s7802_s14 = scalar_lea.vmem (!%p549_p12), [#allocation3], %s7705_s16  ;;  %s7850_s29 = scalar_lea.vmem (!%p549_p12), [#allocation4], %s7705_s16 }
  0x3a   : > { %6524 = vmatprep.mubr.msk.f32.mxu0 (!%p549_p12), %vm667_vm0, %v771_v33  ;;  %v1012_v35 = vld [vmem:[%s7729_s23] sm:$0xff] (!%p549_p12)  ;;  %s7567_s16 = smov (!%p549_p12), 32   ;;  %s7570_s8 = smov (!%p549_p12), 48  }
  0x3b   : > { %1226 = vperm.xlu1 (!%p549_p12), %7153, %v1012_v35   ;;  %v7805_v48 = vld [vmem:[%s7802_s14] sm:$0xff] (!%p549_p12)  ;;  %s6306_s20 = sshll.u32 (!%p549_p12), %s7637_s28, 6 }
  0x3c   : > { %v1011_v5 = vld [vmem:[%s7850_s29] sm:$0xff] (!%p549_p12) }
  0x3e   : > { %s7709_s17 = scalar_select %p634_p13, %s7637_s28, 1 }
  0x3f   : > { %s7573_s28 = smov [#allocation6]  }
  0x40   : > { %s6313_s18 = sshll.u32 %s7709_s17, 5  ;;  %s6314_s15 = sshll.u32 %s7709_s17, 4 }
  0x41   : > { %s7719_s22 = scalar_lea.vmem %s9267_s0, %s6313_s18  ;;  %s7758_s9 = scalar_lea.vmem %s9269_s2, %s6313_s18 }
  0x42   : > { %v7733_v36 = vld [vmem:[%s7719_s22] sm:$0xff]  ;;  %v7736_v37 = vld [vmem:[%s7719_s22 + $0x8] sm:$0xff]  ;;  %v7739_v38 = vld [vmem:[%s7719_s22 + $0x10] sm:$0xff]  ;;  %s7815_s21 = scalar_lea.vmem %s9268_s1, %s6314_s15  ;;  %s7565_s17 = smov 96  }
  0x43   : > { %v7743_v39 = vpack.c.bf16 %v7736_v37, %v7733_v36  ;;  %v7746_v40 = vld [vmem:[%s7719_s22 + $0x18] sm:$0xff]  ;;  %v7767_v42 = vld [vmem:[%s7758_s9] sm:$0xff]  ;;  %v7770_v43 = vld [vmem:[%s7758_s9 + $0x8] sm:$0xff] }
  0x44   : > { %v7750_v41 = vpack.c.bf16 %v7746_v40, %v7739_v38  ;;  %v7774_v44 = vpack.c.bf16 %v7770_v43, %v7767_v42  ;;  %v7783_v45 = vld [vmem:[%s7758_s9 + $0x10] sm:$0xff]  ;;  %v7786_v46 = vld [vmem:[%s7758_s9 + $0x18] sm:$0xff]  ;;  %v7819_v51 = vld [vmem:[%s7815_s21] sm:$0xff] }
  0x45   : > { %6874 = vmatprep.subr.msk.bf16.mxu0 %vm7723_vm1, %v7743_v39  ;;  %v7790_v47 = vpack.c.bf16 %v7786_v46, %v7783_v45  ;;  %v7822_v52 = vld [vmem:[%s7815_s21 + $0x8] sm:$0xff] }
  0x46   : > { %6877 = vmatpush3.bf16.xpose.msk.msra.mxu0 %vm7723_vm1, %v7743_v39  ;;  %v7832_v54 = vpack.c.bf16 %v7822_v52, %v7819_v51 }
  0x47   : > { %6880 = vmatprep.subr.msk.bf16.mxu0 %vm7723_vm1, %v7750_v41 }
  0x48   : > { %6899 = vmatpush3.bf16.xpose.msk.msra.mxu1 %vm7826_vm3, %v7832_v54 }
  0x49   : > { %6900 = vmatprep.subr.bf16.mxu1 %v7562_v50 }
  0x4e   : > { %6883 = vmatpush3.bf16.xpose.msk.msra.mxu0 %vm7723_vm1, %v7750_v41 }
  0x4f   : > { %6886 = vmatprep.subr.msk.bf16.mxu0 %vm7723_vm1, %v7774_v44 }
  0x56   : > { %6889 = vmatpush3.bf16.xpose.msk.msra.mxu0 %vm7723_vm1, %v7774_v44 }
  0x57   : > { %6892 = vmatprep.subr.msk.bf16.mxu0 %vm7723_vm1, %v7790_v47 }
  0x5e   : > { %6895 = vmatpush3.bf16.xpose.msk.msra.mxu0 %vm7723_vm1, %v7790_v47 }
  0x5f   : > { %6931 = vmatprep.subr.bf16.mxu0 %v7562_v50 }
  0x65   : > { %6525 = vmatmul.mubr.msk.f32.vlgmr.msra.gmra.mrb[0].mxu0 %vm667_vm0, %v7805_v48 }
  0x66   : > { %6590 = vmatprep.mubr.msk.f32.mxu0 %vm7563_vm4, %v7564_v55 }
  0xba   : > { %v1227_v6 = vpop.permute.xlu1 %1226 }
 0x138   : > { %v6526_v56 = vpop.f32.mrb[0].mxu0 }
 0x139   : > { %1021 = vrot.lane.b32.xlu1 %v6526_v56, %s7565_s17  ;;  %v869_v57 = vpop.f32.mrb[1].mxu0  ;;  %v6120_v62 = vmul.f32 -1.442695, %v6526_v56 }
 0x13a   : > { %886 = vrot.lane.b32.xlu0 %v869_v57, %s7565_s17  ;;  %v6116_v59 = vmul.f32 -1.442695, %v869_v57 }
 0x13c   : > { %7170 = vpow2.f32 %v6116_v59 }
 0x13e   : > { %1231 = vperm.xlu0 %7152, %v1012_v35  }
 0x142   : > { %7154 = vset.pattern.permute.xlu0 %v7566_v58 }
 0x143   : > { %1107 = vperm.xlu0 %7154, %v1012_v35  }
 0x146   : > { %v7171_v60 = vpop.eup %7170 }
 0x147   : > { %v881_v61 = vadd.f32 1.0, %v7171_v60 }
 0x149   : > { %7172 = vrcp.f32 %v881_v61 }
 0x14a   : > { %7174 = vpow2.f32 %v6120_v62 }
 0x153   : > { %v7173_v63 = vpop.eup %7172 }
 0x154   : > { %v7175_v0 = vpop.eup %7174  ;;  %v884_v1 = vmul.f32 %v7173_v63, %v869_v57 }
 0x155   : > { %v1016_v4 = vadd.f32 1.0, %v7175_v0 }
 0x157   : > { %7176 = vrcp.f32 %v1016_v4  ;;  %v659_v4 = vmul.f32 %v7733_v36, %v7733_v36 }
 0x161   : > { %v7177_v7 = vpop.eup %7176 }
 0x162   : > { %v1019_v10 = vmul.f32 %v7177_v7, %v6526_v56  ;;  %v1101_v14 = vsub.f32 1.0, %v7177_v7 }
 0x164   : > { %v1102_v17 = vmul.f32 %v6526_v56, %v1101_v14 }
 0x166   : > { %v1103_v22 = vadd.f32 1.0, %v1102_v17 }
 0x1ab   : > { %v1022_v9 = vpop.permute.xlu1 %1021 }
 0x1ac   : > { %v887_v2 = vpop.permute.xlu0 %886  ;;  %v1024_v11 = vmul.f32 %v1022_v9, %v1019_v10 }
 0x1ad   : > { %v889_v3 = vmul.f32 %v887_v2, %v884_v1 }
 0x1af   : > { %6532 = vmatmul.mubr.msk.f32.vlgmr.msra.gmra.mrb[0].mxu1 %vm750_vm2, %v889_v3 }
 0x1b0   : > { %6902 = vmatpush3.bf16.msra.mxu1 %v7832_v54  ;;  %6538 = vmatprep.mubr.msk.f32.mxu1 %vm7563_vm4, %v7564_v55 }
 0x1b3   : > { %6539 = vmatmul.mubr.msk.f32.vlgmr.msra.gmra.mrb[2].mxu1 %vm667_vm0, %v1011_v5 }
 0x1bd   : > { %v1232_v8 = vpop.permute.xlu0 %1231 }
 0x1c2   : > { %v1108_v12 = vpop.permute.xlu0 %1107 }
 0x1c3   : > { %v1110_v13 = vmul.f32 %v1108_v12, %v1024_v11 }
 0x1c5   : > { %6541 = vmatprep.subr.mxu1 %v1110_v13 }
 0x1c6   : > { %6542 = vmatpush3.msra.mxu1 %v1110_v13 }
 0x1c7   : > { %6546 = vmatprep.subr.mxu1 %v7805_v48 }
 0x282   : > { %v7855_v15 = vpop.f32.mrb[0].mxu1 }
 0x283   : > { %v6533_v16 = vpop.f32.mrb[1].mxu1  ;;  %v974_v34 = vrot.slane %v7855_v15, 2  ;;  %v986_v53 = vrot.slane %v7855_v15, 5 }
 0x286   : > { %v1094_v18 = vpop.f32.mrb[2].mxu1 }
 0x287   : > { %v1098_v19 = vmul.f32 %v1094_v18, %v1019_v10  ;;  %v1099_v20 = vmul.f32 %v1094_v18, %v1022_v9  ;;  %v6540_v21 = vpop.f32.mrb[3].mxu1  ;;  %v668_v9 = vsel %vm667_vm0, %v659_v4, 0.0  ;;  %v660_v10 = vmul.f32 %v7736_v37, %v7736_v37 }
 0x288   : > { %v749_v4 = vmul.f32 %v7822_v52, %v7822_v52 }
 0x289   : > { %v1100_v23 = vmul.f32 %v7177_v7, %v1099_v20  ;;  %v1234_v24 = vmul.f32 %v1232_v8, %v1098_v19  ;;  %v671_v14 = vsel %vm667_vm0, %v660_v10, 0.0  ;;  %v7968_v10 = vld [vmem:[%s7729_s23 + $0x8] sm:$0xff] }
 0x28b   : > { %v1104_v25 = vmul.f32 %v1103_v22, %v1100_v23  ;;  %1236 = vrot.lane.b32.xlu1 %v1234_v24, %s7567_s16 }
 0x28d   : > { %v1229_v26 = vmul.f32 %v1227_v6, %v1104_v25  ;;  %v662_v6 = vmul.f32 %v7746_v40, %v7746_v40 }
 0x2b4   : > { %1111 = vxpose.xlu1.b32.start.end [1/1] (short) (narrow) %v1011_v5, 16 }
 0x2d2   : > { %7155 = vset.pattern.permute.xlu1 %v7561_v49 }
 0x2fd   : > { %v1237_v27 = vpop.permute.xlu1 %1236 }
 0x2fe   : > { %v1239_v28 = vsel %vm750_vm2, %v1229_v26, %v1237_v27 }
 0x2ff   : > { %1240 = vxpose.xlu0.b32.start.end [1/1] (short) (narrow) %v1239_v28, 64 }
 0x328   : > { %7156 = vset.pattern.permute.xlu0 %v7560_v32 }
 0x334   : > { %v1127_v29 = vpop.trf.xlu1 }
 0x335   : > { %6543 = vmatprep.mubr.msk.f32.mxu1 %vm1143_vm5, %v1127_v29 }
 0x338   : > { %v1128_v30 = vpop.trf.xlu1 }
 0x339   : > { %6544 = vmatmul.mubr.msk.f32.vlgmr.msra.gmra.mrb[4].mxu1 %vm1143_vm5, %v1128_v30 }
 0x33a   : > { %6547 = vmatpush3.msra.mxu1 %v7805_v48 }
 0x37f   : > { %v1256_v31 = vpop.trf.xlu0 }
 0x380   : > { %6548 = vmatprep.mubr.msk.f32.mxu1 %vm1143_vm5, %v1256_v31  ;;  %v661_v31 = vmul.f32 %v7739_v38, %v7739_v38 }
 0x383   : > { %v1257_v33 = vpop.trf.xlu0 }
 0x384   : > { %6549 = vmatmul.mubr.msk.f32.vlgmr.msra.gmra.mrb[6].mxu1 %vm1143_vm5, %v1257_v33  ;;  %v664_v33 = vmul.f32 %v7770_v43, %v7770_v43 }
 0x387   : > { %v1258_v35 = vpop.trf.xlu0 }
 0x388   : > { %6551 = vmatprep.mubr.msk.f32.mxu1 %vm1143_vm5, %v1258_v35 }
 0x38b   : > { %v1259_v56 = vpop.trf.xlu0 }
 0x38c   : > { %6552 = vmatmul.mubr.msk.f32.gmra.mrb[8].mxu1 %vm1143_vm5, %v1259_v56 }
 0x38f   : > { %v1260_v57 = vpop.trf.xlu0 }
 0x390   : > { %6554 = vmatprep.mubr.msk.f32.mxu1 %vm1143_vm5, %v1260_v57  ;;  %v674_v57 = vsel %vm667_vm0, %v661_v31, 0.0 }
 0x393   : > { %v1261_v59 = vpop.trf.xlu0 }
 0x394   : > { %6555 = vmatmul.mubr.msk.f32.gmra.mrb[10].mxu1 %vm1143_vm5, %v1261_v59  ;;  %v683_v59 = vsel %vm667_vm0, %v664_v33, 0.0 }
 0x397   : > { %v1262_v60 = vpop.trf.xlu0 }
 0x398   : > { %6557 = vmatprep.mubr.msk.f32.mxu1 %vm1143_vm5, %v1262_v60  ;;  %v666_v60 = vmul.f32 %v7786_v46, %v7786_v46 }
 0x39b   : > { %v1263_v48 = vpop.trf.xlu0 }
 0x39c   : > { %6558 = vmatmul.mubr.msk.f32.gmra.mrb[12].mxu1 %vm1143_vm5, %v1263_v48 }
 0x40c   : > { %v6545_v61 = vpop.f32.mrb[4].mxu1 }
 0x40d   : > { %v7872_v62 = vpop.f32.mrb[5].mxu1 }
 0x457   : > { %v6550_v63 = vpop.f32.mrb[6].mxu1 }
 0x458   : > { %v7875_v0 = vadd.f32 %v6550_v63, %v7736_v37  ;;  %v1362_v1 = vpop.f32.mrb[7].mxu1 }
 0x459   : > { %v7878_v2 = vadd.f32 %v1362_v1, %v7733_v36  ;;  %v677_v36 = vsel %vm667_vm0, %v662_v6, 0.0  ;;  %v663_v1 = vmul.f32 %v7767_v42, %v7767_v42 }
 0x45a   : > { %v1412_v3 = vmul.f32 %v7875_v0, %v7875_v0 }
 0x45b   : > { %v1411_v5 = vmul.f32 %v7878_v2, %v7878_v2 }
 0x45c   : > { %v1422_v7 = vsel %vm667_vm0, %v1412_v3, 0.0 }
 0x45d   : > { %1423 = vadd.xlane.f32.xlu1 %v1422_v7  ;;  %v1419_v8 = vsel %vm667_vm0, %v1411_v5, 0.0  ;;  %v7954_v5 = vadd.f32 %v7872_v62, %v7819_v51  ;;  %v754_v7 = vsel %vm750_vm2, %v749_v4, 0.0 }
 0x45e   : > { %1420 = vadd.xlane.f32.xlu0 %v1419_v8 }
 0x45f   : > { %v6553_v11 = vpop.f32.mrb[8].mxu1 }
 0x460   : > { %v7895_v12 = vadd.f32 %v6553_v11, %v7746_v40  ;;  %v1372_v13 = vpop.f32.mrb[9].mxu1 }
 0x461   : > { %669 = vadd.xlane.f32.xlu1 %v668_v9  ;;  %v7901_v17 = vadd.f32 %v1372_v13, %v7739_v38  ;;  %v7939_v38 = vadd.f32 %v6545_v61, %v7822_v52  ;;  %v665_v61 = vmul.f32 %v7783_v45, %v7783_v45  ;;  %v748_v52 = vmul.f32 %v7819_v51, %v7819_v51  ;;  %v1561_v9 = vld [vmem:[%s7713_s19 + $0x8] sm:$0xff] }
 0x462   : > { %v1414_v16 = vmul.f32 %v7895_v12, %v7895_v12  ;;  %678 = vadd.xlane.f32.xlu0 %v677_v36  ;;  %6576 = vmatprep.mubr.msk.f32.mxu1 %vm667_vm0, %v1561_v9 }
 0x463   : > { %v1413_v20 = vmul.f32 %v7901_v17, %v7901_v17  ;;  %v1532_v3 = vmul.f32 %v7939_v38, %v7939_v38  ;;  %v686_v6 = vsel %vm667_vm0, %v665_v61, 0.0  ;;  %v751_v8 = vsel %vm750_vm2, %v748_v52, 0.0 }
 0x464   : > { %v1428_v37 = vsel %vm667_vm0, %v1414_v16, 0.0 }
 0x465   : > { %672 = vadd.xlane.f32.xlu1 %v671_v14  ;;  %v1425_v23 = vsel %vm667_vm0, %v1413_v20, 0.0 }
 0x467   : > { %v6556_v18 = vpop.f32.mrb[10].mxu1 }
 0x468   : > { %v7905_v19 = vadd.f32 %v6556_v18, %v7770_v43  ;;  %v1382_v40 = vpop.f32.mrb[11].mxu1  ;;  %v689_v43 = vsel %vm667_vm0, %v666_v60, 0.0 }
 0x469   : > { %1429 = vadd.xlane.f32.xlu1 %v1428_v37  ;;  %v7912_v22 = vadd.f32 %v1382_v40, %v7767_v42  ;;  %v1536_v42 = vsel %vm750_vm2, %v1532_v3, 0.0 }
 0x46a   : > { %v1416_v21 = vmul.f32 %v7905_v19, %v7905_v19 }
 0x46b   : > { %v1415_v27 = vmul.f32 %v7912_v22, %v7912_v22 }
 0x46c   : > { %v1434_v24 = vsel %vm667_vm0, %v1416_v21, 0.0 }
 0x46d   : > { %1426 = vadd.xlane.f32.xlu1 %v1425_v23  ;;  %v1431_v35 = vsel %vm667_vm0, %v1415_v27, 0.0 }
 0x46f   : > { %v6559_v25 = vpop.f32.mrb[12].mxu1 }
 0x470   : > { %v7917_v26 = vadd.f32 %v6559_v25, %v7786_v46  ;;  %v1392_v28 = vpop.f32.mrb[13].mxu1  ;;  %v680_v46 = vsel %vm667_vm0, %v663_v1, 0.0 }
 0x471   : > { %1435 = vadd.xlane.f32.xlu1 %v1434_v24  ;;  %v7924_v30 = vadd.f32 %v1392_v28, %v7783_v45  ;;  %v1531_v45 = vmul.f32 %v7954_v5, %v7954_v5 }
 0x472   : > { %v1418_v29 = vmul.f32 %v7917_v26, %v7917_v26 }
 0x473   : > { %v1417_v48 = vmul.f32 %v7924_v30, %v7924_v30  ;;  %v1533_v62 = vsel %vm750_vm2, %v1531_v45, 0.0 }
 0x474   : > { %v1440_v56 = vsel %vm667_vm0, %v1418_v29, 0.0 }
 0x475   : > { %1432 = vadd.xlane.f32.xlu1 %v1431_v35  ;;  %1441 = vadd.xlane.f32.xlu0 %v1440_v56  ;;  %v1437_v63 = vsel %vm667_vm0, %v1417_v48, 0.0 }
 0x479   : > { %675 = vadd.xlane.f32.xlu1 %v674_v57  ;;  %684 = vadd.xlane.f32.xlu0 %v683_v59 }
 0x47d   : > { %690 = vadd.xlane.f32.xlu0 %v689_v43  ;;  %1438 = vadd.xlane.f32.xlu1 %v1437_v63 }
 0x481   : > { %1537 = vadd.xlane.f32.xlu0 %v1536_v42  ;;  %681 = vadd.xlane.f32.xlu1 %v680_v46 }
 0x485   : > { %687 = vadd.xlane.f32.xlu1 %v686_v6  ;;  %755 = vadd.xlane.f32.xlu0 %v754_v7 }
 0x489   : > { %1534 = vadd.xlane.f32.xlu1 %v1533_v62 }
 0x48d   : > { %752 = vadd.xlane.f32.xlu1 %v751_v8 }
 0x49b   : > { %2010 = vperm.xlu0 %7156, %v7968_v10  }
 0x49e   : > { %2015 = vperm.xlu1 %7155, %v7968_v10  }
 0x4a2   : > { %7157 = vset.pattern.permute.xlu1 %v7566_v58 }
 0x4ea   : > { %v1424_v11 = vpop.xlane.xlu1 %1423 }
 0x4eb   : > { %7178 = vrsqrt.f32 %v1424_v11  ;;  %v1421_v51 = vpop.xlane.xlu0 %1420  ;;  %vm1452_vm6 = vcmp.eq.f32.partialorder %v1424_v11, inf  ;;  %vm1454_vm7 = vcmp.eq.f32.partialorder %v1424_v11, 0.0  ;;  %v1455_v20 = vand.u32 2147483648, %v1424_v11 }
 0x4ec   : > { %7180 = vrsqrt.f32 %v1421_v51  ;;  %vm1445_vm8 = vcmp.eq.f32.partialorder %v1421_v51, inf  ;;  %v1448_v24 = vand.u32 2147483648, %v1421_v51  ;;  %vm1447_vm9 = vcmp.eq.f32.partialorder %v1421_v51, 0.0 }
 0x4ee   : > { %v7973_v36 = vpop.xlane.xlu1 %669 }
 0x4ef   : > { %7182 = vrsqrt.f32 %v7973_v36  ;;  %v7978_v40 = vpop.xlane.xlu0 %678  ;;  %vm694_vm10 = vcmp.eq.f32.partialorder %v7973_v36, inf  ;;  %vm696_vm11 = vcmp.eq.f32.partialorder %v7973_v36, 0.0  ;;  %v697_v46 = vand.u32 2147483648, %v7973_v36 }
 0x4f0   : > { %vm715_vm14 = vcmp.eq.f32.partialorder %v7978_v40, inf  ;;  %v718_v7 = vand.u32 2147483648, %v7978_v40 }
 0x4f2   : > { %v7975_v13 = vpop.xlane.xlu1 %672 }
 0x4f3   : > { %vm701_vm15 = vcmp.eq.f32.partialorder %v7975_v13, inf }
 0x4f5   : > { %v7179_v14 = vpop.eup %7178 }
 0x4f6   : > { %v7181_v16 = vpop.eup %7180  ;;  %v1451_v37 = vmul.f32 %v7179_v14, %v1424_v11  ;;  %v1430_v18 = vpop.xlane.xlu1 %1429 }
 0x4f7   : > { %v1444_v21 = vmul.f32 %v7181_v16, %v1421_v51  ;;  %7184 = vrsqrt.f32 %v1430_v18  ;;  %vm1466_vm12 = vcmp.eq.f32.partialorder %v1430_v18, inf  ;;  %v1469_v3 = vand.u32 2147483648, %v1430_v18 }
 0x4f8   : > { %v1453_v23 = vsel %vm1452_vm6, %v1424_v11, %v1451_v37  ;;  %7186 = vrsqrt.f32 %v7975_v13  ;;  %vm1468_vm13 = vcmp.eq.f32.partialorder %v1430_v18, 0.0  ;;  %v704_v37 = vand.u32 2147483648, %v7975_v13 }
 0x4f9   : > { %v1456_v25 = vsel %vm1454_vm7, %v1455_v20, %v1453_v23  ;;  %v1446_v27 = vsel %vm1445_vm8, %v1421_v51, %v1444_v21  ;;  %7188 = vrsqrt.f32 %v7978_v40  ;;  %v7183_v56 = vpop.eup %7182  ;;  %vm703_vm7 = vcmp.eq.f32.partialorder %v7975_v13, 0.0 }
 0x4fa   : > { %v1500_v28 = vadd.f32 1e-05, %v1456_v25  ;;  %v1449_v29 = vsel %vm1447_vm9, %v1448_v24, %v1446_v27  ;;  %v1427_v31 = vpop.xlane.xlu1 %1426  ;;  %v693_v1 = vmul.f32 %v7183_v56, %v7973_v36  ;;  %vm717_vm9 = vcmp.eq.f32.partialorder %v7978_v40, 0.0 }
 0x4fb   : > { %v1499_v33 = vadd.f32 1e-05, %v1449_v29  ;;  %7190 = vrsqrt.f32 %v1427_v31  ;;  %vm1459_vm6 = vcmp.eq.f32.partialorder %v1427_v31, inf  ;;  %v1462_v16 = vand.u32 2147483648, %v1427_v31 }
 0x4fc   : > { %7192 = vrcp.f32 %v1500_v28  ;;  %v695_v14 = vsel %vm694_vm10, %v7973_v36, %v693_v1  ;;  %vm1461_vm8 = vcmp.eq.f32.partialorder %v1427_v31, 0.0 }
 0x4fd   : > { %7194 = vrcp.f32 %v1499_v33  ;;  %v8017_v25 = vsel %vm696_vm11, %v697_v46, %v695_v14 }
 0x4fe   : > { %v7982_v35 = vpop.xlane.xlu1 %1435 }
 0x4ff   : > { %7196 = vrsqrt.f32 %v7982_v35  ;;  %vm1480_vm10 = vcmp.eq.f32.partialorder %v7982_v35, inf  ;;  %vm1482_vm11 = vcmp.eq.f32.partialorder %v7982_v35, 0.0 }
 0x501   : > { %v7185_v57 = vpop.eup %7184 }
 0x502   : > { %v7187_v59 = vpop.eup %7186  ;;  %v1465_v60 = vmul.f32 %v7185_v57, %v1430_v18  ;;  %v7987_v48 = vpop.xlane.xlu1 %1432 }
 0x503   : > { %v7989_v43 = vpop.xlane.xlu0 %1441  ;;  %v7189_v63 = vpop.eup %7188  ;;  %7198 = vrsqrt.f32 %v7987_v48  ;;  %v700_v42 = vmul.f32 %v7187_v59, %v7975_v13 }
 0x504   : > { %v1467_v61 = vsel %vm1466_vm12, %v1430_v18, %v1465_v60  ;;  %7200 = vrsqrt.f32 %v7989_v43  ;;  %v714_v62 = vmul.f32 %v7189_v63, %v7978_v40  ;;  %vm1473_vm12 = vcmp.eq.f32.partialorder %v7987_v48, inf }
 0x505   : > { %v7191_v4 = vpop.eup %7190  ;;  %v1470_v6 = vsel %vm1468_vm13, %v1469_v3, %v1467_v61  ;;  %v702_v21 = vsel %vm701_vm15, %v7975_v13, %v700_v42  ;;  %vm1475_vm13 = vcmp.eq.f32.partialorder %v7987_v48, 0.0  ;;  %v1476_v61 = vand.u32 2147483648, %v7987_v48 }
 0x506   : > { %v7193_v45 = vpop.eup %7192  ;;  %v1502_v52 = vadd.f32 1e-05, %v1470_v6  ;;  %v1458_v8 = vmul.f32 %v7191_v4, %v1427_v31  ;;  %v8000_v9 = vpop.xlane.xlu1 %675  ;;  %v716_v56 = vsel %vm715_vm14, %v7978_v40, %v714_v62  ;;  %v8033_v36 = vsel %vm703_vm7, %v704_v37, %v702_v21 }
 0x507   : > { %v8002_v11 = vpop.xlane.xlu0 %684  ;;  %v7195_v51 = vpop.eup %7194  ;;  %7202 = vrsqrt.f32 %v8000_v9  ;;  %v1516_v33 = vmul.f32 %v7193_v45, %v7875_v0  ;;  %vm1494_vm14 = vcmp.eq.f32.partialorder %v7989_v43, inf  ;;  %v1497_v6 = vand.u32 2147483648, %v7989_v43 }
 0x508   : > { %v1460_v18 = vsel %vm1459_vm6, %v1427_v31, %v1458_v8  ;;  %7204 = vrcp.f32 %v1502_v52  ;;  %v1515_v24 = vmul.f32 %v7195_v51, %v7878_v2  ;;  %v1483_v2 = vand.u32 2147483648, %v7982_v35 }
 0x509   : > { %v7197_v20 = vpop.eup %7196  ;;  %v1463_v23 = vsel %vm1461_vm8, %v1462_v16, %v1460_v18  ;;  %7206 = vrsqrt.f32 %v8002_v11  ;;  %v8045_v3 = vmul.f32 %v1516_v33, %v8033_v36  ;;  %vm1496_vm15 = vcmp.eq.f32.partialorder %v7989_v43, 0.0 }
 0x50a   : > { %v1501_v27 = vadd.f32 1e-05, %v1463_v23  ;;  %v1479_v28 = vmul.f32 %v7197_v20, %v7982_v35  ;;  %v8022_v31 = vpop.xlane.xlu1 %1438  ;;  %v8040_v60 = vmul.f32 %v1515_v24, %v8017_v25  ;;  %vm708_vm6 = vcmp.eq.f32.partialorder %v8000_v9, inf }
 0x50b   : > { %v8020_v29 = vpop.xlane.xlu0 %690  ;;  %vm710_vm7 = vcmp.eq.f32.partialorder %v8000_v9, 0.0  ;;  %v711_v21 = vand.u32 2147483648, %v8000_v9  ;;  %vm729_vm8 = vcmp.eq.f32.partialorder %v8002_v11, inf }
 0x50c   : > { %7208 = vrcp.f32 %v1501_v27  ;;  %v1481_v57 = vsel %vm1480_vm10, %v7982_v35, %v1479_v28  ;;  %v6903_v45 = vpack.c.bf16 %v8045_v3, %v8040_v60  ;;  %v732_v28 = vand.u32 2147483648, %v8002_v11 }
 0x50d   : > { %v7199_v0 = vpop.eup %7198  ;;  %v1484_v59 = vsel %vm1482_vm11, %v1483_v2, %v1481_v57  ;;  %7210 = vrsqrt.f32 %v8022_v31  ;;  %vm1489_vm10 = vcmp.eq.f32.partialorder %v8022_v31, 0.0 }
 0x50e   : > { %v7201_v63 = vpop.eup %7200  ;;  %v1504_v1 = vadd.f32 1e-05, %v1484_v59  ;;  %v1472_v13 = vmul.f32 %v7199_v0, %v7987_v48  ;;  %v8049_v35 = vpop.xlane.xlu1 %681  ;;  %6905 = vmatprep.subr.msk.bf16.mxu1 %vm7723_vm1, %v6903_v45 }
 0x50f   : > { %v8047_v46 = vpop.xlane.xlu0 %1537  ;;  %v1493_v4 = vmul.f32 %v7201_v63, %v7989_v43  ;;  %6908 = vmatpush3.bf16.xpose.msk.msra.mxu1 %vm7723_vm1, %v6903_v45 }
 0x510   : > { %7212 = vrsqrt.f32 %v8047_v46  ;;  %v1474_v42 = vsel %vm1473_vm12, %v7987_v48, %v1472_v13  ;;  %vm1548_vm11 = vcmp.eq.f32.partialorder %v8047_v46, inf  ;;  %vm1550_vm12 = vcmp.eq.f32.partialorder %v8047_v46, 0.0 }
 0x511   : > { %7214 = vrcp.f32 %v1504_v1  ;;  %v7203_v52 = vpop.eup %7202  ;;  %v1477_v62 = vsel %vm1475_vm13, %v1476_v61, %v1474_v42  ;;  %v1495_v8 = vsel %vm1494_vm14, %v7989_v43, %v1493_v4  ;;  %v8073_v43 = vsel %vm717_vm9, %v718_v7, %v716_v56 }
 0x512   : > { %7216 = vrsqrt.f32 %v8049_v35  ;;  %v1503_v51 = vadd.f32 1e-05, %v1477_v62  ;;  %v1498_v14 = vsel %vm1496_vm15, %v1497_v6, %v1495_v8  ;;  %v707_v16 = vmul.f32 %v7203_v52, %v8000_v9  ;;  %v8065_v48 = vpop.xlane.xlu1 %687  ;;  %v7205_v37 = vpop.eup %7204 }
 0x513   : > { %v7207_v18 = vpop.eup %7206  ;;  %v1506_v20 = vadd.f32 1e-05, %v1498_v14  ;;  %v1518_v7 = vmul.f32 %v7205_v37, %v7895_v12  ;;  %vm1487_vm9 = vcmp.eq.f32.partialorder %v8022_v31, inf  ;;  %v1490_v56 = vand.u32 2147483648, %v8022_v31  ;;  %v8093_v57 = vpop.xlane.xlu0 %755 }
 0x514   : > { %7218 = vrcp.f32 %v1503_v51  ;;  %v709_v24 = vsel %vm708_vm6, %v8000_v9, %v707_v16  ;;  %v728_v59 = vmul.f32 %v7207_v18, %v8002_v11  ;;  %v1551_v6 = vand.u32 2147483648, %v8047_v46 }
 0x515   : > { %7220 = vrsqrt.f32 %v8020_v29  ;;  %v8097_v0 = vsel %vm710_vm7, %v711_v21, %v709_v24  ;;  %vm722_vm13 = vcmp.eq.f32.partialorder %v8049_v35, inf  ;;  %v725_v18 = vand.u32 2147483648, %v8049_v35 }
 0x516   : > { %v7209_v23 = vpop.eup %7208  ;;  %7222 = vrsqrt.f32 %v8065_v48  ;;  %v8082_v40 = vpop.xlane.xlu1 %1534  ;;  %vm731_vm14 = vcmp.eq.f32.partialorder %v8002_v11, 0.0  ;;  %vm724_vm15 = vcmp.eq.f32.partialorder %v8049_v35, 0.0  ;;  %vm743_vm7 = vcmp.eq.f32.partialorder %v8020_v29, inf }
 0x517   : > { %v7211_v27 = vpop.eup %7210  ;;  %7224 = vrsqrt.f32 %v8082_v40  ;;  %v1517_v2 = vmul.f32 %v7209_v23, %v7901_v17  ;;  %v8107_v17 = vmul.f32 %v1518_v7, %v8073_v43  ;;  %vm1541_vm6 = vcmp.eq.f32.partialorder %v8082_v40, inf }
 0x518   : > { %v1486_v33 = vmul.f32 %v7211_v27, %v8022_v31  ;;  %7226 = vrcp.f32 %v1506_v20 }
 0x519   : > { %v8104_v61 = vmul.f32 %v1517_v2, %v8097_v0  ;;  %7228 = vrsqrt.f32 %v8093_v57 }
 0x51a   : > { %v7213_v12 = vpop.eup %7212  ;;  %v1488_v1 = vsel %vm1487_vm9, %v8022_v31, %v1486_v33  ;;  %v8109_v4 = vpop.xlane.xlu1 %752  ;;  %v730_v31 = vsel %vm729_vm8, %v8002_v11, %v728_v59  ;;  %vm1543_vm8 = vcmp.eq.f32.partialorder %v8082_v40, 0.0  ;;  %vm736_vm9 = vcmp.eq.f32.partialorder %v8065_v48, inf }
 0x51b   : > { %v7215_v63 = vpop.eup %7214  ;;  %v1547_v13 = vmul.f32 %v7213_v12, %v8047_v46  ;;  %v1491_v42 = vsel %vm1489_vm10, %v1490_v56, %v1488_v1  ;;  %v6909_v8 = vpack.c.bf16 %v8107_v17, %v8104_v61  ;;  %7230 = vrsqrt.f32 %v8109_v4 }
 0x51c   : > { %v7217_v9 = vpop.eup %7216  ;;  %v1505_v45 = vadd.f32 1e-05, %v1491_v42  ;;  %v1520_v14 = vmul.f32 %v7215_v63, %v7905_v19  ;;  %v8138_v21 = vsel %vm731_vm14, %v732_v28, %v730_v31  ;;  %v1544_v28 = vand.u32 2147483648, %v8082_v40 }
 0x51d   : > { %v1549_v52 = vsel %vm1548_vm11, %v8047_v46, %v1547_v13  ;;  %v721_v62 = vmul.f32 %v7217_v9, %v8049_v35  ;;  %6911 = vmatprep.subr.msk.bf16.mxu1 %vm7723_vm1, %v6909_v8  ;;  %v746_v1 = vand.u32 2147483648, %v8020_v29  ;;  %vm745_vm10 = vcmp.eq.f32.partialorder %v8020_v29, 0.0 }
 0x51e   : > { %v1552_v51 = vsel %vm1550_vm12, %v1551_v6, %v1549_v52  ;;  %v7219_v16 = vpop.eup %7218  ;;  %7232 = vrcp.f32 %v1505_v45  ;;  %6914 = vmatpush3.bf16.xpose.msk.msra.mxu1 %vm7723_vm1, %v6909_v8  ;;  %v8146_v33 = vmul.f32 %v1520_v14, %v8138_v21  ;;  %v739_v52 = vand.u32 2147483648, %v8065_v48 }
 0x51f   : > { %v723_v37 = vsel %vm722_vm13, %v8049_v35, %v721_v62  ;;  %v7221_v20 = vpop.eup %7220  ;;  %v1519_v19 = vmul.f32 %v7219_v16, %v7912_v22  ;;  %v1554_v23 = vadd.f32 1e-05, %v1552_v51  ;;  %vm738_vm11 = vcmp.eq.f32.partialorder %v8065_v48, 0.0 }
 0x520   : > { %v7223_v46 = vpop.eup %7222  ;;  %v8140_v24 = vsel %vm724_vm15, %v725_v18, %v723_v37  ;;  %v742_v11 = vmul.f32 %v7221_v20, %v8020_v29  ;;  %vm766_vm12 = vcmp.eq.f32.partialorder %v8093_v57, inf  ;;  %vm759_vm13 = vcmp.eq.f32.partialorder %v8109_v4, inf }
 0x521   : > { %v7225_v7 = vpop.eup %7224  ;;  %v8143_v27 = vmul.f32 %v1519_v19, %v8140_v24  ;;  %v735_v22 = vmul.f32 %v7223_v46, %v8065_v48  ;;  %7234 = vrcp.f32 %v1554_v23  ;;  %v769_v16 = vand.u32 2147483648, %v8093_v57 }
 0x522   : > { %v1540_v35 = vmul.f32 %v7225_v7, %v8082_v40  ;;  %v7227_v56 = vpop.eup %7226  ;;  %v744_v42 = vsel %vm743_vm7, %v8020_v29, %v742_v11  ;;  %v762_v37 = vand.u32 2147483648, %v8109_v4  ;;  %vm768_vm14 = vcmp.eq.f32.partialorder %v8093_v57, 0.0  ;;  %v1562_v11 = vld [vmem:[%s7802_s14 + $0x8] sm:$0xff] }
 0x523   : > { %v6915_v2 = vpack.c.bf16 %v8146_v33, %v8143_v27  ;;  %v7229_v59 = vpop.eup %7228  ;;  %v737_v6 = vsel %vm736_vm9, %v8065_v48, %v735_v22  ;;  %v8171_v8 = vsel %vm745_vm10, %v746_v1, %v744_v42  ;;  %vm761_vm15 = vcmp.eq.f32.partialorder %v8109_v4, 0.0 }
 0x524   : > { %v1542_v12 = vsel %vm1541_vm6, %v8082_v40, %v1540_v35  ;;  %v1522_v40 = vmul.f32 %v7227_v56, %v7917_v26  ;;  %v8173_v31 = vsel %vm738_vm11, %v739_v52, %v737_v6  ;;  %v765_v29 = vmul.f32 %v7229_v59, %v8093_v57 }
 0x525   : > { %v1545_v63 = vsel %vm1543_vm8, %v1544_v28, %v1542_v12  ;;  %6917 = vmatprep.subr.msk.bf16.mxu1 %vm7723_vm1, %v6915_v2  ;;  %v7231_v9 = vpop.eup %7230 }
 0x526   : > { %v1553_v13 = vadd.f32 1e-05, %v1545_v63  ;;  %6920 = vmatpush3.bf16.xpose.msk.msra.mxu1 %vm7723_vm1, %v6915_v2  ;;  %v758_v51 = vmul.f32 %v7231_v9, %v8109_v4  ;;  %v8181_v26 = vmul.f32 %v1522_v40, %v8171_v8  ;;  %v767_v18 = vsel %vm766_vm12, %v8093_v57, %v765_v29  ;;  %v2016_v9 = vpop.permute.xlu1 %2015 }
 0x527   : > { %v8199_v23 = vsel %vm768_vm14, %v769_v16, %v767_v18 }
 0x528   : > { %v7233_v45 = vpop.eup %7232  ;;  %7236 = vrcp.f32 %v1553_v13  ;;  %v760_v20 = vsel %vm759_vm13, %v8109_v4, %v758_v51 }
 0x529   : > { %v1521_v62 = vmul.f32 %v7233_v45, %v7924_v30  ;;  %v8201_v7 = vsel %vm761_vm15, %v762_v37, %v760_v20 }
 0x52b   : > { %v8178_v14 = vmul.f32 %v1521_v62, %v8173_v31  ;;  %v7235_v48 = vpop.eup %7234 }
 0x52c   : > { %v1558_v19 = vmul.f32 %v7235_v48, %v7939_v38  ;;  %v1796_v38 = vld [vmem:[%s7850_s29 + $0x8] sm:$0xff]  ;;  %v2011_v48 = vpop.permute.xlu0 %2010 }
 0x52d   : > { %v6921_v30 = vpack.c.bf16 %v8181_v26, %v8178_v14 }
 0x52e   : > { %v8209_v35 = vmul.f32 %v1558_v19, %v8199_v23 }
 0x52f   : > { %6923 = vmatprep.subr.msk.bf16.mxu1 %vm7723_vm1, %v6921_v30 }
 0x530   : > { %6926 = vmatpush3.bf16.xpose.msk.msra.mxu1 %vm7723_vm1, %v6921_v30 }
 0x531   : > { %6927 = vmatprep.subr.bf16.mxu1 %v7562_v50 }
 0x532   : > { %v7237_v46 = vpop.eup %7236 }
 0x533   : > { %v1557_v57 = vmul.f32 %v7237_v46, %v7954_v5 }
 0x535   : > { %v8206_v4 = vmul.f32 %v1557_v57, %v8201_v7 }
 0x537   : > { %6577 = vmatmul.mubr.msk.f32.vlgmr.msra.gmra.mrb[14].mxu1 %vm667_vm0, %v1562_v11  ;;  %v6928_v56 = vpack.c.bf16 %v8209_v35, %v8206_v4 }
 0x538   : > { %6583 = vmatprep.mubr.msk.f32.mxu1 %vm7563_vm4, %v7564_v55 }
 0x539   : > { %6930 = vmatpush3.bf16.xpose.msk.msra.mxu1 %vm7826_vm3, %v6928_v56  ;;  %6933 = vmatpush3.bf16.msra.mxu0 %v6928_v56 }
 0x53a   : > { %6958 = vmatprep.subr.bf16.mxu1 %v7562_v50 }
 0x53c   : > { %6591 = vmatmul.mubr.msk.f32.vlgmr.msra.gmra.mrb[2].mxu0 %vm667_vm0, %v1796_v38 }
 0x60a   : > { %v6578_v5 = vpop.f32.mrb[14].mxu1 }
 0x60b   : > { %v6146_v22 = vmul.f32 -1.442695, %v6578_v5  ;;  %1806 = vrot.lane.b32.xlu1 %v6578_v5, %s7565_s17  ;;  %v8222_v28 = vpop.f32.mrb[15].mxu1 }
 0x60d   : > { %7238 = vpow2.f32 %v6146_v22 }
 0x60f   : > { %v1879_v2 = vpop.f32.mrb[2].mxu0 }
 0x610   : > { %v6592_v12 = vpop.f32.mrb[3].mxu0 }
 0x617   : > { %v7239_v59 = vpop.eup %7238 }
 0x618   : > { %v1801_v63 = vadd.f32 1.0, %v7239_v59 }
 0x61a   : > { %7240 = vrcp.f32 %v1801_v63 }
 0x624   : > { %v7241_v1 = vpop.eup %7240 }
 0x625   : > { %v1804_v13 = vmul.f32 %v7241_v1, %v6578_v5  ;;  %v1886_v40 = vsub.f32 1.0, %v7241_v1 }
 0x627   : > { %v1883_v42 = vmul.f32 %v1879_v2, %v1804_v13  ;;  %v1887_v45 = vmul.f32 %v6578_v5, %v1886_v40 }
 0x629   : > { %v2018_v6 = vmul.f32 %v2016_v9, %v1883_v42  ;;  %v1888_v51 = vadd.f32 1.0, %v1887_v45 }
 0x62b   : > { %2020 = vrot.lane.b32.xlu1 %v2018_v6, %s7567_s16 }
 0x62f   : > { %1892 = vperm.xlu1 %7157, %v7968_v10  }
 0x658   : > { %1896 = vxpose.xlu1.b32.start.end [1/1] (short) (narrow) %v1796_v38, 16 }
 0x676   : > { %7158 = vset.pattern.permute.xlu1 %v7561_v49 }
 0x67d   : > { %v1807_v52 = vpop.permute.xlu1 %1806 }
 0x67e   : > { %v1884_v62 = vmul.f32 %v1879_v2, %v1807_v52  ;;  %v1809_v20 = vmul.f32 %v1807_v52, %v1804_v13 }
 0x680   : > { %v1885_v29 = vmul.f32 %v7241_v1, %v1884_v62 }
 0x682   : > { %v1889_v30 = vmul.f32 %v1888_v51, %v1885_v29 }
 0x684   : > { %v2013_v16 = vmul.f32 %v2011_v48, %v1889_v30 }
 0x69d   : > { %v2021_v37 = vpop.permute.xlu1 %2020 }
 0x69e   : > { %v2023_v18 = vsel %vm750_vm2, %v2013_v16, %v2021_v37 }
 0x69f   : > { %2024 = vxpose.xlu0.b32.start.end [1/1] (short) (narrow) %v2023_v18, 64 }
 0x6ae   : > { %v1893_v19 = vpop.permute.xlu1 %1892 }
 0x6af   : > { %v1895_v46 = vmul.f32 %v1893_v19, %v1809_v20 }
 0x6b1   : > { %6593 = vmatprep.subr.mxu0 %v1895_v46 }
 0x6b2   : > { %6594 = vmatpush3.msra.mxu0 %v1895_v46 }
 0x6b3   : > { %6598 = vmatprep.subr.mxu0 %v1562_v11 }
 0x6d8   : > { %v1912_v10 = vpop.trf.xlu1 }
 0x6d9   : > { %6595 = vmatprep.mubr.msk.f32.mxu0 %vm1143_vm5, %v1912_v10 }
 0x6dc   : > { %v1913_v57 = vpop.trf.xlu1 }
 0x6dd   : > { %6596 = vmatmul.mubr.msk.f32.vlgmr.msra.gmra.mrb[4].mxu0 %vm1143_vm5, %v1913_v57 }
 0x6de   : > { %6599 = vmatpush3.msra.mxu0 %v1562_v11 }
 0x71f   : > { %v2040_v56 = vpop.trf.xlu0 }
 0x720   : > { %6600 = vmatprep.mubr.msk.f32.mxu0 %vm1143_vm5, %v2040_v56 }
 0x723   : > { %v2041_v38 = vpop.trf.xlu0 }
 0x724   : > { %6601 = vmatmul.mubr.msk.f32.vlgmr.msra.gmra.mrb[6].mxu0 %vm1143_vm5, %v2041_v38 }
 0x727   : > { %v2042_v5 = vpop.trf.xlu0 }
 0x728   : > { %6603 = vmatprep.mubr.msk.f32.mxu0 %vm1143_vm5, %v2042_v5 }
 0x72b   : > { %v2043_v22 = vpop.trf.xlu0 }
 0x72c   : > { %6604 = vmatmul.mubr.msk.f32.gmra.mrb[8].mxu0 %vm1143_vm5, %v2043_v22 }
 0x72f   : > { %v2044_v2 = vpop.trf.xlu0 }
 0x730   : > { %6606 = vmatprep.mubr.msk.f32.mxu0 %vm1143_vm5, %v2044_v2 }
 0x733   : > { %v2045_v12 = vpop.trf.xlu0 }
 0x734   : > { %6607 = vmatmul.mubr.msk.f32.gmra.mrb[10].mxu0 %vm1143_vm5, %v2045_v12 }
 0x737   : > { %v2046_v59 = vpop.trf.xlu0 }
 0x738   : > { %6609 = vmatprep.mubr.msk.f32.mxu0 %vm1143_vm5, %v2046_v59 }
 0x73b   : > { %v2047_v11 = vpop.trf.xlu0 }
 0x73c   : > { %6610 = vmatmul.mubr.msk.f32.gmra.mrb[12].mxu0 %vm1143_vm5, %v2047_v11 }
 0x7b0   : > { %v6597_v63 = vpop.f32.mrb[4].mxu0 }
 0x7b1   : > { %v2000_v1 = vpop.f32.mrb[5].mxu0 }
 0x7b2   : > { %v8283_v22 = vadd.f32 %v2000_v1, %v8206_v4 }
 0x7b4   : > { %v2315_v59 = vmul.f32 %v8283_v22, %v8283_v22 }
 0x7b6   : > { %v2317_v11 = vsel %vm750_vm2, %v2315_v59, 0.0 }
 0x7f7   : > { %v6602_v13 = vpop.f32.mrb[6].mxu0 }
 0x7f8   : > { %v8239_v9 = vadd.f32 %v6602_v13, %v8045_v3  ;;  %v2146_v42 = vpop.f32.mrb[7].mxu0 }
 0x7f9   : > { %v8242_v6 = vadd.f32 %v2146_v42, %v8040_v60  ;;  %v6142_v42 = vmul.f32 -1.442695, %v8222_v28 }
 0x7fa   : > { %v2196_v40 = vmul.f32 %v8239_v9, %v8239_v9 }
 0x7fb   : > { %v2195_v45 = vmul.f32 %v8242_v6, %v8242_v6 }
 0x7fc   : > { %v2206_v52 = vsel %vm667_vm0, %v2196_v40, 0.0 }
 0x7fd   : > { %2207 = vadd.xlane.f32.xlu0 %v2206_v52  ;;  %v2203_v62 = vsel %vm667_vm0, %v2195_v45, 0.0 }
 0x7fe   : > { %2204 = vadd.xlane.f32.xlu1 %v2203_v62 }
 0x7ff   : > { %v6605_v29 = vpop.f32.mrb[8].mxu0 }
 0x800   : > { %v8251_v3 = vadd.f32 %v6605_v29, %v8107_v17  ;;  %v2156_v51 = vpop.f32.mrb[9].mxu0 }
 0x801   : > { %v8254_v60 = vadd.f32 %v2156_v51, %v8104_v61 }
 0x802   : > { %v2198_v30 = vmul.f32 %v8251_v3, %v8251_v3 }
 0x803   : > { %v2197_v16 = vmul.f32 %v8254_v60, %v8254_v60 }
 0x804   : > { %v2212_v48 = vsel %vm667_vm0, %v2198_v30, 0.0 }
 0x805   : > { %2213 = vadd.xlane.f32.xlu1 %v2212_v48  ;;  %v2209_v17 = vsel %vm667_vm0, %v2197_v16, 0.0 }
 0x807   : > { %v6608_v37 = vpop.f32.mrb[10].mxu0 }
 0x808   : > { %v8262_v18 = vadd.f32 %v6608_v37, %v8146_v33  ;;  %v2166_v20 = vpop.f32.mrb[11].mxu0 }
 0x809   : > { %v8266_v19 = vadd.f32 %v2166_v20, %v8143_v27  ;;  %2210 = vadd.xlane.f32.xlu1 %v2209_v17 }
 0x80a   : > { %v2200_v61 = vmul.f32 %v8262_v18, %v8262_v18 }
 0x80b   : > { %v2199_v10 = vmul.f32 %v8266_v19, %v8266_v19 }
 0x80c   : > { %v2218_v46 = vsel %vm667_vm0, %v2200_v61, 0.0 }
 0x80d   : > { %2219 = vadd.xlane.f32.xlu1 %v2218_v46  ;;  %v2215_v33 = vsel %vm667_vm0, %v2199_v10, 0.0 }
 0x80f   : > { %v6611_v57 = vpop.f32.mrb[12].mxu0 }
 0x810   : > { %v2176_v56 = vpop.f32.mrb[13].mxu0  ;;  %v8275_v38 = vadd.f32 %v6611_v57, %v8181_v26  ;;  %v8289_v26 = vadd.f32 %v6597_v63, %v8209_v35  ;;  %v2345_v35 = vld [vmem:[%s7713_s19 + $0x10] sm:$0xff] }
 0x811   : > { %v8278_v27 = vadd.f32 %v2176_v56, %v8178_v14  ;;  %2216 = vadd.xlane.f32.xlu1 %v2215_v33  ;;  %6628 = vmatprep.mubr.msk.f32.mxu0 %vm667_vm0, %v2345_v35 }
 0x812   : > { %v2202_v12 = vmul.f32 %v8275_v38, %v8275_v38  ;;  %v2316_v4 = vmul.f32 %v8289_v26, %v8289_v26 }
 0x813   : > { %v2201_v5 = vmul.f32 %v8278_v27, %v8278_v27 }
 0x814   : > { %v2224_v14 = vsel %vm667_vm0, %v2202_v12, 0.0  ;;  %v2320_v1 = vsel %vm750_vm2, %v2316_v4, 0.0 }
 0x815   : > { %v2221_v2 = vsel %vm667_vm0, %v2201_v5, 0.0 }
 0x816   : > { %2222 = vadd.xlane.f32.xlu1 %v2221_v2 }
 0x81a   : > { %2225 = vadd.xlane.f32.xlu1 %v2224_v14 }
 0x81e   : > { %2318 = vadd.xlane.f32.xlu1 %v2317_v11 }
 0x822   : > { %2321 = vadd.xlane.f32.xlu1 %v2320_v1 }
 0x833   : > { %1676 = vrot.lane.b32.xlu1 %v8222_v28, %s7565_s17 }
 0x88a   : > { %v2208_v63 = vpop.xlane.xlu0 %2207 }
 0x88b   : > { %7242 = vrsqrt.f32 %v2208_v63  ;;  %v2205_v13 = vpop.xlane.xlu1 %2204  ;;  %vm2236_vm6 = vcmp.eq.f32.partialorder %v2208_v63, inf  ;;  %v2239_v51 = vand.u32 2147483648, %v2208_v63  ;;  %vm2238_vm7 = vcmp.eq.f32.partialorder %v2208_v63, 0.0 }
 0x88c   : > { %7244 = vrsqrt.f32 %v2205_v13  ;;  %vm2229_vm8 = vcmp.eq.f32.partialorder %v2205_v13, inf  ;;  %v2232_v16 = vand.u32 2147483648, %v2205_v13  ;;  %vm2231_vm9 = vcmp.eq.f32.partialorder %v2205_v13, 0.0 }
 0x88d   : > { %7246 = vpow2.f32 %v6142_v42 }
 0x892   : > { %v2214_v40 = vpop.xlane.xlu1 %2213 }
 0x893   : > { %7248 = vrsqrt.f32 %v2214_v40  ;;  %vm2250_vm10 = vcmp.eq.f32.partialorder %v2214_v40, inf  ;;  %v2253_v12 = vand.u32 2147483648, %v2214_v40  ;;  %vm2252_vm11 = vcmp.eq.f32.partialorder %v2214_v40, 0.0 }
 0x895   : > { %v7243_v45 = vpop.eup %7242 }
 0x896   : > { %v7245_v52 = vpop.eup %7244  ;;  %v2235_v62 = vmul.f32 %v7243_v45, %v2208_v63  ;;  %v2211_v29 = vpop.xlane.xlu1 %2210 }
 0x897   : > { %v2228_v30 = vmul.f32 %v7245_v52, %v2205_v13  ;;  %7250 = vrsqrt.f32 %v2211_v29  ;;  %v7247_v57 = vpop.eup %7246  ;;  %vm2243_vm12 = vcmp.eq.f32.partialorder %v2211_v29, inf  ;;  %v2246_v35 = vand.u32 2147483648, %v2211_v29 }
 0x898   : > { %v2237_v48 = vsel %vm2236_vm6, %v2208_v63, %v2235_v62  ;;  %v1671_v2 = vadd.f32 1.0, %v7247_v57  ;;  %vm2245_vm13 = vcmp.eq.f32.partialorder %v2211_v29, 0.0 }
 0x899   : > { %v2240_v37 = vsel %vm2238_vm7, %v2239_v51, %v2237_v48  ;;  %v2230_v20 = vsel %vm2229_vm8, %v2205_v13, %v2228_v30 }
 0x89a   : > { %v2284_v17 = vadd.f32 1e-05, %v2240_v37  ;;  %v2233_v61 = vsel %vm2231_vm9, %v2232_v16, %v2230_v20  ;;  %v2220_v46 = vpop.xlane.xlu1 %2219 }
 0x89b   : > { %v2283_v10 = vadd.f32 1e-05, %v2233_v61  ;;  %7252 = vrsqrt.f32 %v2220_v46  ;;  %vm2264_vm14 = vcmp.eq.f32.partialorder %v2220_v46, inf  ;;  %vm2266_vm15 = vcmp.eq.f32.partialorder %v2220_v46, 0.0 }
 0x89c   : > { %7254 = vrcp.f32 %v2284_v17 }
 0x89d   : > { %v7249_v56 = vpop.eup %7248  ;;  %7256 = vrcp.f32 %v2283_v10 }
 0x89e   : > { %v2249_v33 = vmul.f32 %v7249_v56, %v2214_v40  ;;  %v2217_v5 = vpop.xlane.xlu1 %2216 }
 0x89f   : > { %7258 = vrsqrt.f32 %v2217_v5  ;;  %vm2257_vm6 = vcmp.eq.f32.partialorder %v2217_v5, inf  ;;  %v2260_v56 = vand.u32 2147483648, %v2217_v5  ;;  %vm2259_vm7 = vcmp.eq.f32.partialorder %v2217_v5, 0.0 }
 0x8a0   : > { %v2251_v14 = vsel %vm2250_vm10, %v2214_v40, %v2249_v33  ;;  %7260 = vrcp.f32 %v1671_v2  ;;  %v2267_v40 = vand.u32 2147483648, %v2220_v46 }
 0x8a1   : > { %v7251_v59 = vpop.eup %7250  ;;  %v2254_v11 = vsel %vm2252_vm11, %v2253_v12, %v2251_v14 }
 0x8a2   : > { %v2286_v4 = vadd.f32 1e-05, %v2254_v11  ;;  %v2242_v1 = vmul.f32 %v7251_v59, %v2211_v29 }
 0x8a3   : > { %v2223_v63 = vpop.xlane.xlu1 %2222 }
 0x8a4   : > { %7262 = vrcp.f32 %v2286_v4  ;;  %v2244_v13 = vsel %vm2243_vm12, %v2211_v29, %v2242_v1  ;;  %vm2271_vm8 = vcmp.eq.f32.partialorder %v2223_v63, inf  ;;  %vm2273_vm9 = vcmp.eq.f32.partialorder %v2223_v63, 0.0 }
 0x8a5   : > { %v7253_v42 = vpop.eup %7252  ;;  %v2247_v45 = vsel %vm2245_vm13, %v2246_v35, %v2244_v13  ;;  %7264 = vrsqrt.f32 %v2223_v63 }
 0x8a6   : > { %v7255_v52 = vpop.eup %7254  ;;  %v2285_v62 = vadd.f32 1e-05, %v2247_v45  ;;  %v2263_v51 = vmul.f32 %v7253_v42, %v2220_v46 }
 0x8a7   : > { %v7257_v30 = vpop.eup %7256  ;;  %v2226_v48 = vpop.xlane.xlu1 %2225  ;;  %v2300_v16 = vmul.f32 %v7255_v52, %v8239_v9 }
 0x8a8   : > { %7266 = vrcp.f32 %v2285_v62  ;;  %v2265_v37 = vsel %vm2264_vm14, %v2220_v46, %v2263_v51  ;;  %v2299_v29 = vmul.f32 %v7257_v30, %v8242_v6  ;;  %vm2278_vm10 = vcmp.eq.f32.partialorder %v2226_v48, inf }
 0x8a9   : > { %v7259_v20 = vpop.eup %7258  ;;  %v2268_v17 = vsel %vm2266_vm15, %v2267_v40, %v2265_v37  ;;  %7268 = vrsqrt.f32 %v2226_v48  ;;  %v8306_v57 = vmul.f32 %v2300_v16, %v8033_v36  ;;  %vm2280_vm11 = vcmp.eq.f32.partialorder %v2226_v48, 0.0 }
 0x8aa   : > { %v2288_v61 = vadd.f32 1e-05, %v2268_v17  ;;  %v2256_v10 = vmul.f32 %v7259_v20, %v2217_v5  ;;  %v8309_v2 = vmul.f32 %v2299_v29, %v8017_v25  ;;  %v7261_v46 = vpop.eup %7260  ;;  %v2281_v20 = vand.u32 2147483648, %v2226_v48 }
 0x8ab   : > { %v2319_v33 = vpop.xlane.xlu1 %2318  ;;  %v1674_v42 = vmul.f32 %v7261_v46, %v8222_v28 }
 0x8ac   : > { %7270 = vrcp.f32 %v2288_v61  ;;  %v2258_v9 = vsel %vm2257_vm6, %v2217_v5, %v2256_v10  ;;  %v6934_v6 = vpack.c.bf16 %v8306_v57, %v8309_v2  ;;  %v2274_v5 = vand.u32 2147483648, %v2223_v63 }
 0x8ad   : > { %v2261_v12 = vsel %vm2259_vm7, %v2260_v56, %v2258_v9  ;;  %7272 = vrsqrt.f32 %v2319_v33  ;;  %vm2325_vm12 = vcmp.eq.f32.partialorder %v2319_v33, inf  ;;  %v2328_v9 = vand.u32 2147483648, %v2319_v33 }
 0x8ae   : > { %v7263_v14 = vpop.eup %7262  ;;  %v2287_v59 = vadd.f32 1e-05, %v2261_v12  ;;  %6936 = vmatprep.subr.msk.bf16.mxu0 %vm7723_vm1, %v6934_v6  ;;  %vm2327_vm13 = vcmp.eq.f32.partialorder %v2319_v33, 0.0 }
 0x8af   : > { %v7265_v11 = vpop.eup %7264  ;;  %v2322_v4 = vpop.xlane.xlu1 %2321  ;;  %6939 = vmatpush3.bf16.xpose.msk.msra.mxu0 %vm7723_vm1, %v6934_v6  ;;  %v2302_v35 = vmul.f32 %v7263_v14, %v8251_v3 }
 0x8b0   : > { %7274 = vrcp.f32 %v2287_v59  ;;  %v2270_v1 = vmul.f32 %v7265_v11, %v2223_v63  ;;  %vm2332_vm14 = vcmp.eq.f32.partialorder %v2322_v4, inf  ;;  %vm2334_vm15 = vcmp.eq.f32.partialorder %v2322_v4, 0.0 }
 0x8b1   : > { %7276 = vrsqrt.f32 %v2322_v4  ;;  %v8324_v3 = vmul.f32 %v2302_v35, %v8073_v43 }
 0x8b2   : > { %v7267_v13 = vpop.eup %7266  ;;  %v2272_v45 = vsel %vm2271_vm8, %v2223_v63, %v2270_v1 }
 0x8b3   : > { %v7269_v52 = vpop.eup %7268  ;;  %v2275_v62 = vsel %vm2273_vm9, %v2274_v5, %v2272_v45  ;;  %v1677_v51 = vpop.permute.xlu1 %1676  ;;  %v2301_v30 = vmul.f32 %v7267_v13, %v8254_v60  ;;  %v2335_v5 = vand.u32 2147483648, %v2322_v4 }
 0x8b4   : > { %v2289_v40 = vadd.f32 1e-05, %v2275_v62  ;;  %v2277_v16 = vmul.f32 %v7269_v52, %v2226_v48  ;;  %v1679_v37 = vmul.f32 %v1677_v51, %v1674_v42 }
 0x8b5   : > { %v8321_v17 = vmul.f32 %v2301_v30, %v8097_v0 }
 0x8b6   : > { %v7271_v29 = vpop.eup %7270  ;;  %7278 = vrcp.f32 %v2289_v40  ;;  %v2279_v28 = vsel %vm2278_vm10, %v2226_v48, %v2277_v16  ;;  %6584 = vmatmul.mubr.msk.f32.vlgmr.msra.gmra.mrb[16].mxu1 %vm750_vm2, %v1679_v37 }
 0x8b7   : > { %v7273_v63 = vpop.eup %7272  ;;  %v2282_v61 = vsel %vm2280_vm11, %v2281_v20, %v2279_v28  ;;  %v6940_v60 = vpack.c.bf16 %v8324_v3, %v8321_v17  ;;  %6635 = vmatprep.mubr.msk.f32.mxu1 %vm7563_vm4, %v7564_v55  ;;  %v2304_v46 = vmul.f32 %v7271_v29, %v8262_v18  ;;  %v8373_v28 = vld [vmem:[%s7802_s14 + $0x10] sm:$0xff] }
 0x8b8   : > { %v2290_v10 = vadd.f32 1e-05, %v2282_v61  ;;  %v2324_v56 = vmul.f32 %v7273_v63, %v2319_v33 }
 0x8b9   : > { %6942 = vmatprep.subr.msk.bf16.mxu0 %vm7723_vm1, %v6940_v60  ;;  %v8341_v18 = vmul.f32 %v2304_v46, %v8138_v21 }
 0x8ba   : > { %v7275_v48 = vpop.eup %7274  ;;  %7280 = vrcp.f32 %v2290_v10  ;;  %v2326_v12 = vsel %vm2325_vm12, %v2319_v33, %v2324_v56  ;;  %6945 = vmatpush3.bf16.xpose.msk.msra.mxu0 %vm7723_vm1, %v6940_v60 }
 0x8bb   : > { %v7277_v6 = vpop.eup %7276  ;;  %v2329_v14 = vsel %vm2327_vm13, %v2328_v9, %v2326_v12  ;;  %v2303_v59 = vmul.f32 %v7275_v48, %v8266_v19 }
 0x8bc   : > { %v2337_v11 = vadd.f32 1e-05, %v2329_v14  ;;  %v2331_v1 = vmul.f32 %v7277_v6, %v2322_v4 }
 0x8bd   : > { %v8338_v35 = vmul.f32 %v2303_v59, %v8140_v24 }
 0x8be   : > { %7282 = vrcp.f32 %v2337_v11  ;;  %v2333_v13 = vsel %vm2332_vm14, %v2322_v4, %v2331_v1 }
 0x8bf   : > { %v2336_v33 = vsel %vm2334_vm15, %v2335_v5, %v2333_v13  ;;  %v6946_v42 = vpack.c.bf16 %v8341_v18, %v8338_v35  ;;  %v2580_v13 = vld [vmem:[%s7850_s29 + $0x10] sm:$0xff] }
 0x8c0   : > { %v7279_v45 = vpop.eup %7278  ;;  %v2338_v52 = vadd.f32 1e-05, %v2336_v33 }
 0x8c1   : > { %6948 = vmatprep.subr.msk.bf16.mxu0 %vm7723_vm1, %v6946_v42  ;;  %v2305_v19 = vmul.f32 %v7279_v45, %v8278_v27 }
 0x8c2   : > { %7284 = vrcp.f32 %v2338_v52  ;;  %6951 = vmatpush3.bf16.xpose.msk.msra.mxu0 %vm7723_vm1, %v6946_v42 }
 0x8c3   : > { %v8352_v4 = vmul.f32 %v2305_v19, %v8173_v31 }
 0x8c4   : > { %v7281_v62 = vpop.eup %7280 }
 0x8c5   : > { %v2306_v51 = vmul.f32 %v7281_v62, %v8275_v38 }
 0x8c7   : > { %v8355_v30 = vmul.f32 %v2306_v51, %v8171_v8 }
 0x8c8   : > { %v7283_v40 = vpop.eup %7282 }
 0x8c9   : > { %v6952_v16 = vpack.c.bf16 %v8355_v30, %v8352_v4  ;;  %v2341_v37 = vmul.f32 %v7283_v40, %v8283_v22  ;;  %v2581_v22 = vld [vmem:[%s7729_s23 + $0x10] sm:$0xff] }
 0x8ca   : > { %2799 = vperm.xlu1 %7158, %v2581_v22  }
 0x8cb   : > { %6954 = vmatprep.subr.msk.bf16.mxu0 %vm7723_vm1, %v6952_v16  ;;  %v8367_v20 = vmul.f32 %v2341_v37, %v8201_v7 }
 0x8cc   : > { %v7285_v27 = vpop.eup %7284  ;;  %6957 = vmatpush3.bf16.xpose.msk.msra.mxu0 %vm7723_vm1, %v6952_v16 }
 0x8cd   : > { %v2342_v38 = vmul.f32 %v7285_v27, %v8289_v26  ;;  %6981 = vmatprep.subr.bf16.mxu0 %v7562_v50 }
 0x8ce   : > { %7159 = vset.pattern.permute.xlu1 %v7560_v32 }
 0x8cf   : > { %v8370_v29 = vmul.f32 %v2342_v38, %v8199_v23  ;;  %2794 = vperm.xlu1 %7159, %v2581_v22  }
 0x8d1   : > { %v6959_v63 = vpack.c.bf16 %v8370_v29, %v8367_v20 }
 0x8d3   : > { %6629 = vmatmul.mubr.msk.f32.vlgmr.msra.gmra.mrb[14].mxu0 %vm667_vm0, %v8373_v28  ;;  %6961 = vmatpush3.bf16.xpose.msk.msra.mxu1 %vm7826_vm3, %v6959_v63 }
 0x8d4   : > { %6962 = vmatprep.subr.bf16.mxu1 %v7562_v50  ;;  %6687 = vmatprep.mubr.msk.f32.mxu0 %vm7563_vm4, %v7564_v55 }
 0x8d5   : > { %7160 = vset.pattern.permute.xlu1 %v7566_v58 }
 0x949   : > { %v2800_v11 = vpop.permute.xlu1 %2799 }
 0x94e   : > { %v2795_v33 = vpop.permute.xlu1 %2794 }
 0x989   : > { %v8387_v26 = vpop.f32.mrb[16].mxu1 }
 0x98a   : > { %v6585_v61 = vpop.f32.mrb[17].mxu1 }
 0x9a6   : > { %v6630_v60 = vpop.f32.mrb[14].mxu0 }
 0x9a7   : > { %2590 = vrot.lane.b32.xlu1 %v6630_v60, %s7565_s17  ;;  %v2443_v10 = vpop.f32.mrb[15].mxu0  ;;  %v6172_v46 = vmul.f32 -1.442695, %v6630_v60 }
 0x9a8   : > { %2460 = vrot.lane.b32.xlu0 %v2443_v10, %s7565_s17  ;;  %v6168_v56 = vmul.f32 -1.442695, %v2443_v10 }
 0x9aa   : > { %7286 = vpow2.f32 %v6168_v56 }
 0x9ab   : > { %2676 = vperm.xlu1 %7160, %v2581_v22   ;;  %7288 = vpow2.f32 %v6172_v46 }
 0x9b4   : > { %v7287_v9 = vpop.eup %7286 }
 0x9b5   : > { %v2455_v48 = vadd.f32 1.0, %v7287_v9  ;;  %v7289_v12 = vpop.eup %7288 }
 0x9b6   : > { %v2585_v14 = vadd.f32 1.0, %v7289_v12 }
 0x9b7   : > { %7290 = vrcp.f32 %v2455_v48 }
 0x9b8   : > { %7292 = vrcp.f32 %v2585_v14 }
 0x9c1   : > { %v7291_v6 = vpop.eup %7290 }
 0x9c2   : > { %v2458_v59 = vmul.f32 %v7291_v6, %v2443_v10  ;;  %v7293_v42 = vpop.eup %7292 }
 0x9c3   : > { %v2588_v52 = vmul.f32 %v7293_v42, %v6630_v60  ;;  %v2670_v40 = vsub.f32 1.0, %v7293_v42 }
 0x9c5   : > { %v2671_v27 = vmul.f32 %v6630_v60, %v2670_v40 }
 0x9c7   : > { %v2672_v10 = vadd.f32 1.0, %v2671_v27 }
 0xa19   : > { %v2591_v45 = vpop.permute.xlu1 %2590 }
 0xa1a   : > { %v2461_v1 = vpop.permute.xlu0 %2460  ;;  %v2593_v19 = vmul.f32 %v2591_v45, %v2588_v52 }
 0xa1b   : > { %v2463_v5 = vmul.f32 %v2461_v1, %v2458_v59 }
 0xa1d   : > { %6636 = vmatmul.mubr.msk.f32.vlgmr.msra.gmra.mrb[18].mxu1 %vm750_vm2, %v2463_v5 }
 0xa1e   : > { %6964 = vmatpush3.bf16.msra.mxu1 %v6959_v63  ;;  %6642 = vmatprep.mubr.msk.f32.mxu1 %vm7563_vm4, %v7564_v55 }
 0xa21   : > { %6643 = vmatmul.mubr.msk.f32.vlgmr.msra.gmra.mrb[20].mxu1 %vm667_vm0, %v2580_v13 }
 0xa2a   : > { %v2677_v62 = vpop.permute.xlu1 %2676 }
 0xa2b   : > { %v2679_v51 = vmul.f32 %v2677_v62, %v2593_v19 }
 0xa2d   : > { %6645 = vmatprep.subr.mxu1 %v2679_v51 }
 0xa2e   : > { %6646 = vmatpush3.msra.mxu1 %v2679_v51 }
 0xa2f   : > { %6650 = vmatprep.subr.mxu1 %v8373_v28 }
 0xaf0   : > { %v8397_v16 = vpop.f32.mrb[18].mxu1 }
 0xaf1   : > { %v6637_v37 = vpop.f32.mrb[19].mxu1 }
 0xaf4   : > { %v2663_v38 = vpop.f32.mrb[20].mxu1 }
 0xaf5   : > { %v2667_v63 = vmul.f32 %v2663_v38, %v2588_v52  ;;  %v2668_v22 = vmul.f32 %v2663_v38, %v2591_v45  ;;  %v6644_v61 = vpop.f32.mrb[21].mxu1 }
 0xaf7   : > { %v2669_v56 = vmul.f32 %v7293_v42, %v2668_v22  ;;  %v2802_v9 = vmul.f32 %v2800_v11, %v2667_v63 }
 0xaf9   : > { %v2673_v46 = vmul.f32 %v2672_v10, %v2669_v56  ;;  %2804 = vrot.lane.b32.xlu0 %v2802_v9, %s7567_s16 }
 0xafb   : > { %v2797_v48 = vmul.f32 %v2795_v33, %v2673_v46 }
 0xb17   : > { %2680 = vxpose.xlu0.b32.start.end [1/1] (short) (narrow) %v2580_v13, 16 }
 0xb40   : > { %7163 = vset.pattern.permute.xlu0 %v7566_v58 }
 0xb6b   : > { %v2805_v12 = vpop.permute.xlu0 %2804 }
 0xb6c   : > { %v2807_v6 = vsel %vm750_vm2, %v2797_v48, %v2805_v12 }
 0xb6d   : > { %2808 = vxpose.xlu1.b32.start.end [1/1] (short) (narrow) %v2807_v6, 64 }
 0xb8b   : > { %7161 = vset.pattern.permute.xlu1 %v7561_v49 }
 0xb97   : > { %v2696_v60 = vpop.trf.xlu0 }
 0xb98   : > { %6647 = vmatprep.mubr.msk.f32.mxu1 %vm1143_vm5, %v2696_v60 }
 0xb9b   : > { %v2697_v14 = vpop.trf.xlu0 }
 0xb9c   : > { %6648 = vmatmul.mubr.msk.f32.vlgmr.msra.gmra.mrb[22].mxu1 %vm1143_vm5, %v2697_v14 }
 0xb9d   : > { %6651 = vmatpush3.msra.mxu1 %v8373_v28 }
 0xb9e   : > { %6965 = vmatprep.subr.bf16.mxu1 %v7562_v50 }
 0xbed   : > { %v2824_v59 = vpop.trf.xlu1 }
 0xbee   : > { %6652 = vmatprep.mubr.msk.f32.mxu1 %vm1143_vm5, %v2824_v59 }
 0xbf1   : > { %v2825_v11 = vpop.trf.xlu1 }
 0xbf2   : > { %6653 = vmatmul.mubr.msk.f32.vlgmr.msra.gmra.mrb[24].mxu1 %vm1143_vm5, %v2825_v11 }
 0xbf5   : > { %v2826_v1 = vpop.trf.xlu1 }
 0xbf6   : > { %6655 = vmatprep.mubr.msk.f32.mxu1 %vm1143_vm5, %v2826_v1 }
 0xbf9   : > { %v2827_v5 = vpop.trf.xlu1 }
 0xbfa   : > { %6656 = vmatmul.mubr.msk.f32.gmra.mrb[26].mxu1 %vm1143_vm5, %v2827_v5 }
 0xbfd   : > { %v2828_v13 = vpop.trf.xlu1 }
 0xbfe   : > { %6658 = vmatprep.mubr.msk.f32.mxu1 %vm1143_vm5, %v2828_v13 }
 0xc01   : > { %v2829_v33 = vpop.trf.xlu1 }
 0xc02   : > { %6659 = vmatmul.mubr.msk.f32.gmra.mrb[28].mxu1 %vm1143_vm5, %v2829_v33 }
 0xc05   : > { %v2830_v28 = vpop.trf.xlu1 }
 0xc06   : > { %6661 = vmatprep.mubr.msk.f32.mxu1 %vm1143_vm5, %v2830_v28 }
 0xc09   : > { %v2831_v42 = vpop.trf.xlu1 }
 0xc0a   : > { %6662 = vmatmul.mubr.msk.f32.gmra.mrb[30].mxu1 %vm1143_vm5, %v2831_v42 }
 0xc0b   : > { %6680 = vmatprep.mubr.msk.f32.mxu1 %vm7563_vm4, %v7564_v55 }
 0xc6f   : > { %v6649_v45 = vpop.f32.mrb[22].mxu1 }
 0xc70   : > { %v2784_v52 = vpop.f32.mrb[23].mxu1  ;;  %v8468_v42 = vadd.f32 %v6649_v45, %v8370_v29 }
 0xc71   : > { %v8462_v13 = vadd.f32 %v2784_v52, %v8367_v20 }
 0xc72   : > { %v3100_v20 = vmul.f32 %v8468_v42, %v8468_v42 }
 0xc74   : > { %v3104_v52 = vsel %vm750_vm2, %v3100_v20, 0.0 }
 0xcc5   : > { %v6654_v19 = vpop.f32.mrb[24].mxu1 }
 0xcc6   : > { %v8418_v62 = vadd.f32 %v6654_v19, %v8306_v57  ;;  %v2930_v51 = vpop.f32.mrb[25].mxu1 }
 0xcc7   : > { %v8421_v40 = vadd.f32 %v2930_v51, %v8309_v2 }
 0xcc8   : > { %v2980_v37 = vmul.f32 %v8418_v62, %v8418_v62 }
 0xcc9   : > { %v2979_v27 = vmul.f32 %v8421_v40, %v8421_v40 }
 0xcca   : > { %v2990_v38 = vsel %vm667_vm0, %v2980_v37, 0.0 }
 0xccb   : > { %2991 = vadd.xlane.f32.xlu1 %v2990_v38  ;;  %v2987_v63 = vsel %vm667_vm0, %v2979_v27, 0.0 }
 0xccc   : > { %2988 = vadd.xlane.f32.xlu0 %v2987_v63 }
 0xccd   : > { %v6657_v22 = vpop.f32.mrb[26].mxu1 }
 0xcce   : > { %v8430_v57 = vadd.f32 %v6657_v22, %v8324_v3  ;;  %v2940_v61 = vpop.f32.mrb[27].mxu1 }
 0xccf   : > { %v8433_v2 = vadd.f32 %v2940_v61, %v8321_v17 }
 0xcd0   : > { %v2982_v10 = vmul.f32 %v8430_v57, %v8430_v57 }
 0xcd1   : > { %v2981_v9 = vmul.f32 %v8433_v2, %v8433_v2 }
 0xcd2   : > { %v2996_v56 = vsel %vm667_vm0, %v2982_v10, 0.0 }
 0xcd3   : > { %2997 = vadd.xlane.f32.xlu0 %v2996_v56  ;;  %v2993_v3 = vsel %vm667_vm0, %v2981_v9, 0.0 }
 0xcd5   : > { %v6660_v46 = vpop.f32.mrb[28].mxu1 }
 0xcd6   : > { %v8441_v48 = vadd.f32 %v6660_v46, %v8341_v18  ;;  %v2950_v12 = vpop.f32.mrb[29].mxu1 }
 0xcd7   : > { %v8445_v6 = vadd.f32 %v2950_v12, %v8338_v35  ;;  %2994 = vadd.xlane.f32.xlu0 %v2993_v3 }
 0xcd8   : > { %v2984_v17 = vmul.f32 %v8441_v48, %v8441_v48 }
 0xcd9   : > { %v2983_v14 = vmul.f32 %v8445_v6, %v8445_v6 }
 0xcda   : > { %v3002_v60 = vsel %vm667_vm0, %v2984_v17, 0.0 }
 0xcdb   : > { %3003 = vadd.xlane.f32.xlu0 %v3002_v60  ;;  %v2999_v18 = vsel %vm667_vm0, %v2983_v14, 0.0 }
 0xcdd   : > { %v6663_v59 = vpop.f32.mrb[30].mxu1 }
 0xcde   : > { %v2960_v11 = vpop.f32.mrb[31].mxu1  ;;  %v8454_v1 = vadd.f32 %v6663_v59, %v8355_v30 }
 0xcdf   : > { %v8457_v35 = vadd.f32 %v2960_v11, %v8352_v4  ;;  %3000 = vadd.xlane.f32.xlu0 %v2999_v18  ;;  %v3099_v4 = vmul.f32 %v8462_v13, %v8462_v13 }
 0xce0   : > { %v2986_v28 = vmul.f32 %v8454_v1, %v8454_v1 }
 0xce1   : > { %v2985_v5 = vmul.f32 %v8457_v35, %v8457_v35  ;;  %v3101_v19 = vsel %vm750_vm2, %v3099_v4, 0.0 }
 0xce2   : > { %v3008_v30 = vsel %vm667_vm0, %v2986_v28, 0.0 }
 0xce3   : > { %v3005_v33 = vsel %vm667_vm0, %v2985_v5, 0.0 }
 0xce4   : > { %3006 = vadd.xlane.f32.xlu0 %v3005_v33 }
 0xce8   : > { %3009 = vadd.xlane.f32.xlu0 %v3008_v30 }
 0xcec   : > { %3102 = vadd.xlane.f32.xlu0 %v3101_v19 }
 0xcf0   : > { %3105 = vadd.xlane.f32.xlu0 %v3104_v52 }
 0xd58   : > { %v2992_v51 = vpop.xlane.xlu1 %2991 }
 0xd59   : > { %7294 = vrsqrt.f32 %v2992_v51  ;;  %v2989_v37 = vpop.xlane.xlu0 %2988  ;;  %vm3020_vm6 = vcmp.eq.f32.partialorder %v2992_v51, inf  ;;  %v3023_v22 = vand.u32 2147483648, %v2992_v51  ;;  %vm3022_vm7 = vcmp.eq.f32.partialorder %v2992_v51, 0.0 }
 0xd5a   : > { %7296 = vrsqrt.f32 %v2989_v37  ;;  %vm3013_vm8 = vcmp.eq.f32.partialorder %v2989_v37, inf  ;;  %v3016_v56 = vand.u32 2147483648, %v2989_v37  ;;  %vm3015_vm9 = vcmp.eq.f32.partialorder %v2989_v37, 0.0 }
 0xd60   : > { %v2998_v29 = vpop.xlane.xlu0 %2997 }
 0xd61   : > { %7298 = vrsqrt.f32 %v2998_v29  ;;  %vm3034_vm10 = vcmp.eq.f32.partialorder %v2998_v29, inf  ;;  %v3037_v18 = vand.u32 2147483648, %v2998_v29  ;;  %vm3036_vm11 = vcmp.eq.f32.partialorder %v2998_v29, 0.0 }
 0xd63   : > { %v7295_v45 = vpop.eup %7294 }
 0xd64   : > { %v7297_v27 = vpop.eup %7296  ;;  %v3019_v38 = vmul.f32 %v7295_v45, %v2992_v51  ;;  %v2995_v63 = vpop.xlane.xlu0 %2994 }
 0xd65   : > { %v3012_v61 = vmul.f32 %v7297_v27, %v2989_v37  ;;  %7300 = vrsqrt.f32 %v2995_v63  ;;  %vm3027_vm12 = vcmp.eq.f32.partialorder %v2995_v63, inf  ;;  %v3030_v19 = vand.u32 2147483648, %v2995_v63 }
 0xd66   : > { %v3021_v10 = vsel %vm3020_vm6, %v2992_v51, %v3019_v38  ;;  %vm3029_vm13 = vcmp.eq.f32.partialorder %v2995_v63, 0.0 }
 0xd67   : > { %v3024_v9 = vsel %vm3022_vm7, %v3023_v22, %v3021_v10  ;;  %v3014_v46 = vsel %vm3013_vm8, %v2989_v37, %v3012_v61 }
 0xd68   : > { %v3068_v12 = vadd.f32 1e-05, %v3024_v9  ;;  %v3017_v3 = vsel %vm3015_vm9, %v3016_v56, %v3014_v46  ;;  %v3004_v17 = vpop.xlane.xlu0 %3003 }
 0xd69   : > { %v3067_v60 = vadd.f32 1e-05, %v3017_v3  ;;  %7302 = vrsqrt.f32 %v3004_v17  ;;  %vm3048_vm14 = vcmp.eq.f32.partialorder %v3004_v17, inf  ;;  %v3051_v61 = vand.u32 2147483648, %v3004_v17 }
 0xd6a   : > { %7304 = vrcp.f32 %v3068_v12  ;;  %vm3050_vm15 = vcmp.eq.f32.partialorder %v3004_v17, 0.0 }
 0xd6b   : > { %v7299_v14 = vpop.eup %7298  ;;  %7306 = vrcp.f32 %v3067_v60 }
 0xd6c   : > { %v3033_v59 = vmul.f32 %v7299_v14, %v2998_v29  ;;  %v3001_v11 = vpop.xlane.xlu0 %3000 }
 0xd6d   : > { %7308 = vrsqrt.f32 %v3001_v11  ;;  %vm3041_vm6 = vcmp.eq.f32.partialorder %v3001_v11, inf  ;;  %v3044_v14 = vand.u32 2147483648, %v3001_v11  ;;  %vm3043_vm7 = vcmp.eq.f32.partialorder %v3001_v11, 0.0 }
 0xd6e   : > { %v3035_v5 = vsel %vm3034_vm10, %v2998_v29, %v3033_v59 }
 0xd6f   : > { %v7301_v33 = vpop.eup %7300  ;;  %v3038_v28 = vsel %vm3036_vm11, %v3037_v18, %v3035_v5 }
 0xd70   : > { %v3070_v30 = vadd.f32 1e-05, %v3038_v28  ;;  %v3026_v4 = vmul.f32 %v7301_v33, %v2995_v63 }
 0xd71   : > { %v3007_v20 = vpop.xlane.xlu0 %3006 }
 0xd72   : > { %7310 = vrcp.f32 %v3070_v30  ;;  %v3028_v52 = vsel %vm3027_vm12, %v2995_v63, %v3026_v4  ;;  %vm3055_vm8 = vcmp.eq.f32.partialorder %v3007_v20, inf  ;;  %vm3057_vm9 = vcmp.eq.f32.partialorder %v3007_v20, 0.0 }
 0xd73   : > { %v7303_v51 = vpop.eup %7302  ;;  %v3031_v37 = vsel %vm3029_vm13, %v3030_v19, %v3028_v52  ;;  %7312 = vrsqrt.f32 %v3007_v20  ;;  %v3058_v19 = vand.u32 2147483648, %v3007_v20 }
 0xd74   : > { %v7305_v45 = vpop.eup %7304  ;;  %v3069_v27 = vadd.f32 1e-05, %v3031_v37  ;;  %v3047_v38 = vmul.f32 %v7303_v51, %v3004_v17 }
 0xd75   : > { %v7307_v22 = vpop.eup %7306  ;;  %v3010_v29 = vpop.xlane.xlu0 %3009  ;;  %v3084_v10 = vmul.f32 %v7305_v45, %v8418_v62 }
 0xd76   : > { %7314 = vrcp.f32 %v3069_v27  ;;  %v3049_v56 = vsel %vm3048_vm14, %v3004_v17, %v3047_v38  ;;  %v3083_v63 = vmul.f32 %v7307_v22, %v8421_v40  ;;  %vm3062_vm10 = vcmp.eq.f32.partialorder %v3010_v29, inf }
 0xd77   : > { %v7309_v9 = vpop.eup %7308  ;;  %v3052_v46 = vsel %vm3050_vm15, %v3051_v61, %v3049_v56  ;;  %7316 = vrsqrt.f32 %v3010_v29  ;;  %v3092_v60 = vmul.f32 %v3084_v10, %v8033_v36  ;;  %v3065_v61 = vand.u32 2147483648, %v3010_v29 }
 0xd78   : > { %v3072_v12 = vadd.f32 1e-05, %v3052_v46  ;;  %v3040_v3 = vmul.f32 %v7309_v9, %v3001_v11  ;;  %v3091_v18 = vmul.f32 %v3083_v63, %v8017_v25  ;;  %vm3064_vm11 = vcmp.eq.f32.partialorder %v3010_v29, 0.0 }
 0xd79   : > { %v3103_v59 = vpop.xlane.xlu0 %3102 }
 0xd7a   : > { %7318 = vrcp.f32 %v3072_v12  ;;  %v3042_v5 = vsel %vm3041_vm6, %v3001_v11, %v3040_v3  ;;  %v6966_v17 = vpack.c.bf16 %v3092_v60, %v3091_v18  ;;  %vm3109_vm12 = vcmp.eq.f32.partialorder %v3103_v59, inf }
 0xd7b   : > { %v3045_v62 = vsel %vm3043_vm7, %v3044_v14, %v3042_v5  ;;  %7320 = vrsqrt.f32 %v3103_v59  ;;  %v3112_v60 = vand.u32 2147483648, %v3103_v59  ;;  %vm3111_vm13 = vcmp.eq.f32.partialorder %v3103_v59, 0.0 }
 0xd7c   : > { %v7311_v33 = vpop.eup %7310  ;;  %v3071_v28 = vadd.f32 1e-05, %v3045_v62  ;;  %6968 = vmatpush3.bf16.xpose.msk.msra.mxu1 %vm7723_vm1, %v6966_v17 }
 0xd7d   : > { %v7313_v30 = vpop.eup %7312  ;;  %v3106_v40 = vpop.xlane.xlu0 %3105  ;;  %6969 = vmatprep.subr.bf16.mxu1 %v7562_v50  ;;  %v3086_v52 = vmul.f32 %v7311_v33, %v8430_v57 }
 0xd7e   : > { %7322 = vrcp.f32 %v3071_v28  ;;  %v3054_v4 = vmul.f32 %v7313_v30, %v3007_v20  ;;  %vm3116_vm14 = vcmp.eq.f32.partialorder %v3106_v40, inf  ;;  %v3119_v28 = vand.u32 2147483648, %v3106_v40 }
 0xd7f   : > { %7324 = vrsqrt.f32 %v3106_v40  ;;  %v3094_v56 = vmul.f32 %v3086_v52, %v8073_v43  ;;  %vm3118_vm15 = vcmp.eq.f32.partialorder %v3106_v40, 0.0 }
 0xd80   : > { %v7315_v11 = vpop.eup %7314  ;;  %v3056_v51 = vsel %vm3055_vm8, %v3007_v20, %v3054_v4 }
 0xd81   : > { %v7317_v37 = vpop.eup %7316  ;;  %v3059_v45 = vsel %vm3057_vm9, %v3058_v19, %v3056_v51  ;;  %v3085_v27 = vmul.f32 %v7315_v11, %v8433_v2 }
 0xd82   : > { %v3073_v38 = vadd.f32 1e-05, %v3059_v45  ;;  %v3061_v22 = vmul.f32 %v7317_v37, %v3010_v29 }
 0xd83   : > { %v3093_v10 = vmul.f32 %v3085_v27, %v8097_v0 }
 0xd84   : > { %v7319_v9 = vpop.eup %7318  ;;  %7326 = vrcp.f32 %v3073_v38  ;;  %v3063_v46 = vsel %vm3062_vm10, %v3010_v29, %v3061_v22 }
 0xd85   : > { %v7321_v57 = vpop.eup %7320  ;;  %v3066_v63 = vsel %vm3064_vm11, %v3065_v61, %v3063_v46  ;;  %v6970_v12 = vpack.c.bf16 %v3094_v56, %v3093_v10  ;;  %v3088_v2 = vmul.f32 %v7319_v9, %v8441_v48 }
 0xd86   : > { %v3074_v20 = vadd.f32 1e-05, %v3066_v63  ;;  %v3108_v3 = vmul.f32 %v7321_v57, %v3103_v59 }
 0xd87   : > { %6972 = vmatpush3.bf16.xpose.msk.msra.mxu1 %vm7723_vm1, %v6970_v12  ;;  %v3096_v4 = vmul.f32 %v3088_v2, %v8138_v21  ;;  %v6197_v2 = vld [vmem:[%s7713_s19 + $0x20] sm:$0xff] }
 0xd88   : > { %v7323_v14 = vpop.eup %7322  ;;  %7328 = vrcp.f32 %v3074_v20  ;;  %v3110_v18 = vsel %vm3109_vm12, %v3103_v59, %v3108_v3  ;;  %6973 = vmatprep.subr.bf16.mxu1 %v7562_v50 }
 0xd89   : > { %v7325_v5 = vpop.eup %7324  ;;  %v3113_v29 = vsel %vm3111_vm13, %v3112_v60, %v3110_v18  ;;  %v3087_v62 = vmul.f32 %v7323_v14, %v8445_v6 }
 0xd8a   : > { %v3121_v17 = vadd.f32 1e-05, %v3113_v29  ;;  %v3115_v33 = vmul.f32 %v7325_v5, %v3106_v40 }
 0xd8b   : > { %v3095_v30 = vmul.f32 %v3087_v62, %v8140_v24 }
 0xd8c   : > { %7330 = vrcp.f32 %v3121_v17  ;;  %v3117_v48 = vsel %vm3116_vm14, %v3106_v40, %v3115_v33 }
 0xd8d   : > { %v3120_v19 = vsel %vm3118_vm15, %v3119_v28, %v3117_v48  ;;  %v6974_v52 = vpack.c.bf16 %v3096_v4, %v3095_v30 }
 0xd8e   : > { %v7327_v59 = vpop.eup %7326  ;;  %v3122_v11 = vadd.f32 1e-05, %v3120_v19 }
 0xd8f   : > { %6976 = vmatpush3.bf16.xpose.msk.msra.mxu1 %vm7723_vm1, %v6974_v52  ;;  %v3089_v6 = vmul.f32 %v7327_v59, %v8457_v35  ;;  %v3129_v35 = vld [vmem:[%s7713_s19 + $0x18] sm:$0xff]  ;;  %v6214_v52 = vld [vmem:[%s7850_s29 + $0x20] sm:$0xff] }
 0xd90   : > { %7332 = vrcp.f32 %v3122_v11  ;;  %6977 = vmatprep.subr.bf16.mxu1 %v7562_v50 }
 0xd91   : > { %v3097_v45 = vmul.f32 %v3089_v6, %v8173_v31 }
 0xd92   : > { %v7329_v51 = vpop.eup %7328 }
 0xd93   : > { %v3090_v37 = vmul.f32 %v7329_v51, %v8454_v1 }
 0xd95   : > { %v3098_v40 = vmul.f32 %v3090_v37, %v8171_v8 }
 0xd96   : > { %v7331_v27 = vpop.eup %7330 }
 0xd97   : > { %v6978_v38 = vpack.c.bf16 %v3098_v40, %v3097_v45  ;;  %v3125_v22 = vmul.f32 %v7331_v27, %v8462_v13 }
 0xd99   : > { %6980 = vmatpush3.bf16.xpose.msk.msra.mxu1 %vm7723_vm1, %v6978_v38  ;;  %v3127_v56 = vmul.f32 %v3125_v22, %v8201_v7 }
 0xd9a   : > { %v7333_v61 = vpop.eup %7332  ;;  %7009 = vmatprep.subr.bf16.mxu1 %v7562_v50 }
 0xd9b   : > { %v3126_v10 = vmul.f32 %v7333_v61, %v8468_v42 }
 0xd9d   : > { %v3128_v1 = vmul.f32 %v3126_v10, %v8199_v23 }
 0xd9f   : > { %v6982_v9 = vpack.c.bf16 %v3128_v1, %v3127_v56 }
 0xda0   : > { %6681 = vmatmul.mubr.msk.f32.vlgmr.msra.gmra.mrb[32].mxu1 %vm667_vm0, %v3129_v35 }
 0xda1   : > { %6984 = vmatpush3.bf16.xpose.msk.msra.mxu0 %vm7826_vm3, %v6982_v9  ;;  %7012 = vmatpush3.bf16.xpose.msk.msra.mxu1 %vm7826_vm3, %v7832_v54 }
 0xda2   : > { %6987 = vmatprep.subr.msk.bf16.mxu0 %vm7723_vm1, %v7743_v39  ;;  %6713 = vmatprep.mubr.msk.f32.mxu1 %vm7563_vm4, %v7564_v55 }
 0xda3   : > { %7013 = vmatprep.subr.bf16.mxu1 %v7562_v50 }
 0xe73   : > { %v3223_v13 = vpop.f32.mrb[32].mxu1 }
 0xe74   : > { %3235 = vrot.lane.b32.xlu1 %v3223_v13, %s7565_s17  ;;  %v6682_v42 = vpop.f32.mrb[33].mxu1  ;;  %v6193_v46 = vmul.f32 -1.442695, %v3223_v13 }
 0xe76   : > { %7334 = vpow2.f32 %v6193_v46 }
 0xe80   : > { %v7335_v57 = vpop.eup %7334 }
 0xe81   : > { %v3230_v63 = vadd.f32 1.0, %v7335_v57 }
 0xe83   : > { %7336 = vrcp.f32 %v3230_v63 }
 0xe8d   : > { %v7337_v12 = vpop.eup %7336 }
 0xe8e   : > { %v3233_v20 = vmul.f32 %v7337_v12, %v3223_v13 }
 0xee6   : > { %v3236_v3 = vpop.permute.xlu1 %3235 }
 0xee7   : > { %v3238_v60 = vmul.f32 %v3236_v3, %v3233_v20 }
 0xee9   : > { %6688 = vmatmul.mubr.msk.f32.vlgmr.msra.gmra.mrb[16].mxu0 %vm750_vm2, %v3238_v60 }
 0xeea   : > { %6990 = vmatpush3.bf16.xpose.msk.msra.mxu0 %vm7723_vm1, %v7743_v39  ;;  %6706 = vmatprep.mubr.msk.f32.mxu0 %vm667_vm0, %v6197_v2  ;;  %v8548_v39 = vld [vmem:[%s7802_s14 + $0x20] sm:$0xff] }
 0xeeb   : > { %6993 = vmatprep.subr.msk.bf16.mxu0 %vm7723_vm1, %v7750_v41 }
 0xef2   : > { %6996 = vmatpush3.bf16.xpose.msk.msra.mxu0 %vm7723_vm1, %v7750_v41  ;;  %v6215_v41 = vld [vmem:[%s7729_s23 + $0x20] sm:$0xff] }
 0xef3   : > { %6999 = vmatprep.subr.msk.bf16.mxu0 %vm7723_vm1, %v7774_v44  ;;  %3784 = vperm.xlu1 %7161, %v6215_v41  }
 0xef7   : > { %7162 = vset.pattern.permute.xlu1 %v7560_v32 }
 0xef8   : > { %3779 = vperm.xlu1 %7162, %v6215_v41  }
 0xefa   : > { %7002 = vmatpush3.bf16.xpose.msk.msra.mxu0 %vm7723_vm1, %v7774_v44 }
 0xefb   : > { %7005 = vmatprep.subr.msk.bf16.mxu0 %vm7723_vm1, %v7790_v47 }
 0xf02   : > { %7008 = vmatpush3.bf16.xpose.msk.msra.mxu0 %vm7723_vm1, %v7790_v47 }
 0xf09   : > { %6707 = vmatmul.mubr.msk.f32.vlgmr.msra.gmra.mrb[18].mxu0 %vm667_vm0, %v8548_v39 }
 0xf72   : > { %v3785_v61 = vpop.permute.xlu1 %3784 }
 0xf77   : > { %v3780_v46 = vpop.permute.xlu1 %3779 }
 0xfbc   : > { %v8554_v14 = vpop.f32.mrb[16].mxu0 }
 0xfbd   : > { %v6689_v44 = vpop.f32.mrb[17].mxu0 }
 0xfdc   : > { %v6708_v18 = vpop.f32.mrb[18].mxu0 }
 0xfdd   : > { %v3431_v5 = vpop.f32.mrb[19].mxu0  ;;  %v6216_v17 = vmul.f32 -1.442695, %v6708_v18 }
 0xfde   : > { %3448 = vrot.lane.b32.xlu0 %v3431_v5, %s7565_s17  ;;  %v6209_v47 = vmul.f32 -1.442695, %v3431_v5 }
 0xfe0   : > { %7338 = vpow2.f32 %v6209_v47 }
 0xfe2   : > { %3575 = vrot.lane.b32.xlu0 %v6708_v18, %s7565_s17 }
 0xfe6   : > { %3661 = vperm.xlu0 %7163, %v6215_v41  }
 0xfea   : > { %v7339_v29 = vpop.eup %7338 }
 0xfeb   : > { %v3443_v62 = vadd.f32 1.0, %v7339_v29 }
 0xfed   : > { %7340 = vrcp.f32 %v3443_v62 }
 0xfee   : > { %7342 = vpow2.f32 %v6216_v17 }
 0xff7   : > { %v7341_v33 = vpop.eup %7340 }
 0xff8   : > { %v7343_v28 = vpop.eup %7342  ;;  %v3446_v30 = vmul.f32 %v7341_v33, %v3431_v5  ;;  %v7486_v33 = vld [vmem:[%s7719_s22 + $0x8] sm:$0xff] }
 0xff9   : > { %v3570_v48 = vadd.f32 1.0, %v7343_v28 }
 0xffb   : > { %7344 = vrcp.f32 %v3570_v48 }
0x1005   : > { %v7345_v59 = vpop.eup %7344 }
0x1006   : > { %v3573_v6 = vmul.f32 %v7345_v59, %v6708_v18  ;;  %v3655_v40 = vsub.f32 1.0, %v7345_v59 }
0x1008   : > { %v3656_v38 = vmul.f32 %v6708_v18, %v3655_v40  ;;  %v7489_v40 = vld [vmem:[%s7719_s22 + $0x18] sm:$0xff] }
0x100a   : > { %v3657_v13 = vadd.f32 1.0, %v3656_v38 }
0x1050   : > { %v3449_v4 = vpop.permute.xlu0 %3448 }
0x1051   : > { %v3451_v19 = vmul.f32 %v3449_v4, %v3446_v30  ;;  %v7487_v4 = vld [vmem:[%s7815_s21 + $0x8] sm:$0xff] }
0x1053   : > { %6714 = vmatmul.mubr.msk.f32.vlgmr.msra.gmra.mrb[34].mxu1 %vm750_vm2, %v3451_v19  ;;  %v7488_v19 = vld [vmem:[%s7719_s22] sm:$0xff] }
0x1054   : > { %7015 = vmatpush3.bf16.msra.mxu1 %v7832_v54  ;;  %6720 = vmatprep.mubr.msk.f32.mxu1 %vm7563_vm4, %v7564_v55  ;;  %v3576_v11 = vpop.permute.xlu0 %3575 }
0x1055   : > { %v3578_v51 = vmul.f32 %v3576_v11, %v3573_v6 }
0x1057   : > { %6721 = vmatmul.mubr.msk.f32.vlgmr.msra.gmra.mrb[36].mxu1 %vm667_vm0, %v6214_v52 }
0x1065   : > { %v3662_v37 = vpop.permute.xlu0 %3661 }
0x1066   : > { %v3664_v45 = vmul.f32 %v3662_v37, %v3578_v51 }
0x1068   : > { %6723 = vmatprep.subr.mxu1 %v3664_v45 }
0x1069   : > { %6724 = vmatpush3.msra.mxu1 %v3664_v45 }
0x106a   : > { %6728 = vmatprep.subr.mxu1 %v8548_v39 }
0x1126   : > { %v8565_v27 = vpop.f32.mrb[34].mxu1 }
0x1127   : > { %v6715_v54 = vpop.f32.mrb[35].mxu1 }
0x112a   : > { %v3648_v22 = vpop.f32.mrb[36].mxu1 }
0x112b   : > { %v3652_v10 = vmul.f32 %v3648_v22, %v3573_v6  ;;  %v3653_v35 = vmul.f32 %v3648_v22, %v3576_v11  ;;  %v6722_v56 = vpop.f32.mrb[37].mxu1  ;;  %v7490_v22 = vld [vmem:[%s7719_s22 + $0x10] sm:$0xff]  ;;  %s7568_s22 = smov 16  }
0x112d   : > { %v3654_v1 = vmul.f32 %v7345_v59, %v3653_v35  ;;  %v3787_v9 = vmul.f32 %v3785_v61, %v3652_v10 }
0x112f   : > { %3789 = vrot.lane.b32.xlu1 %v3787_v9, %s7567_s16  ;;  %v3658_v42 = vmul.f32 %v3657_v13, %v3654_v1  ;;  %v7491_v13 = vld [vmem:[%s7758_s9 + $0x8] sm:$0xff] }
0x1131   : > { %v3782_v57 = vmul.f32 %v3780_v46, %v3658_v42 }
0x1158   : > { %3665 = vxpose.xlu1.b32.start.end [1/1] (short) (narrow) %v6214_v52, 16 }
0x11a1   : > { %v3790_v63 = vpop.permute.xlu1 %3789 }
0x11a2   : > { %v3792_v12 = vsel %vm750_vm2, %v3782_v57, %v3790_v63  ;;  %v7492_v63 = vld [vmem:[%s7758_s9] sm:$0xff] }
0x11a3   : > { %3793 = vxpose.xlu0.b32.start.end [1/1] (short) (narrow) %v3792_v12, 64 }
0x11cc   : > { %7164 = vset.pattern.permute.xlu0 %v7561_v49 }
0x11d8   : > { %v3681_v20 = vpop.trf.xlu1 }
0x11d9   : > { %6725 = vmatprep.mubr.msk.f32.mxu1 %vm1143_vm5, %v3681_v20 }
0x11dc   : > { %v3682_v3 = vpop.trf.xlu1 }
0x11dd   : > { %6726 = vmatmul.mubr.msk.f32.vlgmr.msra.gmra.mrb[38].mxu1 %vm1143_vm5, %v3682_v3 }
0x11de   : > { %6729 = vmatpush3.msra.mxu1 %v8548_v39 }
0x11df   : > { %7040 = vmatprep.subr.bf16.mxu1 %v7562_v50 }
0x1223   : > { %v3809_v60 = vpop.trf.xlu0 }
0x1224   : > { %6730 = vmatprep.mubr.msk.f32.mxu1 %vm1143_vm5, %v3809_v60 }
0x1227   : > { %v3810_v2 = vpop.trf.xlu0 }
0x1228   : > { %6731 = vmatmul.mubr.msk.f32.vlgmr.msra.gmra.mrb[40].mxu1 %vm1143_vm5, %v3810_v2 }
0x122b   : > { %v3811_v41 = vpop.trf.xlu0 }
0x122c   : > { %6733 = vmatprep.mubr.msk.f32.mxu1 %vm1143_vm5, %v3811_v41 }
0x122f   : > { %v3812_v44 = vpop.trf.xlu0 }
0x1230   : > { %6734 = vmatmul.mubr.msk.f32.gmra.mrb[42].mxu1 %vm1143_vm5, %v3812_v44 }
0x1233   : > { %v3813_v18 = vpop.trf.xlu0 }
0x1234   : > { %6736 = vmatprep.mubr.msk.f32.mxu1 %vm1143_vm5, %v3813_v18  ;;  %v7493_v18 = vld [vmem:[%s7758_s9 + $0x18] sm:$0xff] }
0x1237   : > { %v3814_v39 = vpop.trf.xlu0 }
0x1238   : > { %6737 = vmatmul.mubr.msk.f32.gmra.mrb[44].mxu1 %vm1143_vm5, %v3814_v39 }
0x123b   : > { %v3815_v5 = vpop.trf.xlu0 }
0x123c   : > { %6739 = vmatprep.mubr.msk.f32.mxu1 %vm1143_vm5, %v3815_v5  ;;  %v7494_v5 = vld [vmem:[%s7758_s9 + $0x10] sm:$0xff]  ;;  %s7571_s9 = smov 80  }
0x123f   : > { %v3816_v47 = vpop.trf.xlu0 }
0x1240   : > { %6740 = vmatmul.mubr.msk.f32.gmra.mrb[46].mxu1 %vm1143_vm5, %v3816_v47 }
0x1241   : > { %6765 = vmatprep.mubr.msk.f32.mxu1 %vm7563_vm4, %v7564_v55 }
0x12b0   : > { %v6727_v29 = vpop.f32.mrb[38].mxu1 }
0x12b1   : > { %v3769_v62 = vpop.f32.mrb[39].mxu1  ;;  %v8588_v48 = vadd.f32 %v7487_v4, %v6727_v29 }
0x12b3   : > { %v4085_v51 = vmul.f32 %v8588_v48, %v8588_v48 }
0x12b5   : > { %v4089_v10 = vsel %vm750_vm2, %v4085_v51, 0.0 }
0x12fb   : > { %v6732_v17 = vpop.f32.mrb[40].mxu1 }
0x12fc   : > { %v8585_v28 = vadd.f32 %v7486_v33, %v6732_v17  ;;  %v3915_v30 = vpop.f32.mrb[41].mxu1  ;;  %v7495_v17 = vld [vmem:[%s7815_s21] sm:$0xff] }
0x12fd   : > { %v8591_v52 = vadd.f32 %v7488_v19, %v3915_v30  ;;  %v8635_v33 = vadd.f32 %v7495_v17, %v3769_v62 }
0x12fe   : > { %v3965_v59 = vmul.f32 %v8585_v28, %v8585_v28 }
0x12ff   : > { %v3964_v11 = vmul.f32 %v8591_v52, %v8591_v52  ;;  %v4084_v19 = vmul.f32 %v8635_v33, %v8635_v33 }
0x1300   : > { %v3975_v6 = vsel %vm667_vm0, %v3965_v59, 0.0 }
0x1301   : > { %3976 = vadd.xlane.f32.xlu1 %v3975_v6  ;;  %v3972_v37 = vsel %vm667_vm0, %v3964_v11, 0.0  ;;  %v4086_v11 = vsel %vm750_vm2, %v4084_v19, 0.0  ;;  %v6228_v6 = vld [vmem:[%s7713_s19 + $0x28] sm:$0xff] }
0x1302   : > { %3973 = vadd.xlane.f32.xlu0 %v3972_v37  ;;  %6758 = vmatprep.mubr.msk.f32.mxu0 %vm667_vm0, %v6228_v6 }
0x1303   : > { %v6735_v45 = vpop.f32.mrb[42].mxu1 }
0x1304   : > { %v8602_v54 = vadd.f32 %v7489_v40, %v6735_v45  ;;  %v3925_v38 = vpop.f32.mrb[43].mxu1 }
0x1305   : > { %v8605_v61 = vadd.f32 %v7490_v22, %v3925_v38 }
0x1306   : > { %v3967_v35 = vmul.f32 %v8602_v54, %v8602_v54  ;;  %4090 = vadd.xlane.f32.xlu0 %v4089_v10 }
0x1307   : > { %v3966_v56 = vmul.f32 %v8605_v61, %v8605_v61 }
0x1308   : > { %v3981_v1 = vsel %vm667_vm0, %v3967_v35, 0.0 }
0x1309   : > { %3982 = vadd.xlane.f32.xlu1 %v3981_v1  ;;  %v3978_v57 = vsel %vm667_vm0, %v3966_v56, 0.0 }
0x130b   : > { %v6738_v9 = vpop.f32.mrb[44].mxu1 }
0x130c   : > { %v8614_v42 = vadd.f32 %v7491_v13, %v6738_v9  ;;  %v3935_v46 = vpop.f32.mrb[45].mxu1 }
0x130d   : > { %v8618_v12 = vadd.f32 %v7492_v63, %v3935_v46  ;;  %3979 = vadd.xlane.f32.xlu1 %v3978_v57 }
0x130e   : > { %v3969_v20 = vmul.f32 %v8614_v42, %v8614_v42 }
0x130f   : > { %v3968_v3 = vmul.f32 %v8618_v12, %v8618_v12 }
0x1310   : > { %v3987_v60 = vsel %vm667_vm0, %v3969_v20, 0.0 }
0x1311   : > { %3988 = vadd.xlane.f32.xlu1 %v3987_v60  ;;  %v3984_v44 = vsel %vm667_vm0, %v3968_v3, 0.0 }
0x1313   : > { %v6741_v2 = vpop.f32.mrb[46].mxu1 }
0x1314   : > { %v3945_v41 = vpop.f32.mrb[47].mxu1  ;;  %v8627_v39 = vadd.f32 %v7493_v18, %v6741_v2 }
0x1315   : > { %v8630_v47 = vadd.f32 %v7494_v5, %v3945_v41  ;;  %3985 = vadd.xlane.f32.xlu1 %v3984_v44 }
0x1316   : > { %v3971_v30 = vmul.f32 %v8627_v39, %v8627_v39 }
0x1317   : > { %v3970_v29 = vmul.f32 %v8630_v47, %v8630_v47 }
0x1318   : > { %v3993_v59 = vsel %vm667_vm0, %v3971_v30, 0.0 }
0x1319   : > { %v3990_v4 = vsel %vm667_vm0, %v3970_v29, 0.0 }
0x131a   : > { %3991 = vadd.xlane.f32.xlu1 %v3990_v4 }
0x131e   : > { %3994 = vadd.xlane.f32.xlu1 %v3993_v59 }
0x1322   : > { %4087 = vadd.xlane.f32.xlu1 %v4086_v11 }
0x138e   : > { %v3977_v62 = vpop.xlane.xlu1 %3976 }
0x138f   : > { %7346 = vrsqrt.f32 %v3977_v62  ;;  %v3974_v51 = vpop.xlane.xlu0 %3973  ;;  %vm4005_vm6 = vcmp.eq.f32.partialorder %v3977_v62, inf  ;;  %v4008_v10 = vand.u32 2147483648, %v3977_v62  ;;  %vm4007_vm7 = vcmp.eq.f32.partialorder %v3977_v62, 0.0 }
0x1390   : > { %7348 = vrsqrt.f32 %v3974_v51  ;;  %vm3998_vm8 = vcmp.eq.f32.partialorder %v3974_v51, inf  ;;  %v4001_v9 = vand.u32 2147483648, %v3974_v51  ;;  %vm4000_vm9 = vcmp.eq.f32.partialorder %v3974_v51, 0.0 }
0x1393   : > { %v8646_v56 = vpop.xlane.xlu0 %4090 }
0x1396   : > { %v3983_v37 = vpop.xlane.xlu1 %3982 }
0x1397   : > { %7350 = vrsqrt.f32 %v3983_v37  ;;  %vm4019_vm10 = vcmp.eq.f32.partialorder %v3983_v37, inf  ;;  %v4022_v44 = vand.u32 2147483648, %v3983_v37  ;;  %vm4021_vm11 = vcmp.eq.f32.partialorder %v3983_v37, 0.0 }
0x1399   : > { %v7347_v45 = vpop.eup %7346 }
0x139a   : > { %v7349_v40 = vpop.eup %7348  ;;  %v4004_v38 = vmul.f32 %v7347_v45, %v3977_v62  ;;  %v3980_v22 = vpop.xlane.xlu1 %3979 }
0x139b   : > { %v3997_v35 = vmul.f32 %v7349_v40, %v3974_v51  ;;  %7352 = vrsqrt.f32 %v3980_v22  ;;  %vm4012_vm12 = vcmp.eq.f32.partialorder %v3980_v22, inf  ;;  %v4015_v4 = vand.u32 2147483648, %v3980_v22 }
0x139c   : > { %v4006_v1 = vsel %vm4005_vm6, %v3977_v62, %v4004_v38  ;;  %7354 = vrsqrt.f32 %v8646_v56  ;;  %vm4014_vm13 = vcmp.eq.f32.partialorder %v3980_v22, 0.0 }
0x139d   : > { %v4009_v13 = vsel %vm4007_vm7, %v4008_v10, %v4006_v1  ;;  %v3999_v46 = vsel %vm3998_vm8, %v3974_v51, %v3997_v35  ;;  %vm4101_vm8 = vcmp.eq.f32.partialorder %v8646_v56, inf }
0x139e   : > { %v4053_v57 = vadd.f32 1e-05, %v4009_v13  ;;  %v4002_v63 = vsel %vm4000_vm9, %v4001_v9, %v3999_v46  ;;  %v3989_v20 = vpop.xlane.xlu1 %3988  ;;  %vm4103_vm9 = vcmp.eq.f32.partialorder %v8646_v56, 0.0 }
0x139f   : > { %v4052_v3 = vadd.f32 1e-05, %v4002_v63  ;;  %7356 = vrsqrt.f32 %v3989_v20  ;;  %vm4033_vm14 = vcmp.eq.f32.partialorder %v3989_v20, inf  ;;  %vm4035_vm15 = vcmp.eq.f32.partialorder %v3989_v20, 0.0 }
0x13a0   : > { %7358 = vrcp.f32 %v4053_v57 }
0x13a1   : > { %v7351_v60 = vpop.eup %7350  ;;  %7360 = vrcp.f32 %v4052_v3 }
0x13a2   : > { %v4018_v2 = vmul.f32 %v7351_v60, %v3983_v37  ;;  %v3986_v41 = vpop.xlane.xlu1 %3985 }
0x13a3   : > { %7362 = vrsqrt.f32 %v3986_v41  ;;  %vm4026_vm6 = vcmp.eq.f32.partialorder %v3986_v41, inf  ;;  %v4029_v60 = vand.u32 2147483648, %v3986_v41  ;;  %vm4028_vm7 = vcmp.eq.f32.partialorder %v3986_v41, 0.0 }
0x13a4   : > { %v4020_v18 = vsel %vm4019_vm10, %v3983_v37, %v4018_v2  ;;  %v4036_v37 = vand.u32 2147483648, %v3989_v20 }
0x13a5   : > { %v7353_v5 = vpop.eup %7352  ;;  %v4023_v29 = vsel %vm4021_vm11, %v4022_v44, %v4020_v18 }
0x13a6   : > { %v4055_v17 = vadd.f32 1e-05, %v4023_v29  ;;  %v4011_v30 = vmul.f32 %v7353_v5, %v3980_v22  ;;  %v7355_v59 = vpop.eup %7354 }
0x13a7   : > { %v3992_v19 = vpop.xlane.xlu1 %3991  ;;  %v4100_v46 = vmul.f32 %v7355_v59, %v8646_v56 }
0x13a8   : > { %7364 = vrcp.f32 %v4055_v17  ;;  %v4013_v11 = vsel %vm4012_vm12, %v3980_v22, %v4011_v30  ;;  %v4104_v30 = vand.u32 2147483648, %v8646_v56  ;;  %vm4040_vm10 = vcmp.eq.f32.partialorder %v3992_v19, inf }
0x13a9   : > { %v7357_v6 = vpop.eup %7356  ;;  %v4016_v62 = vsel %vm4014_vm13, %v4015_v4, %v4013_v11  ;;  %7366 = vrsqrt.f32 %v3992_v19  ;;  %v4102_v5 = vsel %vm4101_vm8, %v8646_v56, %v4100_v46  ;;  %v4043_v59 = vand.u32 2147483648, %v3992_v19 }
0x13aa   : > { %v7359_v51 = vpop.eup %7358  ;;  %v4054_v45 = vadd.f32 1e-05, %v4016_v62  ;;  %v4032_v40 = vmul.f32 %v7357_v6, %v3989_v20  ;;  %v4105_v4 = vsel %vm4103_vm9, %v4104_v30, %v4102_v5  ;;  %vm4042_vm11 = vcmp.eq.f32.partialorder %v3992_v19, 0.0 }
0x13ab   : > { %v7361_v38 = vpop.eup %7360  ;;  %v3995_v10 = vpop.xlane.xlu1 %3994  ;;  %v4069_v35 = vmul.f32 %v7359_v51, %v8585_v28 }
0x13ac   : > { %7368 = vrcp.f32 %v4054_v45  ;;  %v4034_v1 = vsel %vm4033_vm14, %v3989_v20, %v4032_v40  ;;  %v4068_v22 = vmul.f32 %v7361_v38, %v8591_v52  ;;  %v4107_v38 = vadd.f32 1e-05, %v4105_v4 }
0x13ad   : > { %v7363_v9 = vpop.eup %7362  ;;  %v4037_v13 = vsel %vm4035_vm15, %v4036_v37, %v4034_v1  ;;  %7370 = vrsqrt.f32 %v3995_v10  ;;  %v8653_v3 = vmul.f32 %v4069_v35, %v8033_v36  ;;  %vm4047_vm12 = vcmp.eq.f32.partialorder %v3995_v10, inf }
0x13ae   : > { %v4057_v57 = vadd.f32 1e-05, %v4037_v13  ;;  %v4025_v63 = vmul.f32 %v7363_v9, %v3986_v41  ;;  %v8656_v28 = vmul.f32 %v4068_v22, %v8017_v25  ;;  %v4050_v35 = vand.u32 2147483648, %v3995_v10 }
0x13af   : > { %v4088_v2 = vpop.xlane.xlu1 %4087  ;;  %vm4049_vm13 = vcmp.eq.f32.partialorder %v3995_v10, 0.0 }
0x13b0   : > { %7372 = vrcp.f32 %v4057_v57  ;;  %v4027_v20 = vsel %vm4026_vm6, %v3986_v41, %v4025_v63  ;;  %v7016_v52 = vpack.c.bf16 %v8653_v3, %v8656_v28  ;;  %vm4094_vm14 = vcmp.eq.f32.partialorder %v4088_v2, inf }
0x13b1   : > { %v4030_v44 = vsel %vm4028_vm7, %v4029_v60, %v4027_v20  ;;  %7374 = vrsqrt.f32 %v4088_v2  ;;  %v4097_v63 = vand.u32 2147483648, %v4088_v2  ;;  %vm4096_vm15 = vcmp.eq.f32.partialorder %v4088_v2, 0.0 }
0x13b2   : > { %v7365_v18 = vpop.eup %7364  ;;  %v4056_v29 = vadd.f32 1e-05, %v4030_v44  ;;  %7018 = vmatprep.subr.msk.bf16.mxu0 %vm7723_vm1, %v7016_v52 }
0x13b3   : > { %v7367_v17 = vpop.eup %7366  ;;  %7021 = vmatpush3.bf16.xpose.msk.msra.mxu0 %vm7723_vm1, %v7016_v52  ;;  %v4071_v11 = vmul.f32 %v7365_v18, %v8602_v54 }
0x13b4   : > { %7376 = vrcp.f32 %v4056_v29  ;;  %v4039_v41 = vmul.f32 %v7367_v17, %v3992_v19 }
0x13b5   : > { %v8674_v9 = vmul.f32 %v4071_v11, %v8073_v43 }
0x13b6   : > { %v7369_v6 = vpop.eup %7368  ;;  %v4041_v62 = vsel %vm4040_vm10, %v3992_v19, %v4039_v41 }
0x13b7   : > { %v7371_v51 = vpop.eup %7370  ;;  %v4044_v45 = vsel %vm4042_vm11, %v4043_v59, %v4041_v62  ;;  %v4070_v40 = vmul.f32 %v7369_v6, %v8605_v61 }
0x13b8   : > { %v4058_v37 = vadd.f32 1e-05, %v4044_v45  ;;  %v4046_v56 = vmul.f32 %v7371_v51, %v3995_v10  ;;  %v6246_v45 = vld [vmem:[%s7729_s23 + $0x28] sm:$0xff] }
0x13b9   : > { %v8671_v1 = vmul.f32 %v4070_v40, %v8097_v0  ;;  %4568 = vperm.xlu0 %7164, %v6246_v45  }
0x13ba   : > { %v7373_v13 = vpop.eup %7372  ;;  %7378 = vrcp.f32 %v4058_v37  ;;  %v4048_v54 = vsel %vm4047_vm12, %v3995_v10, %v4046_v56 }
0x13bb   : > { %v7375_v19 = vpop.eup %7374  ;;  %v4051_v22 = vsel %vm4049_vm13, %v4050_v35, %v4048_v54  ;;  %v7022_v61 = vpack.c.bf16 %v8674_v9, %v8671_v1  ;;  %7380 = vrcp.f32 %v4107_v38  ;;  %v4073_v60 = vmul.f32 %v7373_v13, %v8614_v42 }
0x13bc   : > { %v4059_v46 = vadd.f32 1e-05, %v4051_v22  ;;  %v4093_v57 = vmul.f32 %v7375_v19, %v4088_v2 }
0x13bd   : > { %7024 = vmatprep.subr.msk.bf16.mxu0 %vm7723_vm1, %v7022_v61  ;;  %v8688_v29 = vmul.f32 %v4073_v60, %v8138_v21 }
0x13be   : > { %v7377_v20 = vpop.eup %7376  ;;  %7382 = vrcp.f32 %v4059_v46  ;;  %v4095_v44 = vsel %vm4094_vm14, %v4088_v2, %v4093_v57  ;;  %7027 = vmatpush3.bf16.xpose.msk.msra.mxu0 %vm7723_vm1, %v7022_v61  ;;  %v6245_v61 = vld [vmem:[%s7850_s29 + $0x28] sm:$0xff] }
0x13bf   : > { %v4098_v10 = vsel %vm4096_vm15, %v4097_v63, %v4095_v44  ;;  %v4072_v52 = vmul.f32 %v7377_v20, %v8618_v12 }
0x13c0   : > { %v4106_v18 = vadd.f32 1e-05, %v4098_v10 }
0x13c1   : > { %v8685_v5 = vmul.f32 %v4072_v52, %v8140_v24 }
0x13c2   : > { %7384 = vrcp.f32 %v4106_v18 }
0x13c3   : > { %v7028_v42 = vpack.c.bf16 %v8688_v29, %v8685_v5 }
0x13c4   : > { %v7379_v17 = vpop.eup %7378 }
0x13c5   : > { %7030 = vmatprep.subr.msk.bf16.mxu0 %vm7723_vm1, %v7028_v42  ;;  %v7381_v2 = vpop.eup %7380  ;;  %v4074_v12 = vmul.f32 %v7379_v17, %v8630_v47 }
0x13c6   : > { %7033 = vmatpush3.bf16.xpose.msk.msra.mxu0 %vm7723_vm1, %v7028_v42  ;;  %v4111_v11 = vmul.f32 %v7381_v2, %v8588_v48 }
0x13c7   : > { %v8699_v4 = vmul.f32 %v4074_v12, %v8173_v31 }
0x13c8   : > { %v7383_v30 = vpop.eup %7382  ;;  %v8714_v47 = vmul.f32 %v4111_v11, %v8199_v23 }
0x13c9   : > { %v4075_v41 = vmul.f32 %v7383_v30, %v8627_v39 }
0x13cb   : > { %v8702_v59 = vmul.f32 %v4075_v41, %v8171_v8 }
0x13cc   : > { %v7385_v6 = vpop.eup %7384 }
0x13cd   : > { %v7034_v62 = vpack.c.bf16 %v8702_v59, %v8699_v4  ;;  %v4110_v51 = vmul.f32 %v7385_v6, %v8635_v33  ;;  %v8724_v33 = vld [vmem:[%s7802_s14 + $0x28] sm:$0xff] }
0x13cf   : > { %7036 = vmatprep.subr.msk.bf16.mxu0 %vm7723_vm1, %v7034_v62  ;;  %v8711_v39 = vmul.f32 %v4110_v51, %v8201_v7 }
0x13d0   : > { %7039 = vmatpush3.bf16.xpose.msk.msra.mxu0 %vm7723_vm1, %v7034_v62 }
0x13d1   : > { %v7041_v48 = vpack.c.bf16 %v8714_v47, %v8711_v39  ;;  %7071 = vmatprep.subr.bf16.mxu0 %v7562_v50 }
0x13d3   : > { %7043 = vmatpush3.bf16.xpose.msk.msra.mxu1 %vm7826_vm3, %v7041_v48 }
0x13d4   : > { %7044 = vmatprep.subr.bf16.mxu1 %v7562_v50 }
0x13d7   : > { %6759 = vmatmul.mubr.msk.f32.vlgmr.msra.gmra.mrb[20].mxu0 %vm667_vm0, %v8724_v33 }
0x13d8   : > { %6817 = vmatprep.mubr.msk.f32.mxu0 %vm7563_vm4, %v7564_v55 }
0x1438   : > { %v4569_v12 = vpop.permute.xlu0 %4568 }
0x14aa   : > { %v6760_v40 = vpop.f32.mrb[20].mxu0 }
0x14ab   : > { %v4212_v38 = vpop.f32.mrb[21].mxu0  ;;  %v6247_v46 = vmul.f32 -1.442695, %v6760_v40 }
0x14ac   : > { %4229 = vrot.lane.b32.xlu1 %v4212_v38, %s7565_s17  ;;  %v6240_v37 = vmul.f32 -1.442695, %v4212_v38 }
0x14ae   : > { %7386 = vpow2.f32 %v6240_v37 }
0x14b0   : > { %4563 = vperm.xlu1 %7162, %v6246_v45  }
0x14b4   : > { %4359 = vrot.lane.b32.xlu1 %v6760_v40, %s7565_s17 }
0x14b5   : > { %7165 = vset.pattern.permute.xlu1 %v7566_v58 }
0x14b8   : > { %v7387_v56 = vpop.eup %7386 }
0x14b9   : > { %v4224_v35 = vadd.f32 1.0, %v7387_v56 }
0x14bb   : > { %7388 = vrcp.f32 %v4224_v35 }
0x14bc   : > { %7390 = vpow2.f32 %v6247_v46 }
0x14c5   : > { %v7389_v13 = vpop.eup %7388 }
0x14c6   : > { %v4227_v54 = vmul.f32 %v7389_v13, %v4212_v38  ;;  %v7391_v57 = vpop.eup %7390 }
0x14c7   : > { %v4354_v63 = vadd.f32 1.0, %v7391_v57 }
0x14c9   : > { %7392 = vrcp.f32 %v4354_v63 }
0x14d3   : > { %v7393_v60 = vpop.eup %7392 }
0x14d4   : > { %v4439_v44 = vsub.f32 1.0, %v7393_v60  ;;  %v4357_v42 = vmul.f32 %v7393_v60, %v6760_v40 }
0x14d6   : > { %v4440_v18 = vmul.f32 %v6760_v40, %v4439_v44 }
0x14d8   : > { %v4441_v6 = vadd.f32 1.0, %v4440_v18 }
0x151e   : > { %v4230_v19 = vpop.permute.xlu1 %4229 }
0x151f   : > { %v4232_v22 = vmul.f32 %v4230_v19, %v4227_v54 }
0x1521   : > { %6766 = vmatmul.mubr.msk.f32.vlgmr.msra.gmra.mrb[48].mxu1 %vm750_vm2, %v4232_v22 }
0x1522   : > { %7046 = vmatpush3.bf16.msra.mxu1 %v7041_v48  ;;  %6772 = vmatprep.mubr.msk.f32.mxu1 %vm7563_vm4, %v7564_v55 }
0x1525   : > { %6773 = vmatmul.mubr.msk.f32.vlgmr.msra.gmra.mrb[50].mxu1 %vm667_vm0, %v6245_v61 }
0x152f   : > { %v4564_v20 = vpop.permute.xlu1 %4563 }
0x1533   : > { %v4360_v17 = vpop.permute.xlu1 %4359 }
0x1534   : > { %v4362_v56 = vmul.f32 %v4360_v17, %v4357_v42 }
0x15f4   : > { %v8740_v10 = vpop.f32.mrb[48].mxu1 }
0x15f5   : > { %v6767_v52 = vpop.f32.mrb[49].mxu1 }
0x15f8   : > { %v4432_v2 = vpop.f32.mrb[50].mxu1 }
0x15f9   : > { %v4436_v30 = vmul.f32 %v4432_v2, %v4357_v42  ;;  %v4437_v41 = vmul.f32 %v4432_v2, %v4360_v17  ;;  %v6774_v11 = vpop.f32.mrb[51].mxu1 }
0x15fb   : > { %v4438_v62 = vmul.f32 %v7393_v60, %v4437_v41  ;;  %v4571_v51 = vmul.f32 %v4569_v12, %v4436_v30 }
0x15fd   : > { %v4442_v48 = vmul.f32 %v4441_v6, %v4438_v62  ;;  %4573 = vrot.lane.b32.xlu1 %v4571_v51, %s7567_s16 }
0x15ff   : > { %v4566_v38 = vmul.f32 %v4564_v20, %v4442_v48 }
0x1601   : > { %4445 = vperm.xlu1 %7165, %v6246_v45  }
0x162a   : > { %4449 = vxpose.xlu1.b32.start.end [1/1] (short) (narrow) %v6245_v61, 16 }
0x1648   : > { %7166 = vset.pattern.permute.xlu1 %v7561_v49 }
0x166f   : > { %v4574_v37 = vpop.permute.xlu1 %4573 }
0x1670   : > { %v4576_v40 = vsel %vm750_vm2, %v4566_v38, %v4574_v37 }
0x1671   : > { %4577 = vxpose.xlu0.b32.start.end [1/1] (short) (narrow) %v4576_v40, 64 }
0x1680   : > { %v4446_v35 = vpop.permute.xlu1 %4445 }
0x1681   : > { %v4448_v13 = vmul.f32 %v4446_v35, %v4362_v56 }
0x1683   : > { %6775 = vmatprep.subr.mxu1 %v4448_v13 }
0x1684   : > { %6776 = vmatpush3.msra.mxu1 %v4448_v13 }
0x1685   : > { %6780 = vmatprep.subr.mxu1 %v8724_v33 }
0x169a   : > { %7168 = vset.pattern.permute.xlu0 %v7566_v58 }
0x16aa   : > { %v4465_v54 = vpop.trf.xlu1 }
0x16ab   : > { %6777 = vmatprep.mubr.msk.f32.mxu1 %vm1143_vm5, %v4465_v54 }
0x16ae   : > { %v4466_v45 = vpop.trf.xlu1 }
0x16af   : > { %6778 = vmatmul.mubr.msk.f32.vlgmr.msra.gmra.mrb[52].mxu1 %vm1143_vm5, %v4466_v45 }
0x16b0   : > { %6781 = vmatpush3.msra.mxu1 %v8724_v33 }
0x16f1   : > { %v4593_v19 = vpop.trf.xlu0 }
0x16f2   : > { %6782 = vmatprep.mubr.msk.f32.mxu1 %vm1143_vm5, %v4593_v19 }
0x16f5   : > { %v4594_v22 = vpop.trf.xlu0 }
0x16f6   : > { %6783 = vmatmul.mubr.msk.f32.vlgmr.msra.gmra.mrb[54].mxu1 %vm1143_vm5, %v4594_v22 }
0x16f9   : > { %v4595_v61 = vpop.trf.xlu0 }
0x16fa   : > { %6785 = vmatprep.mubr.msk.f32.mxu1 %vm1143_vm5, %v4595_v61 }
0x16fd   : > { %v4596_v46 = vpop.trf.xlu0 }
0x16fe   : > { %6786 = vmatmul.mubr.msk.f32.gmra.mrb[56].mxu1 %vm1143_vm5, %v4596_v46 }
0x1701   : > { %v4597_v58 = vpop.trf.xlu0 }
0x1702   : > { %6788 = vmatprep.mubr.msk.f32.mxu1 %vm1143_vm5, %v4597_v58 }
0x1705   : > { %v4598_v57 = vpop.trf.xlu0 }
0x1706   : > { %6789 = vmatmul.mubr.msk.f32.gmra.mrb[58].mxu1 %vm1143_vm5, %v4598_v57 }
0x1709   : > { %v4599_v63 = vpop.trf.xlu0 }
0x170a   : > { %6791 = vmatprep.mubr.msk.f32.mxu1 %vm1143_vm5, %v4599_v63 }
0x170d   : > { %v4600_v33 = vpop.trf.xlu0 }
0x170e   : > { %6792 = vmatmul.mubr.msk.f32.gmra.mrb[60].mxu1 %vm1143_vm5, %v4600_v33  ;;  %v6259_v33 = vld [vmem:[%s7713_s19 + $0x30] sm:$0xff] }
0x170f   : > { %6810 = vmatprep.mubr.msk.f32.mxu1 %vm667_vm0, %v6259_v33 }
0x1782   : > { %v6779_v60 = vpop.f32.mrb[52].mxu1 }
0x1783   : > { %v4553_v20 = vpop.f32.mrb[53].mxu1 }
0x1784   : > { %v8803_v22 = vadd.f32 %v4553_v20, %v8711_v39 }
0x17c9   : > { %v6784_v44 = vpop.f32.mrb[54].mxu1 }
0x17ca   : > { %v8759_v52 = vadd.f32 %v6784_v44, %v8653_v3  ;;  %v4699_v18 = vpop.f32.mrb[55].mxu1 }
0x17cb   : > { %v8762_v42 = vadd.f32 %v4699_v18, %v8656_v28 }
0x17cc   : > { %v4749_v17 = vmul.f32 %v8759_v52, %v8759_v52 }
0x17cd   : > { %v4748_v2 = vmul.f32 %v8762_v42, %v8762_v42 }
0x17ce   : > { %v4759_v12 = vsel %vm667_vm0, %v4749_v17, 0.0 }
0x17cf   : > { %4760 = vadd.xlane.f32.xlu0 %v4759_v12  ;;  %v4756_v30 = vsel %vm667_vm0, %v4748_v2, 0.0 }
0x17d0   : > { %4757 = vadd.xlane.f32.xlu1 %v4756_v30 }
0x17d1   : > { %v6787_v41 = vpop.f32.mrb[56].mxu1 }
0x17d2   : > { %v8771_v3 = vadd.f32 %v6787_v41, %v8674_v9  ;;  %v4709_v11 = vpop.f32.mrb[57].mxu1 }
0x17d3   : > { %v8774_v28 = vadd.f32 %v4709_v11, %v8671_v1 }
0x17d4   : > { %v4751_v6 = vmul.f32 %v8771_v3, %v8771_v3 }
0x17d5   : > { %v4750_v62 = vmul.f32 %v8774_v28, %v8774_v28 }
0x17d6   : > { %v4765_v51 = vsel %vm667_vm0, %v4751_v6, 0.0 }
0x17d7   : > { %4766 = vadd.xlane.f32.xlu1 %v4765_v51  ;;  %v4762_v9 = vsel %vm667_vm0, %v4750_v62, 0.0 }
0x17d9   : > { %v6790_v48 = vpop.f32.mrb[58].mxu1 }
0x17da   : > { %v8782_v38 = vadd.f32 %v6790_v48, %v8688_v29  ;;  %v4719_v37 = vpop.f32.mrb[59].mxu1 }
0x17db   : > { %v8786_v40 = vadd.f32 %v4719_v37, %v8685_v5  ;;  %4763 = vadd.xlane.f32.xlu1 %v4762_v9 }
0x17dc   : > { %v4753_v1 = vmul.f32 %v8782_v38, %v8782_v38 }
0x17dd   : > { %v4752_v56 = vmul.f32 %v8786_v40, %v8786_v40 }
0x17de   : > { %v4771_v35 = vsel %vm667_vm0, %v4753_v1, 0.0 }
0x17df   : > { %4772 = vadd.xlane.f32.xlu1 %v4771_v35  ;;  %v4768_v29 = vsel %vm667_vm0, %v4752_v56, 0.0 }
0x17e1   : > { %v6793_v13 = vpop.f32.mrb[60].mxu1 }
0x17e2   : > { %v4729_v54 = vpop.f32.mrb[61].mxu1  ;;  %v8795_v45 = vadd.f32 %v6793_v13, %v8702_v59  ;;  %v8809_v59 = vadd.f32 %v6779_v60, %v8714_v47 }
0x17e3   : > { %v8798_v5 = vadd.f32 %v4729_v54, %v8699_v4  ;;  %4769 = vadd.xlane.f32.xlu1 %v4768_v29  ;;  %v4868_v4 = vmul.f32 %v8803_v22, %v8803_v22 }
0x17e4   : > { %v4755_v61 = vmul.f32 %v8795_v45, %v8795_v45  ;;  %v4869_v57 = vmul.f32 %v8809_v59, %v8809_v59 }
0x17e5   : > { %v4754_v19 = vmul.f32 %v8798_v5, %v8798_v5  ;;  %v4870_v39 = vsel %vm750_vm2, %v4868_v4, 0.0 }
0x17e6   : > { %v4777_v58 = vsel %vm667_vm0, %v4755_v61, 0.0  ;;  %v4873_v63 = vsel %vm750_vm2, %v4869_v57, 0.0 }
0x17e7   : > { %v4774_v46 = vsel %vm667_vm0, %v4754_v19, 0.0 }
0x17e8   : > { %4775 = vadd.xlane.f32.xlu1 %v4774_v46 }
0x17ec   : > { %4778 = vadd.xlane.f32.xlu1 %v4777_v58 }
0x17f0   : > { %4871 = vadd.xlane.f32.xlu1 %v4870_v39 }
0x17f4   : > { %4874 = vadd.xlane.f32.xlu1 %v4873_v63 }
0x185c   : > { %v4761_v47 = vpop.xlane.xlu0 %4760 }
0x185d   : > { %7394 = vrsqrt.f32 %v4761_v47  ;;  %v4758_v60 = vpop.xlane.xlu1 %4757  ;;  %vm4789_vm6 = vcmp.eq.f32.partialorder %v4761_v47, inf  ;;  %v4792_v12 = vand.u32 2147483648, %v4761_v47  ;;  %vm4791_vm7 = vcmp.eq.f32.partialorder %v4761_v47, 0.0 }
0x185e   : > { %7396 = vrsqrt.f32 %v4758_v60  ;;  %vm4782_vm8 = vcmp.eq.f32.partialorder %v4758_v60, inf  ;;  %v4785_v11 = vand.u32 2147483648, %v4758_v60  ;;  %vm4784_vm9 = vcmp.eq.f32.partialorder %v4758_v60, 0.0 }
0x1864   : > { %v4767_v20 = vpop.xlane.xlu1 %4766 }
0x1865   : > { %7398 = vrsqrt.f32 %v4767_v20  ;;  %vm4803_vm10 = vcmp.eq.f32.partialorder %v4767_v20, inf  ;;  %v4806_v13 = vand.u32 2147483648, %v4767_v20  ;;  %vm4805_vm11 = vcmp.eq.f32.partialorder %v4767_v20, 0.0 }
0x1867   : > { %v7395_v44 = vpop.eup %7394 }
0x1868   : > { %v7397_v18 = vpop.eup %7396  ;;  %v4788_v17 = vmul.f32 %v7395_v44, %v4761_v47  ;;  %v4764_v2 = vpop.xlane.xlu1 %4763 }
0x1869   : > { %v4781_v30 = vmul.f32 %v7397_v18, %v4758_v60  ;;  %7400 = vrsqrt.f32 %v4764_v2  ;;  %vm4796_vm12 = vcmp.eq.f32.partialorder %v4764_v2, inf  ;;  %v4799_v4 = vand.u32 2147483648, %v4764_v2 }
0x186a   : > { %v4790_v41 = vsel %vm4789_vm6, %v4761_v47, %v4788_v17  ;;  %vm4798_vm13 = vcmp.eq.f32.partialorder %v4764_v2, 0.0 }
0x186b   : > { %v4793_v6 = vsel %vm4791_vm7, %v4792_v12, %v4790_v41  ;;  %v4783_v62 = vsel %vm4782_vm8, %v4758_v60, %v4781_v30 }
0x186c   : > { %v4837_v51 = vadd.f32 1e-05, %v4793_v6  ;;  %v4786_v48 = vsel %vm4784_vm9, %v4785_v11, %v4783_v62  ;;  %v4773_v37 = vpop.xlane.xlu1 %4772 }
0x186d   : > { %v4836_v9 = vadd.f32 1e-05, %v4786_v48  ;;  %7402 = vrsqrt.f32 %v4773_v37  ;;  %vm4817_vm14 = vcmp.eq.f32.partialorder %v4773_v37, inf  ;;  %v4820_v18 = vand.u32 2147483648, %v4773_v37 }
0x186e   : > { %7404 = vrcp.f32 %v4837_v51  ;;  %vm4819_vm15 = vcmp.eq.f32.partialorder %v4773_v37, 0.0 }
0x186f   : > { %v7399_v1 = vpop.eup %7398  ;;  %7406 = vrcp.f32 %v4836_v9 }
0x1870   : > { %v4802_v56 = vmul.f32 %v7399_v1, %v4767_v20  ;;  %v4770_v35 = vpop.xlane.xlu1 %4769 }
0x1871   : > { %7408 = vrsqrt.f32 %v4770_v35  ;;  %vm4810_vm6 = vcmp.eq.f32.partialorder %v4770_v35, inf  ;;  %v4813_v51 = vand.u32 2147483648, %v4770_v35  ;;  %vm4812_vm7 = vcmp.eq.f32.partialorder %v4770_v35, 0.0 }
0x1872   : > { %v4804_v54 = vsel %vm4803_vm10, %v4767_v20, %v4802_v56 }
0x1873   : > { %v7401_v29 = vpop.eup %7400  ;;  %v4807_v19 = vsel %vm4805_vm11, %v4806_v13, %v4804_v54 }
0x1874   : > { %v4839_v61 = vadd.f32 1e-05, %v4807_v19  ;;  %v4795_v46 = vmul.f32 %v7401_v29, %v4764_v2 }
0x1875   : > { %v4776_v58 = vpop.xlane.xlu1 %4775 }
0x1876   : > { %7410 = vrcp.f32 %v4839_v61  ;;  %v4797_v57 = vsel %vm4796_vm12, %v4764_v2, %v4795_v46  ;;  %vm4824_vm8 = vcmp.eq.f32.partialorder %v4776_v58, inf  ;;  %v4827_v19 = vand.u32 2147483648, %v4776_v58 }
0x1877   : > { %v7403_v39 = vpop.eup %7402  ;;  %v4800_v63 = vsel %vm4798_vm13, %v4799_v4, %v4797_v57  ;;  %7412 = vrsqrt.f32 %v4776_v58  ;;  %vm4826_vm9 = vcmp.eq.f32.partialorder %v4776_v58, 0.0 }
0x1878   : > { %v7405_v33 = vpop.eup %7404  ;;  %v4838_v47 = vadd.f32 1e-05, %v4800_v63  ;;  %v4816_v60 = vmul.f32 %v7403_v39, %v4773_v37 }
0x1879   : > { %v7407_v44 = vpop.eup %7406  ;;  %v4779_v20 = vpop.xlane.xlu1 %4778  ;;  %v4853_v17 = vmul.f32 %v7405_v33, %v8759_v52 }
0x187a   : > { %7414 = vrcp.f32 %v4838_v47  ;;  %v4818_v12 = vsel %vm4817_vm14, %v4773_v37, %v4816_v60  ;;  %v4852_v2 = vmul.f32 %v7407_v44, %v8762_v42  ;;  %vm4831_vm10 = vcmp.eq.f32.partialorder %v4779_v20, inf }
0x187b   : > { %v7409_v30 = vpop.eup %7408  ;;  %v4821_v41 = vsel %vm4819_vm15, %v4820_v18, %v4818_v12  ;;  %7416 = vrsqrt.f32 %v4779_v20  ;;  %v8823_v62 = vmul.f32 %v4853_v17, %v8033_v36  ;;  %v4834_v47 = vand.u32 2147483648, %v4779_v20 }
0x187c   : > { %v4841_v11 = vadd.f32 1e-05, %v4821_v41  ;;  %v4809_v6 = vmul.f32 %v7409_v30, %v4770_v35  ;;  %v8826_v9 = vmul.f32 %v4852_v2, %v8017_v25  ;;  %vm4833_vm11 = vcmp.eq.f32.partialorder %v4779_v20, 0.0 }
0x187d   : > { %v4872_v48 = vpop.xlane.xlu1 %4871 }
0x187e   : > { %7418 = vrcp.f32 %v4841_v11  ;;  %v4811_v52 = vsel %vm4810_vm6, %v4770_v35, %v4809_v6  ;;  %v7047_v1 = vpack.c.bf16 %v8823_v62, %v8826_v9  ;;  %vm4878_vm12 = vcmp.eq.f32.partialorder %v4872_v48, inf }
0x187f   : > { %v4814_v37 = vsel %vm4812_vm7, %v4813_v51, %v4811_v52  ;;  %7420 = vrsqrt.f32 %v4872_v48  ;;  %v4881_v41 = vand.u32 2147483648, %v4872_v48  ;;  %vm4880_vm13 = vcmp.eq.f32.partialorder %v4872_v48, 0.0 }
0x1880   : > { %v7411_v42 = vpop.eup %7410  ;;  %v4840_v56 = vadd.f32 1e-05, %v4814_v37  ;;  %7049 = vmatprep.subr.msk.bf16.mxu1 %vm7723_vm1, %v7047_v1 }
0x1881   : > { %v7413_v13 = vpop.eup %7412  ;;  %v4875_v54 = vpop.xlane.xlu1 %4874  ;;  %7052 = vmatpush3.bf16.xpose.msk.msra.mxu1 %vm7723_vm1, %v7047_v1  ;;  %v4855_v35 = vmul.f32 %v7411_v42, %v8771_v3 }
0x1882   : > { %7422 = vrcp.f32 %v4840_v56  ;;  %v4823_v29 = vmul.f32 %v7413_v13, %v4776_v58  ;;  %vm4885_vm14 = vcmp.eq.f32.partialorder %v4875_v54, inf  ;;  %v4888_v42 = vand.u32 2147483648, %v4875_v54 }
0x1883   : > { %7424 = vrsqrt.f32 %v4875_v54  ;;  %v8840_v44 = vmul.f32 %v4855_v35, %v8073_v43  ;;  %vm4887_vm15 = vcmp.eq.f32.partialorder %v4875_v54, 0.0 }
0x1884   : > { %v7415_v61 = vpop.eup %7414  ;;  %v4825_v46 = vsel %vm4824_vm8, %v4776_v58, %v4823_v29 }
0x1885   : > { %v7417_v4 = vpop.eup %7416  ;;  %v4828_v57 = vsel %vm4826_vm9, %v4827_v19, %v4825_v46  ;;  %v4854_v39 = vmul.f32 %v7415_v61, %v8774_v28 }
0x1886   : > { %v4842_v63 = vadd.f32 1e-05, %v4828_v57  ;;  %v4830_v33 = vmul.f32 %v7417_v4, %v4779_v20 }
0x1887   : > { %v8837_v60 = vmul.f32 %v4854_v39, %v8097_v0 }
0x1888   : > { %v7419_v18 = vpop.eup %7418  ;;  %7426 = vrcp.f32 %v4842_v63  ;;  %v4832_v3 = vsel %vm4831_vm10, %v4779_v20, %v4830_v33 }
0x1889   : > { %v7421_v17 = vpop.eup %7420  ;;  %v4835_v58 = vsel %vm4833_vm11, %v4834_v47, %v4832_v3  ;;  %v7053_v12 = vpack.c.bf16 %v8840_v44, %v8837_v60  ;;  %v4857_v2 = vmul.f32 %v7419_v18, %v8782_v38  ;;  %v8886_v18 = vld [vmem:[%s7802_s14 + $0x30] sm:$0xff]  ;;  %s7572_s14 = smov 112  }
0x188a   : > { %v4843_v28 = vadd.f32 1e-05, %v4835_v58  ;;  %v4877_v30 = vmul.f32 %v7421_v17, %v4872_v48 }
0x188b   : > { %7055 = vmatprep.subr.msk.bf16.mxu1 %vm7723_vm1, %v7053_v12  ;;  %v8854_v38 = vmul.f32 %v4857_v2, %v8138_v21 }
0x188c   : > { %v7423_v11 = vpop.eup %7422  ;;  %7428 = vrcp.f32 %v4843_v28  ;;  %v4879_v6 = vsel %vm4878_vm12, %v4872_v48, %v4877_v30  ;;  %7058 = vmatpush3.bf16.xpose.msk.msra.mxu1 %vm7723_vm1, %v7053_v12 }
0x188d   : > { %v7425_v20 = vpop.eup %7424  ;;  %v4882_v51 = vsel %vm4880_vm13, %v4881_v41, %v4879_v6  ;;  %v4856_v52 = vmul.f32 %v7423_v11, %v8786_v40 }
0x188e   : > { %v4890_v37 = vadd.f32 1e-05, %v4882_v51  ;;  %v4884_v1 = vmul.f32 %v7425_v20, %v4875_v54  ;;  %v6276_v51 = vld [vmem:[%s7850_s29 + $0x30] sm:$0xff]  ;;  %s9220_s29 = scalar_lea.hbm %s9274_s7, %s6306_s20 }
0x188f   : > { %v8851_v56 = vmul.f32 %v4856_v52, %v8140_v24 }
0x1890   : > { %7430 = vrcp.f32 %v4890_v37  ;;  %v4886_v13 = vsel %vm4885_vm14, %v4875_v54, %v4884_v1 }
0x1891   : > { %v4889_v48 = vsel %vm4887_vm15, %v4888_v42, %v4886_v13  ;;  %v7059_v29 = vpack.c.bf16 %v8854_v38, %v8851_v56 }
0x1892   : > { %v7427_v19 = vpop.eup %7426  ;;  %v4891_v35 = vadd.f32 1e-05, %v4889_v48 }
0x1893   : > { %7061 = vmatprep.subr.msk.bf16.mxu1 %vm7723_vm1, %v7059_v29  ;;  %v4858_v40 = vmul.f32 %v7427_v19, %v8798_v5 }
0x1894   : > { %7432 = vrcp.f32 %v4891_v35  ;;  %7064 = vmatpush3.bf16.xpose.msk.msra.mxu1 %vm7723_vm1, %v7059_v29 }
0x1895   : > { %v8865_v54 = vmul.f32 %v4858_v40, %v8173_v31 }
0x1896   : > { %v7429_v61 = vpop.eup %7428 }
0x1897   : > { %v4859_v46 = vmul.f32 %v7429_v61, %v8795_v45 }
0x1899   : > { %v8868_v4 = vmul.f32 %v4859_v46, %v8171_v8 }
0x189a   : > { %v7431_v57 = vpop.eup %7430 }
0x189b   : > { %v7065_v39 = vpack.c.bf16 %v8868_v4, %v8865_v54  ;;  %v4894_v63 = vmul.f32 %v7431_v57, %v8803_v22  ;;  %v6277_v22 = vld [vmem:[%s7729_s23 + $0x30] sm:$0xff]  ;;  %s7569_s23 = smov 64  }
0x189c   : > { %5352 = vperm.xlu1 %7166, %v6277_v22  }
0x189d   : > { %7067 = vmatprep.subr.msk.bf16.mxu1 %vm7723_vm1, %v7065_v39  ;;  %v8880_v33 = vmul.f32 %v4894_v63, %v8201_v7 }
0x189e   : > { %v7433_v5 = vpop.eup %7432  ;;  %7070 = vmatpush3.bf16.xpose.msk.msra.mxu1 %vm7723_vm1, %v7065_v39 }
0x189f   : > { %v4895_v45 = vmul.f32 %v7433_v5, %v8809_v59  ;;  %7094 = vmatprep.subr.bf16.mxu1 %v7562_v50 }
0x18a0   : > { %7167 = vset.pattern.permute.xlu1 %v7560_v32 }
0x18a1   : > { %v8883_v47 = vmul.f32 %v4895_v45, %v8199_v23  ;;  %5347 = vperm.xlu1 %7167, %v6277_v22  }
0x18a3   : > { %v7072_v3 = vpack.c.bf16 %v8883_v47, %v8880_v33 }
0x18a5   : > { %6811 = vmatmul.mubr.msk.f32.vlgmr.msra.gmra.mrb[62].mxu1 %vm667_vm0, %v8886_v18  ;;  %7074 = vmatpush3.bf16.xpose.msk.msra.mxu0 %vm7826_vm3, %v7072_v3 }
0x18a6   : > { %7075 = vmatprep.subr.bf16.mxu0 %v7562_v50  ;;  %6869 = vmatprep.mubr.msk.f32.mxu1 %vm7563_vm4, %v7564_v55 }
0x191b   : > { %v5353_v46 = vpop.permute.xlu1 %5352 }
0x1978   : > { %v6812_v59 = vpop.f32.mrb[62].mxu1 }
0x1979   : > { %v4996_v17 = vpop.f32.mrb[63].mxu1  ;;  %v6278_v30 = vmul.f32 -1.442695, %v6812_v59 }
0x197a   : > { %5013 = vrot.lane.b32.xlu0 %v4996_v17, %s7565_s17  ;;  %v6271_v58 = vmul.f32 -1.442695, %v4996_v17 }
0x197c   : > { %7434 = vpow2.f32 %v6271_v58 }
0x197e   : > { %5143 = vrot.lane.b32.xlu0 %v6812_v59, %s7565_s17 }
0x1982   : > { %5229 = vperm.xlu0 %7168, %v6277_v22  }
0x1986   : > { %v7435_v12 = vpop.eup %7434 }
0x1987   : > { %v5008_v28 = vadd.f32 1.0, %v7435_v12 }
0x1989   : > { %7436 = vrcp.f32 %v5008_v28 }
0x198a   : > { %7438 = vpow2.f32 %v6278_v30 }
0x1993   : > { %v7437_v41 = vpop.eup %7436 }
0x1994   : > { %v7439_v2 = vpop.eup %7438  ;;  %v5011_v11 = vmul.f32 %v7437_v41, %v4996_v17  ;;  %v5348_v17 = vpop.permute.xlu1 %5347 }
0x1995   : > { %v5138_v6 = vadd.f32 1.0, %v7439_v2 }
0x1997   : > { %7440 = vrcp.f32 %v5138_v6 }
0x19a1   : > { %v7441_v52 = vpop.eup %7440 }
0x19a2   : > { %v5141_v1 = vmul.f32 %v7441_v52, %v6812_v59  ;;  %v5223_v29 = vsub.f32 1.0, %v7441_v52 }
0x19a4   : > { %v5224_v40 = vmul.f32 %v6812_v59, %v5223_v29 }
0x19ec   : > { %v5014_v32 = vpop.permute.xlu0 %5013 }
0x19ed   : > { %v5016_v20 = vmul.f32 %v5014_v32, %v5011_v11 }
0x19ef   : > { %6818 = vmatmul.mubr.msk.f32.vlgmr.msra.gmra.mrb[22].mxu0 %vm750_vm2, %v5016_v20 }
0x19f0   : > { %7077 = vmatpush3.bf16.msra.mxu0 %v7072_v3  ;;  %6824 = vmatprep.mubr.msk.f32.mxu0 %vm7563_vm4, %v7564_v55  ;;  %v5144_v37 = vpop.permute.xlu0 %5143  ;;  %v5225_v3 = vadd.f32 1.0, %v5224_v40 }
0x19f1   : > { %v5146_v42 = vmul.f32 %v5144_v37, %v5141_v1 }
0x19f3   : > { %6825 = vmatmul.mubr.msk.f32.vlgmr.msra.gmra.mrb[24].mxu0 %vm667_vm0, %v6276_v51 }
0x1a01   : > { %v5230_v13 = vpop.permute.xlu0 %5229 }
0x1a02   : > { %v5232_v48 = vmul.f32 %v5230_v13, %v5146_v42 }
0x1a04   : > { %6827 = vmatprep.subr.mxu0 %v5232_v48 }
0x1a05   : > { %6828 = vmatpush3.msra.mxu0 %v5232_v48 }
0x1a06   : > { %6832 = vmatprep.subr.mxu0 %v8886_v18 }
0x1ac2   : > { %v8907_v19 = vpop.f32.mrb[22].mxu0 }
0x1ac3   : > { %v6819_v35 = vpop.f32.mrb[23].mxu0 }
0x1ac6   : > { %v5216_v61 = vpop.f32.mrb[24].mxu0 }
0x1ac7   : > { %v5220_v57 = vmul.f32 %v5216_v61, %v5141_v1  ;;  %v5221_v39 = vmul.f32 %v5216_v61, %v5144_v37  ;;  %v6826_v63 = vpop.f32.mrb[25].mxu0 }
0x1ac9   : > { %v5222_v5 = vmul.f32 %v7441_v52, %v5221_v39  ;;  %v5355_v45 = vmul.f32 %v5353_v46, %v5220_v57 }
0x1acb   : > { %5357 = vrot.lane.b32.xlu1 %v5355_v45, %s7567_s16  ;;  %v5226_v22 = vmul.f32 %v5225_v3, %v5222_v5 }
0x1acd   : > { %v5350_v58 = vmul.f32 %v5348_v17, %v5226_v22 }
0x1af4   : > { %5233 = vxpose.xlu1.b32.start.end [1/1] (short) (narrow) %v6276_v51, 16 }
0x1b3d   : > { %v5358_v12 = vpop.permute.xlu1 %5357 }
0x1b3e   : > { %v5360_v28 = vsel %vm750_vm2, %v5350_v58, %v5358_v12 }
0x1b3f   : > { %5361 = vxpose.xlu0.b32.start.end [1/1] (short) (narrow) %v5360_v28, 64 }
0x1b68   : > { %7169 = vset.pattern.permute.xlu0 %v7561_v49 }
0x1b74   : > { %v5249_v59 = vpop.trf.xlu1 }
0x1b75   : > { %6829 = vmatprep.mubr.msk.f32.mxu0 %vm1143_vm5, %v5249_v59 }
0x1b78   : > { %v5250_v30 = vpop.trf.xlu1 }
0x1b79   : > { %6830 = vmatmul.mubr.msk.f32.vlgmr.msra.gmra.mrb[26].mxu0 %vm1143_vm5, %v5250_v30 }
0x1b7a   : > { %6833 = vmatpush3.msra.mxu0 %v8886_v18 }
0x1b7b   : > { %7078 = vmatprep.subr.bf16.mxu0 %v7562_v50 }
0x1bbf   : > { %v5377_v41 = vpop.trf.xlu0 }
0x1bc0   : > { %6834 = vmatprep.mubr.msk.f32.mxu0 %vm1143_vm5, %v5377_v41 }
0x1bc3   : > { %v5378_v2 = vpop.trf.xlu0 }
0x1bc4   : > { %6835 = vmatmul.mubr.msk.f32.vlgmr.msra.gmra.mrb[28].mxu0 %vm1143_vm5, %v5378_v2 }
0x1bc7   : > { %v5379_v11 = vpop.trf.xlu0 }
0x1bc8   : > { %6837 = vmatprep.mubr.msk.f32.mxu0 %vm1143_vm5, %v5379_v11 }
0x1bcb   : > { %v5380_v49 = vpop.trf.xlu0 }
0x1bcc   : > { %6838 = vmatmul.mubr.msk.f32.gmra.mrb[30].mxu0 %vm1143_vm5, %v5380_v49 }
0x1bcf   : > { %v5381_v32 = vpop.trf.xlu0 }
0x1bd0   : > { %6840 = vmatprep.mubr.msk.f32.mxu0 %vm1143_vm5, %v5381_v32  ;;  %v970_v32 = vrot.slane %v7855_v15, 1 }
0x1bd3   : > { %v5382_v6 = vpop.trf.xlu0 }
0x1bd4   : > { %6841 = vmatmul.mubr.msk.f32.gmra.mrb[32].mxu0 %vm1143_vm5, %v5382_v6 }
0x1bd7   : > { %v5383_v18 = vpop.trf.xlu0 }
0x1bd8   : > { %6843 = vmatprep.mubr.msk.f32.mxu0 %vm1143_vm5, %v5383_v18  ;;  %v990_v18 = vrot.slane %v7855_v15, 6 }
0x1bdb   : > { %v5384_v20 = vpop.trf.xlu0 }
0x1bdc   : > { %6844 = vmatmul.mubr.msk.f32.gmra.mrb[34].mxu0 %vm1143_vm5, %v5384_v20  ;;  %v1760_v20 = vrot.slane %v8387_v26, 1 }
0x1bdd   : > { %6862 = vmatprep.mubr.msk.f32.mxu0 %vm7563_vm4, %v7564_v55 }
0x1c4c   : > { %v6831_v51 = vpop.f32.mrb[26].mxu0 }
0x1c4d   : > { %v5337_v52 = vpop.f32.mrb[27].mxu0  ;;  %v8930_v13 = vadd.f32 %v6831_v51, %v8883_v47  ;;  %v1768_v51 = vrot.slane %v8387_v26, 3 }
0x1c4e   : > { %v8977_v2 = vadd.f32 %v5337_v52, %v8880_v33  ;;  %v982_v33 = vrot.slane %v7855_v15, 4  ;;  %v1776_v52 = vrot.slane %v8387_v26, 5 }
0x1c4f   : > { %v5653_v40 = vmul.f32 %v8930_v13, %v8930_v13 }
0x1c51   : > { %v5657_v57 = vsel %vm750_vm2, %v5653_v40, 0.0  ;;  %v3327_v40 = vrot.slane %v8554_v14, 3 }
0x1c97   : > { %v6836_v37 = vpop.f32.mrb[28].mxu0 }
0x1c98   : > { %v8927_v1 = vadd.f32 %v6836_v37, %v8823_v62  ;;  %v5483_v42 = vpop.f32.mrb[29].mxu0  ;;  %v1784_v37 = vrot.slane %v8387_v26, 7 }
0x1c99   : > { %v8933_v48 = vadd.f32 %v5483_v42, %v8826_v9  ;;  %v2548_v42 = vrot.slane %v8397_v16, 2 }
0x1c9a   : > { %v5533_v29 = vmul.f32 %v8927_v1, %v8927_v1 }
0x1c9b   : > { %v5532_v35 = vmul.f32 %v8933_v48, %v8933_v48 }
0x1c9c   : > { %v5543_v55 = vsel %vm667_vm0, %v5533_v29, 0.0  ;;  %v2556_v29 = vrot.slane %v8397_v16, 4 }
0x1c9d   : > { %5544 = vadd.xlane.f32.xlu1 %v5543_v55  ;;  %v5540_v62 = vsel %vm667_vm0, %v5532_v35, 0.0  ;;  %v2564_v35 = vrot.slane %v8397_v16, 6  ;;  %v3319_v55 = vrot.slane %v8554_v14, 1 }
0x1c9e   : > { %5541 = vadd.xlane.f32.xlu0 %v5540_v62  ;;  %v3335_v62 = vrot.slane %v8554_v14, 5 }
0x1c9f   : > { %v6839_v47 = vpop.f32.mrb[30].mxu0 }
0x1ca0   : > { %v8944_v61 = vadd.f32 %v6839_v47, %v8840_v44  ;;  %v5493_v9 = vpop.f32.mrb[31].mxu0  ;;  %v3343_v47 = vrot.slane %v8554_v14, 7 }
0x1ca1   : > { %v8947_v46 = vadd.f32 %v5493_v9, %v8837_v60  ;;  %v3530_v9 = vrot.slane %v8565_v27, 2 }
0x1ca2   : > { %v5535_v39 = vmul.f32 %v8944_v61, %v8944_v61  ;;  %5658 = vadd.xlane.f32.xlu0 %v5657_v57  ;;  %v3538_v57 = vrot.slane %v8565_v27, 4 }
0x1ca3   : > { %v5534_v63 = vmul.f32 %v8947_v46, %v8947_v46 }
0x1ca4   : > { %v5549_v5 = vsel %vm667_vm0, %v5535_v39, 0.0  ;;  %v3546_v39 = vrot.slane %v8565_v27, 6 }
0x1ca5   : > { %5550 = vadd.xlane.f32.xlu1 %v5549_v5  ;;  %v5546_v60 = vsel %vm667_vm0, %v5534_v63, 0.0  ;;  %v4313_v63 = vrot.slane %v8740_v10, 1  ;;  %v4321_v5 = vrot.slane %v8740_v10, 3 }
0x1ca7   : > { %v6842_v45 = vpop.f32.mrb[32].mxu0 }
0x1ca8   : > { %v8956_v44 = vadd.f32 %v6842_v45, %v8854_v38  ;;  %v5503_v3 = vpop.f32.mrb[33].mxu0  ;;  %v4329_v45 = vrot.slane %v8740_v10, 5 }
0x1ca9   : > { %v8960_v22 = vadd.f32 %v5503_v3, %v8851_v56  ;;  %5547 = vadd.xlane.f32.xlu1 %v5546_v60  ;;  %v4337_v3 = vrot.slane %v8740_v10, 7  ;;  %v5101_v60 = vrot.slane %v8907_v19, 2 }
0x1caa   : > { %v5537_v17 = vmul.f32 %v8956_v44, %v8956_v44 }
0x1cab   : > { %v5536_v58 = vmul.f32 %v8960_v22, %v8960_v22 }
0x1cac   : > { %v5555_v12 = vsel %vm667_vm0, %v5537_v17, 0.0  ;;  %v5109_v17 = vrot.slane %v8907_v19, 4 }
0x1cad   : > { %5556 = vadd.xlane.f32.xlu1 %v5555_v12  ;;  %v5552_v38 = vsel %vm667_vm0, %v5536_v58, 0.0  ;;  %v5117_v58 = vrot.slane %v8907_v19, 6 }
0x1caf   : > { %v6845_v28 = vpop.f32.mrb[34].mxu0 }
0x1cb0   : > { %v5513_v59 = vpop.f32.mrb[35].mxu0  ;;  %v8969_v30 = vadd.f32 %v6845_v28, %v8868_v4 }
0x1cb1   : > { %v8972_v56 = vadd.f32 %v5513_v59, %v8865_v54  ;;  %5553 = vadd.xlane.f32.xlu1 %v5552_v38  ;;  %v5652_v54 = vmul.f32 %v8977_v2, %v8977_v2 }
0x1cb2   : > { %v5539_v11 = vmul.f32 %v8969_v30, %v8969_v30 }
0x1cb3   : > { %v5538_v41 = vmul.f32 %v8972_v56, %v8972_v56  ;;  %v5654_v6 = vsel %vm750_vm2, %v5652_v54, 0.0 }
0x1cb4   : > { %v5561_v4 = vsel %vm667_vm0, %v5539_v11, 0.0 }
0x1cb5   : > { %v5558_v49 = vsel %vm667_vm0, %v5538_v41, 0.0 }
0x1cb6   : > { %5559 = vadd.xlane.f32.xlu1 %v5558_v49 }
0x1cb8   : > { %971 = vrot.lane.b32.xlu0 %v970_v32, %s7568_s22 }
0x1cba   : > { %5562 = vadd.xlane.f32.xlu1 %v5561_v4 }
0x1cbc   : > { %983 = vrot.lane.b32.xlu0 %v982_v33, %s7569_s23 }
0x1cbe   : > { %5655 = vadd.xlane.f32.xlu1 %v5654_v6 }
0x1cc0   : > { %991 = vrot.lane.b32.xlu0 %v990_v18, %s7565_s17 }
0x1cc4   : > { %1761 = vrot.lane.b32.xlu0 %v1760_v20, %s7568_s22 }
0x1cc8   : > { %1769 = vrot.lane.b32.xlu0 %v1768_v51, %s7570_s8 }
0x1ccc   : > { %1777 = vrot.lane.b32.xlu0 %v1776_v52, %s7571_s9 }
0x1cd0   : > { %1785 = vrot.lane.b32.xlu0 %v1784_v37, %s7572_s14 }
0x1cd4   : > { %2549 = vrot.lane.b32.xlu0 %v2548_v42, %s7567_s16 }
0x1cd8   : > { %2557 = vrot.lane.b32.xlu0 %v2556_v29, %s7569_s23 }
0x1cdc   : > { %2565 = vrot.lane.b32.xlu0 %v2564_v35, %s7565_s17 }
0x1ce0   : > { %3320 = vrot.lane.b32.xlu0 %v3319_v55, %s7568_s22 }
0x1ce4   : > { %3328 = vrot.lane.b32.xlu0 %v3327_v40, %s7570_s8 }
0x1ce8   : > { %3336 = vrot.lane.b32.xlu0 %v3335_v62, %s7571_s9 }
0x1cec   : > { %3344 = vrot.lane.b32.xlu0 %v3343_v47, %s7572_s14 }
0x1cf0   : > { %3531 = vrot.lane.b32.xlu0 %v3530_v9, %s7567_s16 }
0x1cf4   : > { %3539 = vrot.lane.b32.xlu0 %v3538_v57, %s7569_s23 }
0x1cf8   : > { %3547 = vrot.lane.b32.xlu0 %v3546_v39, %s7565_s17 }
0x1cfc   : > { %4314 = vrot.lane.b32.xlu0 %v4313_v63, %s7568_s22 }
0x1d00   : > { %4322 = vrot.lane.b32.xlu0 %v4321_v5, %s7570_s8 }
0x1d04   : > { %4330 = vrot.lane.b32.xlu0 %v4329_v45, %s7571_s9 }
0x1d08   : > { %4338 = vrot.lane.b32.xlu0 %v4337_v3, %s7572_s14 }
0x1d0c   : > { %5102 = vrot.lane.b32.xlu0 %v5101_v60, %s7567_s16 }
0x1d10   : > { %5110 = vrot.lane.b32.xlu0 %v5109_v17, %s7569_s23 }
0x1d14   : > { %5118 = vrot.lane.b32.xlu0 %v5117_v58, %s7565_s17 }
0x1d2a   : > { %v5545_v12 = vpop.xlane.xlu1 %5544 }
0x1d2b   : > { %7442 = vrsqrt.f32 %v5545_v12  ;;  %v5542_v28 = vpop.xlane.xlu0 %5541  ;;  %vm5573_vm4 = vcmp.eq.f32.partialorder %v5545_v12, inf  ;;  %v5576_v32 = vand.u32 2147483648, %v5545_v12  ;;  %vm5575_vm5 = vcmp.eq.f32.partialorder %v5545_v12, 0.0 }
0x1d2c   : > { %7444 = vrsqrt.f32 %v5542_v28  ;;  %vm5566_vm6 = vcmp.eq.f32.partialorder %v5542_v28, inf  ;;  %v5569_v6 = vand.u32 2147483648, %v5542_v28  ;;  %vm5568_vm7 = vcmp.eq.f32.partialorder %v5542_v28, 0.0 }
0x1d2f   : > { %v9034_v4 = vpop.xlane.xlu0 %5658 }
0x1d32   : > { %v5551_v59 = vpop.xlane.xlu1 %5550 }
0x1d33   : > { %7446 = vrsqrt.f32 %v5551_v59  ;;  %vm5587_vm8 = vcmp.eq.f32.partialorder %v5551_v59, inf  ;;  %v5590_v40 = vand.u32 2147483648, %v5551_v59  ;;  %vm5589_vm9 = vcmp.eq.f32.partialorder %v5551_v59, 0.0 }
0x1d35   : > { %v7443_v38 = vpop.eup %7442 }
0x1d36   : > { %v7445_v41 = vpop.eup %7444  ;;  %v5572_v11 = vmul.f32 %v7443_v38, %v5545_v12  ;;  %v5548_v49 = vpop.xlane.xlu1 %5547 }
0x1d37   : > { %v5565_v54 = vmul.f32 %v7445_v41, %v5542_v28  ;;  %7448 = vrsqrt.f32 %v5548_v49  ;;  %vm5580_vm10 = vcmp.eq.f32.partialorder %v5548_v49, inf  ;;  %v5583_v63 = vand.u32 2147483648, %v5548_v49 }
0x1d38   : > { %v5574_v33 = vsel %vm5573_vm4, %v5545_v12, %v5572_v11  ;;  %7450 = vrsqrt.f32 %v9034_v4  ;;  %vm5582_vm11 = vcmp.eq.f32.partialorder %v5548_v49, 0.0  ;;  %vm5669_vm4 = vcmp.eq.f32.partialorder %v9034_v4, inf }
0x1d39   : > { %v5577_v18 = vsel %vm5575_vm5, %v5576_v32, %v5574_v33  ;;  %v5567_v20 = vsel %vm5566_vm6, %v5542_v28, %v5565_v54  ;;  %vm5671_vm5 = vcmp.eq.f32.partialorder %v9034_v4, 0.0 }
0x1d3a   : > { %v5621_v51 = vadd.f32 1e-05, %v5577_v18  ;;  %v5570_v52 = vsel %vm5568_vm7, %v5569_v6, %v5567_v20  ;;  %v5557_v37 = vpop.xlane.xlu1 %5556 }
0x1d3b   : > { %v5620_v42 = vadd.f32 1e-05, %v5570_v52  ;;  %7452 = vrsqrt.f32 %v5557_v37  ;;  %vm5601_vm12 = vcmp.eq.f32.partialorder %v5557_v37, inf  ;;  %vm5603_vm13 = vcmp.eq.f32.partialorder %v5557_v37, 0.0 }
0x1d3c   : > { %7454 = vrcp.f32 %v5621_v51 }
0x1d3d   : > { %v7447_v29 = vpop.eup %7446  ;;  %7456 = vrcp.f32 %v5620_v42 }
0x1d3e   : > { %v5586_v35 = vmul.f32 %v7447_v29, %v5551_v59  ;;  %v5554_v55 = vpop.xlane.xlu1 %5553 }
0x1d3f   : > { %7458 = vrsqrt.f32 %v5554_v55  ;;  %vm5594_vm14 = vcmp.eq.f32.partialorder %v5554_v55, inf  ;;  %v5597_v52 = vand.u32 2147483648, %v5554_v55  ;;  %vm5596_vm15 = vcmp.eq.f32.partialorder %v5554_v55, 0.0 }
0x1d40   : > { %v5588_v62 = vsel %vm5587_vm8, %v5551_v59, %v5586_v35  ;;  %v5604_v59 = vand.u32 2147483648, %v5557_v37 }
0x1d41   : > { %v7449_v47 = vpop.eup %7448  ;;  %v5591_v9 = vsel %vm5589_vm9, %v5590_v40, %v5588_v62 }
0x1d42   : > { %v5623_v57 = vadd.f32 1e-05, %v5591_v9  ;;  %v5579_v39 = vmul.f32 %v7449_v47, %v5548_v49  ;;  %v7451_v45 = vpop.eup %7450 }
0x1d43   : > { %v5560_v5 = vpop.xlane.xlu1 %5559  ;;  %v5668_v6 = vmul.f32 %v7451_v45, %v9034_v4 }
0x1d44   : > { %7460 = vrcp.f32 %v5623_v57  ;;  %v5581_v3 = vsel %vm5580_vm10, %v5548_v49, %v5579_v39  ;;  %vm5608_vm6 = vcmp.eq.f32.partialorder %v5560_v5, inf  ;;  %v5611_v9 = vand.u32 2147483648, %v5560_v5 }
0x1d45   : > { %v7453_v60 = vpop.eup %7452  ;;  %v5584_v17 = vsel %vm5582_vm11, %v5583_v63, %v5581_v3  ;;  %7462 = vrsqrt.f32 %v5560_v5  ;;  %v5670_v40 = vsel %vm5669_vm4, %v9034_v4, %v5668_v6  ;;  %vm5610_vm7 = vcmp.eq.f32.partialorder %v5560_v5, 0.0 }
0x1d46   : > { %v7455_v58 = vpop.eup %7454  ;;  %v5622_v12 = vadd.f32 1e-05, %v5584_v17  ;;  %v5600_v28 = vmul.f32 %v7453_v60, %v5557_v37 }
0x1d47   : > { %v7457_v38 = vpop.eup %7456  ;;  %v5563_v41 = vpop.xlane.xlu1 %5562  ;;  %v5637_v11 = vmul.f32 %v7455_v58, %v8927_v1 }
0x1d48   : > { %7464 = vrcp.f32 %v5622_v12  ;;  %v5602_v32 = vsel %vm5601_vm12, %v5557_v37, %v5600_v28  ;;  %v5636_v49 = vmul.f32 %v7457_v38, %v8933_v48  ;;  %vm5615_vm8 = vcmp.eq.f32.partialorder %v5563_v41, inf }
0x1d49   : > { %v7459_v54 = vpop.eup %7458  ;;  %v5605_v33 = vsel %vm5603_vm13, %v5604_v59, %v5602_v32  ;;  %7466 = vrsqrt.f32 %v5563_v41  ;;  %v5645_v51 = vmul.f32 %v5637_v11, %v8033_v36  ;;  %v5672_v36 = vand.u32 2147483648, %v9034_v4 }
0x1d4a   : > { %v5625_v18 = vadd.f32 1e-05, %v5605_v33  ;;  %v5593_v20 = vmul.f32 %v7459_v54, %v5554_v55  ;;  %v5644_v29 = vmul.f32 %v5636_v49, %v8017_v25  ;;  %v5618_v4 = vand.u32 2147483648, %v5563_v41 }
0x1d4b   : > { %v5656_v42 = vpop.xlane.xlu1 %5655  ;;  %vm5617_vm9 = vcmp.eq.f32.partialorder %v5563_v41, 0.0  ;;  %vm1004_vm12 = vcmask 654336   ;;  %vm1006_vm13 = vcmask 785408  }
0x1d4c   : > { %7468 = vrcp.f32 %v5625_v18  ;;  %v5595_v1 = vsel %vm5594_vm14, %v5554_v55, %v5593_v20  ;;  %v7079_v35 = vpack.c.bf16 %v5645_v51, %v5644_v29  ;;  %v5673_v55 = vsel %vm5671_vm5, %v5672_v36, %v5670_v40 }
0x1d4d   : > { %v5598_v37 = vsel %vm5596_vm15, %v5597_v52, %v5595_v1  ;;  %7470 = vrsqrt.f32 %v5656_v42  ;;  %v5675_v17 = vadd.f32 1e-05, %v5673_v55  ;;  %vm5662_vm10 = vcmp.eq.f32.partialorder %v5656_v42, inf }
0x1d4e   : > { %v7461_v48 = vpop.eup %7460  ;;  %v5624_v62 = vadd.f32 1e-05, %v5598_v37  ;;  %7081 = vmatpush3.bf16.xpose.msk.msra.mxu0 %vm7723_vm1, %v7079_v35  ;;  %vm5664_vm11 = vcmp.eq.f32.partialorder %v5656_v42, 0.0  ;;  %v2544_v36 = vrot.slane %v8397_v16, 1  ;;  %v2560_v55 = vrot.slane %v8397_v16, 5 }
0x1d4f   : > { %v7463_v47 = vpop.eup %7462  ;;  %7082 = vmatprep.subr.bf16.mxu0 %v7562_v50  ;;  %v5639_v57 = vmul.f32 %v7461_v48, %v8944_v61  ;;  %vm1008_vm14 = vcmask 916480  }
0x1d50   : > { %7472 = vrcp.f32 %v5624_v62  ;;  %v5607_v25 = vmul.f32 %v7463_v47, %v5560_v5  ;;  %v1780_v47 = vrot.slane %v8387_v26, 6 }
0x1d51   : > { %v5647_v38 = vmul.f32 %v5639_v57, %v8073_v43  ;;  %v3323_v57 = vrot.slane %v8554_v14, 2 }
0x1d52   : > { %v7465_v39 = vpop.eup %7464  ;;  %v5609_v63 = vsel %vm5608_vm6, %v5560_v5, %v5607_v25  ;;  %v2552_v25 = vrot.slane %v8397_v16, 3 }
0x1d53   : > { %v7467_v45 = vpop.eup %7466  ;;  %v5612_v3 = vsel %vm5610_vm7, %v5611_v9, %v5609_v63  ;;  %v5638_v60 = vmul.f32 %v7465_v39, %v8947_v46  ;;  %v5665_v46 = vand.u32 2147483648, %v5656_v42  ;;  %v2568_v9 = vrot.slane %v8397_v16, 7 }
0x1d54   : > { %v5626_v58 = vadd.f32 1e-05, %v5612_v3  ;;  %v5614_v12 = vmul.f32 %v7467_v45, %v5563_v41  ;;  %v3331_v39 = vrot.slane %v8554_v14, 4  ;;  %v3339_v63 = vrot.slane %v8554_v14, 6 }
0x1d55   : > { %v5646_v28 = vmul.f32 %v5638_v60, %v8097_v0  ;;  %v3526_v45 = vrot.slane %v8565_v27, 1  ;;  %v3534_v3 = vrot.slane %v8565_v27, 3  ;;  %v3542_v60 = vrot.slane %v8565_v27, 5 }
0x1d56   : > { %v7469_v59 = vpop.eup %7468  ;;  %7474 = vrcp.f32 %v5626_v58  ;;  %v5616_v11 = vsel %vm5615_vm8, %v5563_v41, %v5614_v12  ;;  %v4317_v58 = vrot.slane %v8740_v10, 2  ;;  %v972_v12 = vpop.permute.xlu0 %971 }
0x1d57   : > { %v7471_v61 = vpop.eup %7470  ;;  %v5619_v32 = vsel %vm5617_vm9, %v5618_v4, %v5616_v11  ;;  %v7083_v5 = vpack.c.bf16 %v5647_v38, %v5646_v28  ;;  %7476 = vrcp.f32 %v5675_v17  ;;  %v5641_v49 = vmul.f32 %v7469_v59, %v8956_v44 }
0x1d58   : > { %v5627_v54 = vadd.f32 1e-05, %v5619_v32  ;;  %v5661_v33 = vmul.f32 %v7471_v61, %v5656_v42  ;;  %v3550_v17 = vrot.slane %v8565_v27, 7  ;;  %v4325_v4 = vrot.slane %v8740_v10, 4 }
0x1d59   : > { %7085 = vmatpush3.bf16.xpose.msk.msra.mxu0 %vm7723_vm1, %v7083_v5  ;;  %v5649_v51 = vmul.f32 %v5641_v49, %v8138_v21  ;;  %v4333_v59 = vrot.slane %v8740_v10, 6  ;;  %v5097_v11 = vrot.slane %v8907_v19, 1  ;;  %v5105_v32 = vrot.slane %v8907_v19, 3 }
0x1d5a   : > { %v7473_v0 = vpop.eup %7472  ;;  %7478 = vrcp.f32 %v5627_v54  ;;  %v5663_v43 = vsel %vm5662_vm10, %v5656_v42, %v5661_v33  ;;  %7086 = vmatprep.subr.bf16.mxu0 %v7562_v50  ;;  %v984_v38 = vpop.permute.xlu0 %983  ;;  %v5113_v33 = vrot.slane %v8907_v19, 5  ;;  %v5121_v49 = vrot.slane %v8907_v19, 7 }
0x1d5b   : > { %v5666_v41 = vsel %vm5664_vm11, %v5665_v46, %v5663_v43  ;;  %v5640_v6 = vmul.f32 %v7473_v0, %v8960_v22 }
0x1d5c   : > { %v5674_v18 = vadd.f32 1e-05, %v5666_v41 }
0x1d5d   : > { %v5648_v20 = vmul.f32 %v5640_v6, %v8140_v24 }
0x1d5e   : > { %7480 = vrcp.f32 %v5674_v18  ;;  %v992_v61 = vpop.permute.xlu0 %991 }
0x1d5f   : > { %v7087_v52 = vpack.c.bf16 %v5649_v51, %v5648_v20 }
0x1d60   : > { %v7475_v29 = vpop.eup %7474 }
0x1d61   : > { %7089 = vmatpush3.bf16.xpose.msk.msra.mxu0 %vm7723_vm1, %v7087_v52  ;;  %v7477_v44 = vpop.eup %7476  ;;  %v5642_v42 = vmul.f32 %v7475_v29, %v8972_v56 }
0x1d62   : > { %7090 = vmatprep.subr.bf16.mxu0 %v7562_v50  ;;  %v5679_v21 = vmul.f32 %v7477_v44, %v8930_v13  ;;  %v1762_v54 = vpop.permute.xlu0 %1761  ;;  %v998_v44 = vsel %vm667_vm0, %v7855_v15, %v972_v12 }
0x1d63   : > { %v5650_v37 = vmul.f32 %v5642_v42, %v8173_v31  ;;  %v6290_v31 = vld [vmem:[%s7713_s19 + $0x38] sm:$0xff]  ;;  %s6099_s19 = sshll.u32 %s7702_s11, 3 }
0x1d64   : > { %v7479_v1 = vpop.eup %7478  ;;  %v5681_v56 = vmul.f32 %v5679_v21, %v8199_v23  ;;  %v994_v23 = vrot.slane %v7855_v15, 7  ;;  %s9143_s15 = scalar_lea.vmem [#allocation6], %s6099_s19 }
0x1d65   : > { %v5643_v22 = vmul.f32 %v7479_v1, %v8969_v30  ;;  %v1764_v30 = vrot.slane %v8387_v26, 2  ;;  %s5921_s18 = sshll.u32 %s9143_s15, 4  ;;  %s9214_s18 = int_to_ptr.vmem [resolvable:$true] %s5921_s18 }
0x1d66   : > { %v1770_v0 = vpop.permute.xlu0 %1769 }
0x1d67   : > { %v5651_v24 = vmul.f32 %v5643_v22, %v8171_v8 }
0x1d68   : > { %v7481_v35 = vpop.eup %7480 }
0x1d69   : > { %v7091_v48 = vpack.c.bf16 %v5651_v24, %v5650_v37  ;;  %v5678_v40 = vmul.f32 %v7481_v35, %v8977_v2  ;;  %v1772_v2 = vrot.slane %v8387_v26, 4 }
0x1d6a   : > { %v1778_v43 = vpop.permute.xlu0 %1777 }
0x1d6b   : > { %7093 = vmatpush3.bf16.xpose.msk.msra.mxu0 %vm7723_vm1, %v7091_v48  ;;  %v5680_v50 = vmul.f32 %v5678_v40, %v8201_v7  ;;  %v978_v7 = vrot.slane %v7855_v15, 3  ;;  %vm1000_vm1 = vcmask 392192  }
0x1d6d   : > { %v7095_v62 = vpack.c.bf16 %v5681_v56, %v5680_v50  ;;  %v1788_v56 = vsel %vm667_vm0, %v8387_v26, %v1762_v54 }
0x1d6e   : > { %v1786_v6 = vpop.permute.xlu0 %1785 }
0x1d6f   : > { %7097 = vmatpush3.bf16.xpose.msk.msra.mxu1 %vm7826_vm3, %v7095_v62  ;;  %vm1002_vm3 = vcmask 523264  }
0x1d72   : > { %6863 = vmatmul.mubr.msk.f32.vlgmr.msra.gmra.mrb[36].mxu0 %vm667_vm0, %v6290_v31  ;;  %v2550_v52 = vpop.permute.xlu0 %2549 }
0x1d76   : > { %v2558_v22 = vpop.permute.xlu0 %2557 }
0x1d7a   : > { %v2566_v48 = vpop.permute.xlu0 %2565 }
0x1d7e   : > { %v3321_v31 = vpop.permute.xlu0 %3320 }
0x1e45   : > { %v9077_v8 = vpop.f32.mrb[36].mxu0 }
0x1e46   : > { %5788 = vrot.lane.b32.xlu1 %v9077_v8, %s7565_s17  ;;  %v6864_v13 = vpop.f32.mrb[37].mxu0  ;;  %v6300_v28 = vmul.f32 -1.442695, %v9077_v8 }
0x1e48   : > { %7482 = vpow2.f32 %v6300_v28 }
0x1e4a   : > { %975 = vrot.lane.b32.xlu1 %v974_v34, %s7567_s16 }
0x1e4e   : > { %979 = vrot.lane.b32.xlu1 %v978_v7, %s7570_s8 }
0x1e52   : > { %987 = vrot.lane.b32.xlu1 %v986_v53, %s7571_s9  ;;  %v7483_v5 = vpop.eup %7482  ;;  %v3329_v53 = vpop.permute.xlu0 %3328 }
0x1e53   : > { %v5783_v46 = vadd.f32 1.0, %v7483_v5 }
0x1e55   : > { %7484 = vrcp.f32 %v5783_v46 }
0x1e56   : > { %995 = vrot.lane.b32.xlu1 %v994_v23, %s7572_s14 }
0x1e5a   : > { %1765 = vrot.lane.b32.xlu1 %v1764_v30, %s7567_s16 }
0x1e5e   : > { %1773 = vrot.lane.b32.xlu1 %v1772_v2, %s7569_s23 }
0x1e5f   : > { %v7485_v41 = vpop.eup %7484 }
0x1e60   : > { %v5786_v18 = vmul.f32 %v7485_v41, %v9077_v8 }
0x1e62   : > { %1781 = vrot.lane.b32.xlu1 %v1780_v47, %s7565_s17 }
0x1e66   : > { %2545 = vrot.lane.b32.xlu1 %v2544_v36, %s7568_s22  ;;  %v3337_v36 = vpop.permute.xlu0 %3336 }
0x1e6a   : > { %2553 = vrot.lane.b32.xlu1 %v2552_v25, %s7570_s8 }
0x1e6e   : > { %2561 = vrot.lane.b32.xlu1 %v2560_v55, %s7571_s9 }
0x1e72   : > { %2569 = vrot.lane.b32.xlu1 %v2568_v9, %s7572_s14 }
0x1e76   : > { %3324 = vrot.lane.b32.xlu1 %v3323_v57, %s7567_s16 }
0x1e7a   : > { %3332 = vrot.lane.b32.xlu1 %v3331_v39, %s7569_s23  ;;  %v3345_v39 = vpop.permute.xlu0 %3344 }
0x1e7e   : > { %3340 = vrot.lane.b32.xlu1 %v3339_v63, %s7565_s17 }
0x1e82   : > { %3527 = vrot.lane.b32.xlu1 %v3526_v45, %s7568_s22 }
0x1e86   : > { %3535 = vrot.lane.b32.xlu1 %v3534_v3, %s7570_s8 }
0x1e8a   : > { %3543 = vrot.lane.b32.xlu1 %v3542_v60, %s7571_s9 }
0x1e8e   : > { %3551 = vrot.lane.b32.xlu1 %v3550_v17, %s7572_s14 }
0x1e92   : > { %4318 = vrot.lane.b32.xlu1 %v4317_v58, %s7567_s16  ;;  %v3532_v58 = vpop.permute.xlu0 %3531 }
0x1e96   : > { %4326 = vrot.lane.b32.xlu1 %v4325_v4, %s7569_s23 }
0x1e9a   : > { %4334 = vrot.lane.b32.xlu1 %v4333_v59, %s7565_s17 }
0x1e9e   : > { %5098 = vrot.lane.b32.xlu1 %v5097_v11, %s7568_s22 }
0x1ea2   : > { %5106 = vrot.lane.b32.xlu1 %v5105_v32, %s7570_s8 }
0x1ea6   : > { %5114 = vrot.lane.b32.xlu1 %v5113_v33, %s7571_s9 }
0x1eaa   : > { %5122 = vrot.lane.b32.xlu1 %v5121_v49, %s7572_s14 }
0x1eb8   : > { %v5789_v20 = vpop.permute.xlu1 %5788 }
0x1eb9   : > { %v5791_v51 = vmul.f32 %v5789_v20, %v5786_v18 }
0x1ebb   : > { %6870 = vmatmul.mubr.msk.f32.vlgmr.msra.gmra.mrb[64].mxu1 %vm750_vm2, %v5791_v51 }
0x1ebc   : > { %v976_v29 = vpop.permute.xlu1 %975 }
0x1ebd   : > { %v999_v42 = vsel %vm750_vm2, %v998_v44, %v976_v29 }
0x1ec0   : > { %v980_v1 = vpop.permute.xlu1 %979 }
0x1ec1   : > { %v1001_v37 = vsel %vm1000_vm1, %v999_v42, %v980_v1 }
0x1ec2   : > { %v1003_v24 = vsel %vm1002_vm3, %v1001_v37, %v984_v38  ;;  %v3540_v38 = vpop.permute.xlu0 %3539 }
0x1ec4   : > { %v988_v21 = vpop.permute.xlu1 %987 }
0x1ec5   : > { %v1005_v35 = vsel %vm1004_vm12, %v1003_v24, %v988_v21 }
0x1ec6   : > { %v1007_v40 = vsel %vm1006_vm13, %v1005_v35, %v992_v61  ;;  %v3548_v54 = vpop.permute.xlu0 %3547 }
0x1ec8   : > { %v996_v15 = vpop.permute.xlu1 %995 }
0x1ec9   : > { %v1009_v50 = vsel %vm1008_vm14, %v1007_v40, %v996_v15 }
0x1eca   : > { %1010 = vst [vmem:[%s9143_s15] sm:$0x1] %v1009_v50 }
0x1ecc   : > { %v1766_v62 = vpop.permute.xlu1 %1765 }
0x1ecd   : > { %v1789_v8 = vsel %vm750_vm2, %v1788_v56, %v1766_v62 }
0x1ece   : > { %v1790_v13 = vsel %vm1000_vm1, %v1789_v8, %v1770_v0  ;;  %v4315_v0 = vpop.permute.xlu0 %4314 }
0x1ecf   : > { %v4341_v1 = vsel %vm667_vm0, %v8740_v10, %v4315_v0 }
0x1ed0   : > { %v1774_v34 = vpop.permute.xlu1 %1773 }
0x1ed1   : > { %v1791_v7 = vsel %vm1002_vm3, %v1790_v13, %v1774_v34 }
0x1ed2   : > { %v1792_v23 = vsel %vm1004_vm12, %v1791_v7, %v1778_v43  ;;  %v4323_v51 = vpop.permute.xlu0 %4322 }
0x1ed4   : > { %v1782_v30 = vpop.permute.xlu1 %1781 }
0x1ed5   : > { %v1793_v2 = vsel %vm1006_vm13, %v1792_v23, %v1782_v30 }
0x1ed6   : > { %v1794_v47 = vsel %vm1008_vm14, %v1793_v2, %v1786_v6 }
0x1ed7   : > { %1795 = vst [vmem:[%s9143_s15 + $0x1] sm:$0x1] %v1794_v47 }
0x1ed8   : > { %v2546_v26 = vpop.permute.xlu1 %2545 }
0x1ed9   : > { %v2572_v25 = vsel %vm667_vm0, %v8397_v16, %v2546_v26  ;;  %v3347_v16 = vsel %vm667_vm0, %v8554_v14, %v3321_v31 }
0x1eda   : > { %v2573_v55 = vsel %vm750_vm2, %v2572_v25, %v2550_v52 }
0x1edc   : > { %v2554_v9 = vpop.permute.xlu1 %2553 }
0x1edd   : > { %v2574_v57 = vsel %vm1000_vm1, %v2573_v55, %v2554_v9 }
0x1ede   : > { %v2575_v63 = vsel %vm1002_vm3, %v2574_v57, %v2558_v22 }
0x1ee0   : > { %v2562_v45 = vpop.permute.xlu1 %2561 }
0x1ee1   : > { %v2576_v3 = vsel %vm1004_vm12, %v2575_v63, %v2562_v45 }
0x1ee2   : > { %v2577_v60 = vsel %vm1006_vm13, %v2576_v3, %v2566_v48 }
0x1ee4   : > { %v2570_v17 = vpop.permute.xlu1 %2569 }
0x1ee5   : > { %v2578_v12 = vsel %vm1008_vm14, %v2577_v60, %v2570_v17 }
0x1ee6   : > { %2579 = vst [vmem:[%s9143_s15 + $0x2] sm:$0x1] %v2578_v12 }
0x1ee8   : > { %v3325_v4 = vpop.permute.xlu1 %3324 }
0x1ee9   : > { %v3348_v28 = vsel %vm750_vm2, %v3347_v16, %v3325_v4 }
0x1eea   : > { %v3349_v59 = vsel %vm1000_vm1, %v3348_v28, %v3329_v53 }
0x1eec   : > { %v3333_v11 = vpop.permute.xlu1 %3332 }
0x1eed   : > { %v3350_v61 = vsel %vm1002_vm3, %v3349_v59, %v3333_v11 }
0x1eee   : > { %v3351_v32 = vsel %vm1004_vm12, %v3350_v61, %v3337_v36 }
0x1ef0   : > { %v3341_v5 = vpop.permute.xlu1 %3340 }
0x1ef1   : > { %v3352_v33 = vsel %vm1006_vm13, %v3351_v32, %v3341_v5 }
0x1ef2   : > { %v3353_v46 = vsel %vm1008_vm14, %v3352_v33, %v3345_v39 }
0x1ef3   : > { %3354 = vst [vmem:[%s9143_s15 + $0x3] sm:$0x1] %v3353_v46 }
0x1ef4   : > { %v3528_v14 = vpop.permute.xlu1 %3527 }
0x1ef5   : > { %v3554_v49 = vsel %vm667_vm0, %v8565_v27, %v3528_v14  ;;  %v4331_v27 = vpop.permute.xlu0 %4330 }
0x1ef6   : > { %v3555_v43 = vsel %vm750_vm2, %v3554_v49, %v3532_v58 }
0x1ef8   : > { %v3536_v41 = vpop.permute.xlu1 %3535 }
0x1ef9   : > { %v3556_v6 = vsel %vm1000_vm1, %v3555_v43, %v3536_v41  ;;  %v4339_v35 = vpop.permute.xlu0 %4338 }
0x1efa   : > { %v3557_v18 = vsel %vm1002_vm3, %v3556_v6, %v3540_v38 }
0x1efc   : > { %v3544_v20 = vpop.permute.xlu1 %3543 }
0x1efd   : > { %v3558_v52 = vsel %vm1004_vm12, %v3557_v18, %v3544_v20  ;;  %v5103_v62 = vpop.permute.xlu0 %5102 }
0x1efe   : > { %v3559_v29 = vsel %vm1006_vm13, %v3558_v52, %v3548_v54 }
0x1f00   : > { %v3552_v44 = vpop.permute.xlu1 %3551 }
0x1f01   : > { %v3560_v42 = vsel %vm1008_vm14, %v3559_v29, %v3552_v44  ;;  %v5111_v34 = vpop.permute.xlu0 %5110 }
0x1f02   : > { %6213 = vst [vmem:[%s9143_s15 + $0x4] sm:$0x1] %v3560_v42 }
0x1f04   : > { %v4319_v22 = vpop.permute.xlu1 %4318 }
0x1f05   : > { %v4342_v37 = vsel %vm750_vm2, %v4341_v1, %v4319_v22  ;;  %v5119_v2 = vpop.permute.xlu0 %5118 }
0x1f06   : > { %v4343_v24 = vsel %vm1000_vm1, %v4342_v37, %v4323_v51 }
0x1f08   : > { %v4327_v21 = vpop.permute.xlu1 %4326 }
0x1f09   : > { %v4344_v48 = vsel %vm1002_vm3, %v4343_v24, %v4327_v21 }
0x1f0a   : > { %v4345_v40 = vsel %vm1004_vm12, %v4344_v48, %v4331_v27 }
0x1f0c   : > { %v4335_v15 = vpop.permute.xlu1 %4334 }
0x1f0d   : > { %v4346_v50 = vsel %vm1006_vm13, %v4345_v40, %v4335_v15 }
0x1f0e   : > { %v4347_v56 = vsel %vm1008_vm14, %v4346_v50, %v4339_v35 }
0x1f0f   : > { %6244 = vst [vmem:[%s9143_s15 + $0x5] sm:$0x1] %v4347_v56 }
0x1f10   : > { %v5099_v10 = vpop.permute.xlu1 %5098 }
0x1f11   : > { %v5125_v31 = vsel %vm667_vm0, %v8907_v19, %v5099_v10 }
0x1f12   : > { %v5126_v8 = vsel %vm750_vm2, %v5125_v31, %v5103_v62 }
0x1f14   : > { %v5107_v13 = vpop.permute.xlu1 %5106 }
0x1f15   : > { %v5127_v7 = vsel %vm1000_vm1, %v5126_v8, %v5107_v13 }
0x1f16   : > { %v5128_v53 = vsel %vm1002_vm3, %v5127_v7, %v5111_v34 }
0x1f18   : > { %v5115_v23 = vpop.permute.xlu1 %5114 }
0x1f19   : > { %v5129_v30 = vsel %vm1004_vm12, %v5128_v53, %v5115_v23 }
0x1f1a   : > { %v5130_v47 = vsel %vm1006_vm13, %v5129_v30, %v5119_v2 }
0x1f1c   : > { %v5123_v26 = vpop.permute.xlu1 %5122 }
0x1f1d   : > { %v5131_v36 = vsel %vm1008_vm14, %v5130_v47, %v5123_v26 }
0x1f1e   : > { %6275 = vst [vmem:[%s9143_s15 + $0x6] sm:$0x1] %v5131_v36 }
0x1f8e   : > { %v5867_v25 = vpop.f32.mrb[64].mxu1 }
0x1f8f   : > { %v6871_v19 = vpop.f32.mrb[65].mxu1  ;;  %v5876_v55 = vrot.slane %v5867_v25, 2  ;;  %v5872_v9 = vrot.slane %v5867_v25, 1  ;;  %v5884_v57 = vrot.slane %v5867_v25, 4  ;;  %v5880_v39 = vrot.slane %v5867_v25, 3 }
0x1f90   : > { %v5892_v63 = vrot.slane %v5867_v25, 6  ;;  %v5888_v45 = vrot.slane %v5867_v25, 5  ;;  %v5896_v3 = vrot.slane %v5867_v25, 7 }
0x1f91   : > { %5877 = vrot.lane.b32.xlu1 %v5876_v55, %s7567_s16  ;;  %5873 = vrot.lane.b32.xlu0 %v5872_v9, %s7568_s22  ;;  %s5909_s16 = scalar_lea.sflag [#allocation7], %s7702_s11  ;;  %s7496_s22 = scalar_lea.vmem %s9214_s18, 128 }
0x1f92   : > { %p7497_p0 = scmp.ne.s32.totalorder %s9214_s18, %s7496_s22 }
0x1f94   : > { %p7498_p1 = pnand %p7497_p0, %p7659_p6 }
0x1f95   : > { %5885 = vrot.lane.b32.xlu1 %v5884_v57, %s7569_s23  ;;  %5881 = vrot.lane.b32.xlu0 %v5880_v39, %s7570_s8  ;;  %s7500_s8 = sshll.u32 %s7573_s28, 4  ;;  %s7501_s8 = int_to_ptr.vmem [resolvable:$false] %s7500_s8 }
0x1f96   : > { %p7499_p2 = pneg %p7498_p1  ;;  %p7503_p3 = scmp.lt.s32.totalorder %s9214_s18, %s7501_s8 }
0x1f99   : > { %5893 = vrot.lane.b32.xlu1 %v5892_v63, %s7565_s17  ;;  %5889 = vrot.lane.b32.xlu0 %v5888_v45, %s7571_s9  ;;  %s7502_s9 = scalar_lea.vmem %s7501_s8, 256 }
0x1f9a   : > { %p7504_p4 = scmp.lt.s32.totalorder %s7502_s9, %s7496_s22 }
0x1f9c   : > { %p7505_p5 = por %p7504_p4, %p7503_p3 }
0x1f9d   : > { %5897 = vrot.lane.b32.xlu0 %v5896_v3, %s7572_s14 }
0x1f9e   : > { %p7506_p7 = pnand %p7505_p5, %p7499_p2 }
0x2003   : > { %v5874_v60 = vpop.permute.xlu0 %5873  ;;  %v5878_v17 = vpop.permute.xlu1 %5877 }
0x2004   : > { %v5900_v58 = vsel %vm667_vm0, %v5867_v25, %v5874_v60 }
0x2005   : > { %v5901_v12 = vsel %vm750_vm2, %v5900_v58, %v5878_v17 }
0x2007   : > { %v5882_v16 = vpop.permute.xlu0 %5881  ;;  %v5886_v4 = vpop.permute.xlu1 %5885 }
0x2008   : > { %v5902_v28 = vsel %vm1000_vm1, %v5901_v12, %v5882_v16 }
0x2009   : > { %v5903_v38 = vsel %vm1002_vm3, %v5902_v28, %v5886_v4 }
0x200b   : > { %v5890_v59 = vpop.permute.xlu0 %5889  ;;  %v5894_v61 = vpop.permute.xlu1 %5893 }
0x200c   : > { %v5904_v11 = vsel %vm1004_vm12, %v5903_v38, %v5890_v59 }
0x200d   : > { %v5905_v32 = vsel %vm1006_vm13, %v5904_v11, %v5894_v61 }
0x200f   : > { %v5898_v5 = vpop.permute.xlu0 %5897 }
0x2010   : > { %v5906_v54 = vsel %vm1008_vm14, %v5905_v32, %v5898_v5 }
0x2011   : > { %6304 = vst [vmem:[%s9143_s15 + $0x7] sm:$0x1] %v5906_v54 }
0x2012   : > { %7509 = shalt.err (!%p7506_p7)
}
0x2013   : > { %s7510_s14 = scalar_lea.hbm %s9220_s29, 128  ;;  %s7514_s20 = scalar_lea.hbm %s9274_s7, 256 }
0x2014   : > { %p7511_p10 = scmp.ne.s32.totalorder %s9220_s29, %s7510_s14  ;;  %p7515_p13 = scmp.lt.u32.totalorder %s9220_s29, %s9274_s7 }
0x2015   : > { %p7516_p0 = scmp.lt.u32.totalorder %s7514_s20, %s7510_s14  ;;  %p7518_p2 = scmp.lt.u32.totalorder %s7510_s14, %s9220_s29 }
0x2016   : > { %p7512_p11 = pnand %p7511_p10, %p7659_p6 }
0x2017   : > { %p7517_p1 = por %p7516_p0, %p7515_p13 }
0x2018   : > { %p7513_p12 = pneg %p7512_p11 }
0x2019   : > { %p7519_p3 = por %p7518_p2, %p7517_p1 }
0x201b   : > { %p7520_p4 = pnand %p7519_p3, %p7513_p12 }
0x201d   : > { %7523 = shalt.err (!%p7520_p4)
}
0x201e   : > { %s7574_s22 = smov 128   ;;  %s7575_s28 = smov 4  }
0x201f   : > { %7098 = dma.vmem_to_hbm [thread:$0]  (%p7659_p6), %s9214_s18, 128, %s9220_s29, %s5909_s16, %s7569_s23, %s7574_s22, %s7575_s28  }
0x2020 PF: > { %s5936_s8 = sand.u32 1, %s7546_s24   ;;  %p7101_p5 = pnand %p6081_p9, %p7663_p8 }
0x2021   : > { %s5937_s9 = scalar_lea.sflag [#allocation7], %s5936_s8 }
0x2022   : > { %7541 = dma.done.wait (!%p7101_p5), %s5937_s9, 128  }
0x2023   : > { %7543 = vsyncadd (!%p7101_p5), %s5937_s9, 4294967168  ;;  %p17_p7 = scmp.ge.s32.totalorder %s7641_s30, 4   ;;  %s9282_s24 = smov %s7550_s25 }
0x2024   : > { %s9283_s25 = smov %s7554_s26  ;;  %s9284_s26 = smov %s7653_s10 }
0x2025   : > { %s9285_s27 = smov %s7641_s30  ;;  %19 = sbr.rel (!%p17_p7) target bundleno = 3 (0x3), region = 278 }
0x202c   :  { %5942 = vsyncpa [#allocation7], 1 }
0x202d   :  { %5944 = vsyncpa [#allocation7 + $0x1], 1 }

</bundles_post_ra>
